<compile_context>
chip_gen: v5e
topology: v5e:2x2
jax: 0.10.0
libtpu: 0.0.40
codegen_flags: <defaults>
</compile_context>

<pallas_src>
import functools

import numpy as np
import jax
import jax.numpy as jnp
from jax.experimental import pallas as pl
from jax.experimental.pallas import tpu as pltpu

_LANE = 128
_Y1_OFF = 32  # 8-aligned sublane offset of the y1 frame inside the VMEM scratch


def _ceil_to(x, m):
  return (x + m - 1) // m * m


# ----------------------------------------------------------------------------
# Pallas kernel: whole residual block (stride 1) for one image per grid step.
# ----------------------------------------------------------------------------
def _make_residual_kernel(H, W, use_1x1conv):
  """Flat-frame geometry (all static Python ints):

    Wp = W + 2            padded row width (1-px W halo each side)
    P  = (H + 3) * Wp     rows of the flat, spatially padded input x
    c0 = Wp + 1           flat row of interior pixel (0, 0)
    L  = H * Wp           rows of the computed output frame
  Output frame row o maps to interior pixel (i, j) via o = i*Wp + j; the two
  W-halo columns per image row are garbage and dropped by the wrapper.
  """
  Wp = W + 2
  c0 = Wp + 1
  L = H * Wp
  Q = _Y1_OFF
  S = _ceil_to(Q + L + Wp + 1, 8)  # y1 scratch rows (zero borders around frame)

  # Flat row offset of each of the nine 3x3 taps.
  taps = [(kh * 3 + kw, (kh - 1) * Wp + (kw - 1))
          for kh in range(3) for kw in range(3)]

  def conv3x3(src_ref, start, w_ref):
    # Per-tap accumulating matmuls (K = Cpad): no im2col matrix materialized.
    acc = None
    for t, off in taps:
      lhs = src_ref[pl.ds(start + off, L), :]                    # (L, Cin_p) bf16
      part = jnp.dot(lhs, w_ref[t], preferred_element_type=jnp.float32)
      acc = part if acc is None else acc + part
    return acc                                                   # (L, Cout_p) f32

  def kernel(*refs):
    if use_1x1conv:
      (x_ref, m_ref, w1_ref, s1_ref, t1_ref, w2_ref, s2_ref, t2_ref,
       w3_ref, b3_ref, o_ref, y1_scr) = refs
    else:
      (x_ref, m_ref, w1_ref, s1_ref, t1_ref, w2_ref, s2_ref, t2_ref,
       o_ref, y1_scr) = refs
      w3_ref = b3_ref = None

    cop = y1_scr.shape[1]

    # ---- conv1 (3x3) + folded BN1 + ReLU ----------------------------------
    acc1 = conv3x3(x_ref, c0, w1_ref)
    y1 = jnp.maximum(acc1 * s1_ref[...] + t1_ref[...], 0.0)
    # Zero the W-halo columns of the frame (conv2 expects zero padding there).
    y1 = y1 * m_ref[...]

    # Stage y1 in VMEM at an 8-aligned offset (unmasked store / tap reads).
    # Zero only the small top/bottom border strips, every step (NOT gated on
    # program_id: under megacore "parallel" each core owns its own scratch).
    y1_scr[pl.ds(0, Q), :] = jnp.zeros((Q, cop), y1_scr.dtype)
    y1_scr[pl.ds(Q + L, S - Q - L), :] = jnp.zeros((S - Q - L, cop),
                                                   y1_scr.dtype)
    y1_scr[pl.ds(Q, L), :] = y1.astype(y1_scr.dtype)

    # ---- conv2 (3x3) + folded BN2 ------------------------------------------
    acc2 = conv3x3(y1_scr, Q, w2_ref)
    y2 = acc2 * s2_ref[...] + t2_ref[...]

    # ---- shortcut (identity or fused 1x1 projection), add, final ReLU ------
    x_int = x_ref[pl.ds(c0, L), :]                               # (L, Cin_p) bf16
    if use_1x1conv:
      res = (jnp.dot(x_int, w3_ref[...], preferred_element_type=jnp.float32)
             + b3_ref[...])
    else:
      res = x_int.astype(jnp.float32)

    o_ref[...] = jnp.maximum(y2 + res, 0.0).astype(o_ref.dtype)  # bf16 writeback

  return kernel, S


# ----------------------------------------------------------------------------
# Wrapper: layout plumbing (NCHW boundary, lane-dense channel pad, BN folding).
# ----------------------------------------------------------------------------
def _fold_bn(conv_bias, gamma, beta, mean, var, eps=1e-5):
  scale = gamma / jnp.sqrt(var + eps)
  shift = (conv_bias - mean) * scale + beta
  return scale, shift


def _pad_vec(v, target):
  return jnp.pad(v, (0, target - v.shape[0])).reshape(1, target).astype(
      jnp.float32)


@functools.partial(jax.jit, static_argnames=("use_1x1conv", "stride"))
def residual_forward(x_nchw, p, *, use_1x1conv=False, stride=1):
  """Y = relu(bn1(conv1(X))); Y = bn2(conv2(Y)); X' = conv3(X) if any; relu(Y+X')."""
  if stride != 1:
    raise NotImplementedError("Pallas Residual kernel implements stride=1 only")
  N, Cin, H, W = x_nchw.shape
  Cout = p["w1"].shape[-1]
  if not use_1x1conv and Cin != Cout:
    raise ValueError("identity shortcut requires in_channels == out_channels")

  Wp = W + 2
  L = H * Wp
  P = (H + 3) * Wp
  Cp = _ceil_to(Cin, _LANE)
  Cop = _ceil_to(Cout, _LANE)

  # NCHW -> NHWC; one fused pad does bf16 cast + lane-dense channel pad + the
  # conv halo (1 top / 2 bottom / 1 left / 1 right).  Flattening the spatial
  # dims afterwards is free (contiguous).
  x = jnp.transpose(x_nchw, (0, 2, 3, 1)).astype(jnp.bfloat16)
  x = jnp.pad(x, ((0, 0), (1, 2), (1, 1), (0, Cp - Cin))).reshape(N, P, Cp)

  s1, t1 = _fold_bn(p["b1"], p["gamma1"], p["beta1"], p["mean1"], p["var1"])
  s2, t2 = _fold_bn(p["b2"], p["gamma2"], p["beta2"], p["mean2"], p["var2"])

  # Static W-halo column mask for the y1 frame (1 = interior column).
  col = (np.arange(L) + Wp + 1) % Wp
  mask = jnp.asarray(((col >= 1) & (col <= W)).astype(np.float32).reshape(L, 1))

  def prep_w3x3(w, cin_p, cout_p):   # HWIO -> (9, cin_p, cout_p) bf16
    w = jnp.pad(w, ((0, 0), (0, 0),
                    (0, cin_p - w.shape[2]), (0, cout_p - w.shape[3])))
    return w.reshape(9, cin_p, cout_p).astype(jnp.bfloat16)

  w1 = prep_w3x3(p["w1"], Cp, Cop)
  w2 = prep_w3x3(p["w2"], Cop, Cop)

  inputs = [x, mask, w1, _pad_vec(s1, Cop), _pad_vec(t1, Cop),
            w2, _pad_vec(s2, Cop), _pad_vec(t2, Cop)]

  def const_spec(shape):
    nd = len(shape)
    return pl.BlockSpec(shape, lambda n: (0,) * nd)

  in_specs = [
      pl.BlockSpec((None, P, Cp), lambda n: (n, 0, 0)),
      const_spec((L, 1)),
      const_spec((9, Cp, Cop)), const_spec((1, Cop)), const_spec((1, Cop)),
      const_spec((9, Cop, Cop)), const_spec((1, Cop)), const_spec((1, Cop)),
  ]
  if use_1x1conv:
    w3 = jnp.pad(p["w3"], ((0, Cp - Cin), (0, Cop - Cout))).astype(jnp.bfloat16)
    inputs += [w3, _pad_vec(p["b3"], Cop)]
    in_specs += [const_spec((Cp, Cop)), const_spec((1, Cop))]

  kernel, S = _make_residual_kernel(H, W, use_1x1conv)
  out = pl.pallas_call(
      kernel,
      out_shape=jax.ShapeDtypeStruct((N, L, Cop), jnp.bfloat16),
      grid_spec=pltpu.PrefetchScalarGridSpec(
          num_scalar_prefetch=0,
          grid=(N,),
          in_specs=in_specs,
          out_specs=pl.BlockSpec((None, L, Cop), lambda n: (n, 0, 0)),
          scratch_shapes=[pltpu.VMEM((S, Cop), jnp.bfloat16)],
      ),
      compiler_params=pltpu.CompilerParams(
          dimension_semantics=("parallel",)),
  )(*inputs)

  # Module-boundary plumbing only: the reshape is free; halo/channel un-pad,
  # NHWC->NCHW transpose and f32 cast fuse into a single XLA pass.
  out = out.reshape(N, H, Wp, Cop)[:, :, :W, :Cout]
  return jnp.transpose(out, (0, 3, 1, 2)).astype(jnp.float32)


# ----------------------------------------------------------------------------
# Pure-JAX reference (mimics the kernel's bf16 MXU inputs / bf16 output).
# ----------------------------------------------------------------------------
def _ref_residual(x_nchw, p, *, use_1x1conv=False, stride=1):
  q = lambda a: a.astype(jnp.bfloat16).astype(jnp.float32)
  x = jnp.transpose(x_nchw, (0, 2, 3, 1))

  def conv(inp, w, s, pad):
    return jax.lax.conv_general_dilated(
        q(inp), q(w), (s, s), ((pad, pad), (pad, pad)),
        dimension_numbers=("NHWC", "HWIO", "NHWC"))

  def bn(y, b, g, bta, m, v, eps=1e-5):
    sc = g / jnp.sqrt(v + eps)
    return y * sc + (b - m) * sc + bta

  y = jax.nn.relu(bn(conv(x, p["w1"], stride, 1),
                     p["b1"], p["gamma1"], p["beta1"], p["mean1"], p["var1"]))
  y = bn(conv(y, p["w2"], 1, 1),
         p["b2"], p["gamma2"], p["beta2"], p["mean2"], p["var2"])
  if use_1x1conv:
    res = conv(x, p["w3"].reshape(1, 1, *p["w3"].shape), stride, 0) + p["b3"]
  else:
    res = q(x)
  out = jax.nn.relu(y + res)
  out = out.astype(jnp.bfloat16).astype(jnp.float32)   # kernel emits bf16
  return jnp.transpose(out, (0, 3, 1, 2))


# ----------------------------------------------------------------------------
# Main
# ----------------------------------------------------------------------------
if __name__ == "__main__":
  # Residual(in_channels=4, out_channels=4, ...)
  N, Cin, H, W = 2, 4, 16, 16
  Cout = 4

  key = jax.random.PRNGKey(0)
  ks = jax.random.split(key, 16)

  params = {
      # conv1: 3x3, Cin -> Cout (HWIO)
      "w1": 0.1 * jax.random.normal(ks[0], (3, 3, Cin, Cout), jnp.float32),
      "b1": 0.1 * jax.random.normal(ks[1], (Cout,), jnp.float32),
      # bn1 (inference running stats)
      "gamma1": 1.0 + 0.1 * jax.random.normal(ks[2], (Cout,), jnp.float32),
      "beta1": 0.1 * jax.random.normal(ks[3], (Cout,), jnp.float32),
      "mean1": 0.1 * jax.random.normal(ks[4], (Cout,), jnp.float32),
      "var1": 1.0 + 0.1 * jax.random.uniform(ks[5], (Cout,), jnp.float32),
      # conv2: 3x3, Cout -> Cout
      "w2": 0.1 * jax.random.normal(ks[6], (3, 3, Cout, Cout), jnp.float32),
      "b2": 0.1 * jax.random.normal(ks[7], (Cout,), jnp.float32),
      # bn2
      "gamma2": 1.0 + 0.1 * jax.random.normal(ks[8], (Cout,), jnp.float32),
      "beta2": 0.1 * jax.random.normal(ks[9], (Cout,), jnp.float32),
      "mean2": 0.1 * jax.random.normal(ks[10], (Cout,), jnp.float32),
      "var2": 1.0 + 0.1 * jax.random.uniform(ks[11], (Cout,), jnp.float32),
      # conv3 (1x1 projection shortcut)
      "w3": 0.1 * jax.random.normal(ks[12], (Cin, Cout), jnp.float32),
      "b3": 0.1 * jax.random.normal(ks[13], (Cout,), jnp.float32),
  }

  x = jax.random.normal(ks[14], (N, Cin, H, W), jnp.float32)

  # Config 1: identity shortcut (use_1x1conv=False, stride=1).
  out = jax.block_until_ready(
      residual_forward(x, params, use_1x1conv=False, stride=1))
  ref = _ref_residual(x, params, use_1x1conv=False, stride=1)
  assert out.shape == (N, Cout, H, W), out.shape
  assert jnp.allclose(out, ref, atol=1e-2, rtol=1e-2), (
      float(jnp.max(jnp.abs(out - ref))))

  # Config 2: fused 1x1 projection shortcut.
  out2 = jax.block_until_ready(
      residual_forward(x, params, use_1x1conv=True, stride=1))
  ref2 = _ref_residual(x, params, use_1x1conv=True, stride=1)
  assert out2.shape == (N, Cout, H, W), out2.shape
  assert jnp.allclose(out2, ref2, atol=1e-2, rtol=1e-2), (
      float(jnp.max(jnp.abs(out2 - ref2))))

  print("KERNEL_OK")
</pallas_src>

<mosaic_0001>
module attributes {stable_mosaic.version = 11 : i64} {
  func.func @kernel(%arg0: i32, %arg1: memref<1x342x128xbf16, #tpu.memory_space<vmem>>, %arg2: memref<288x1xf32, #tpu.memory_space<vmem>>, %arg3: memref<9x128x128xbf16, #tpu.memory_space<vmem>>, %arg4: memref<1x128xf32, #tpu.memory_space<vmem>>, %arg5: memref<1x128xf32, #tpu.memory_space<vmem>>, %arg6: memref<9x128x128xbf16, #tpu.memory_space<vmem>>, %arg7: memref<1x128xf32, #tpu.memory_space<vmem>>, %arg8: memref<1x128xf32, #tpu.memory_space<vmem>>, %arg9: memref<1x288x128xbf16, #tpu.memory_space<vmem>>, %arg10: memref<344x128xbf16, #tpu.memory_space<vmem>>) attributes {dimension_semantics = [#tpu.dimension_semantics<parallel>], iteration_bounds = array<i64: 2>, scalar_prefetch = 0 : i64, scratch_operands = 1 : i64, tpu.core_type = #tpu.core_type<tc>, window_params = [{transform_indices = @transform_0, window_bounds = array<i64: 1, 342, 128>}, {pipeline_mode = #tpu.pipeline_mode<synchronous>, transform_indices = @transform_1, window_bounds = array<i64: 288, 1>}, {pipeline_mode = #tpu.pipeline_mode<synchronous>, transform_indices = @transform_2, window_bounds = array<i64: 9, 128, 128>}, {pipeline_mode = #tpu.pipeline_mode<synchronous>, transform_indices = @transform_3, window_bounds = array<i64: 1, 128>}, {pipeline_mode = #tpu.pipeline_mode<synchronous>, transform_indices = @transform_4, window_bounds = array<i64: 1, 128>}, {pipeline_mode = #tpu.pipeline_mode<synchronous>, transform_indices = @transform_5, window_bounds = array<i64: 9, 128, 128>}, {pipeline_mode = #tpu.pipeline_mode<synchronous>, transform_indices = @transform_6, window_bounds = array<i64: 1, 128>}, {pipeline_mode = #tpu.pipeline_mode<synchronous>, transform_indices = @transform_7, window_bounds = array<i64: 1, 128>}, {transform_indices = @transform_8, window_bounds = array<i64: 1, 288, 128>}]} {
    %c0 = arith.constant 0 : index
    %c0_0 = arith.constant 0 : index
    %c0_1 = arith.constant 0 : index
    %0 = vector.load %arg1[%c0, %c0_0, %c0_1] : memref<1x342x128xbf16, #tpu.memory_space<vmem>>, vector<1x288x128xbf16>
    %1 = vector.shape_cast %0 : vector<1x288x128xbf16> to vector<288x128xbf16>
    %c0_2 = arith.constant 0 : index
    %c0_3 = arith.constant 0 : index
    %c0_4 = arith.constant 0 : index
    %2 = vector.load %arg3[%c0_2, %c0_3, %c0_4] : memref<9x128x128xbf16, #tpu.memory_space<vmem>>, vector<1x128x128xbf16>
    %3 = vector.shape_cast %2 : vector<1x128x128xbf16> to vector<128x128xbf16>
    %cst = arith.constant dense<0.000000e+00> : vector<288x128xf32>
    %4 = tpu.matmul %1, %3, %cst {dimension_numbers = #tpu.dot_dimension_numbers<[1], [0], [0], [1], [0, 0, 1, 1], [], []>} : vector<288x128xbf16>, vector<128x128xbf16>, vector<288x128xf32> -> vector<288x128xf32>
    %c0_5 = arith.constant 0 : index
    %c1 = arith.constant 1 : index
    %c0_6 = arith.constant 0 : index
    %5 = vector.load %arg1[%c0_5, %c1, %c0_6] : memref<1x342x128xbf16, #tpu.memory_space<vmem>>, vector<1x288x128xbf16>
    %6 = vector.shape_cast %5 : vector<1x288x128xbf16> to vector<288x128xbf16>
    %c1_7 = arith.constant 1 : index
    %c0_8 = arith.constant 0 : index
    %c0_9 = arith.constant 0 : index
    %7 = vector.load %arg3[%c1_7, %c0_8, %c0_9] : memref<9x128x128xbf16, #tpu.memory_space<vmem>>, vector<1x128x128xbf16>
    %8 = vector.shape_cast %7 : vector<1x128x128xbf16> to vector<128x128xbf16>
    %cst_10 = arith.constant dense<0.000000e+00> : vector<288x128xf32>
    %9 = tpu.matmul %6, %8, %cst_10 {dimension_numbers = #tpu.dot_dimension_numbers<[1], [0], [0], [1], [0, 0, 1, 1], [], []>} : vector<288x128xbf16>, vector<128x128xbf16>, vector<288x128xf32> -> vector<288x128xf32>
    %10 = arith.addf %4, %9 : vector<288x128xf32>
    %c0_11 = arith.constant 0 : index
    %c2 = arith.constant 2 : index
    %c0_12 = arith.constant 0 : index
    %11 = vector.load %arg1[%c0_11, %c2, %c0_12] : memref<1x342x128xbf16, #tpu.memory_space<vmem>>, vector<1x288x128xbf16>
    %12 = vector.shape_cast %11 : vector<1x288x128xbf16> to vector<288x128xbf16>
    %c2_13 = arith.constant 2 : index
    %c0_14 = arith.constant 0 : index
    %c0_15 = arith.constant 0 : index
    %13 = vector.load %arg3[%c2_13, %c0_14, %c0_15] : memref<9x128x128xbf16, #tpu.memory_space<vmem>>, vector<1x128x128xbf16>
    %14 = vector.shape_cast %13 : vector<1x128x128xbf16> to vector<128x128xbf16>
    %cst_16 = arith.constant dense<0.000000e+00> : vector<288x128xf32>
    %15 = tpu.matmul %12, %14, %cst_16 {dimension_numbers = #tpu.dot_dimension_numbers<[1], [0], [0], [1], [0, 0, 1, 1], [], []>} : vector<288x128xbf16>, vector<128x128xbf16>, vector<288x128xf32> -> vector<288x128xf32>
    %16 = arith.addf %10, %15 : vector<288x128xf32>
    %c0_17 = arith.constant 0 : index
    %c18 = arith.constant 18 : index
    %c0_18 = arith.constant 0 : index
    %17 = vector.load %arg1[%c0_17, %c18, %c0_18] : memref<1x342x128xbf16, #tpu.memory_space<vmem>>, vector<1x288x128xbf16>
    %18 = vector.shape_cast %17 : vector<1x288x128xbf16> to vector<288x128xbf16>
    %c3 = arith.constant 3 : index
    %c0_19 = arith.constant 0 : index
    %c0_20 = arith.constant 0 : index
    %19 = vector.load %arg3[%c3, %c0_19, %c0_20] : memref<9x128x128xbf16, #tpu.memory_space<vmem>>, vector<1x128x128xbf16>
    %20 = vector.shape_cast %19 : vector<1x128x128xbf16> to vector<128x128xbf16>
    %cst_21 = arith.constant dense<0.000000e+00> : vector<288x128xf32>
    %21 = tpu.matmul %18, %20, %cst_21 {dimension_numbers = #tpu.dot_dimension_numbers<[1], [0], [0], [1], [0, 0, 1, 1], [], []>} : vector<288x128xbf16>, vector<128x128xbf16>, vector<288x128xf32> -> vector<288x128xf32>
    %22 = arith.addf %16, %21 : vector<288x128xf32>
    %c0_22 = arith.constant 0 : index
    %c19 = arith.constant 19 : index
    %c0_23 = arith.constant 0 : index
    %23 = vector.load %arg1[%c0_22, %c19, %c0_23] : memref<1x342x128xbf16, #tpu.memory_space<vmem>>, vector<1x288x128xbf16>
    %24 = vector.shape_cast %23 : vector<1x288x128xbf16> to vector<288x128xbf16>
    %c4 = arith.constant 4 : index
    %c0_24 = arith.constant 0 : index
    %c0_25 = arith.constant 0 : index
    %25 = vector.load %arg3[%c4, %c0_24, %c0_25] : memref<9x128x128xbf16, #tpu.memory_space<vmem>>, vector<1x128x128xbf16>
    %26 = vector.shape_cast %25 : vector<1x128x128xbf16> to vector<128x128xbf16>
    %cst_26 = arith.constant dense<0.000000e+00> : vector<288x128xf32>
    %27 = tpu.matmul %24, %26, %cst_26 {dimension_numbers = #tpu.dot_dimension_numbers<[1], [0], [0], [1], [0, 0, 1, 1], [], []>} : vector<288x128xbf16>, vector<128x128xbf16>, vector<288x128xf32> -> vector<288x128xf32>
    %28 = arith.addf %22, %27 : vector<288x128xf32>
    %c0_27 = arith.constant 0 : index
    %c20 = arith.constant 20 : index
    %c0_28 = arith.constant 0 : index
    %29 = vector.load %arg1[%c0_27, %c20, %c0_28] : memref<1x342x128xbf16, #tpu.memory_space<vmem>>, vector<1x288x128xbf16>
    %30 = vector.shape_cast %29 : vector<1x288x128xbf16> to vector<288x128xbf16>
    %c5 = arith.constant 5 : index
    %c0_29 = arith.constant 0 : index
    %c0_30 = arith.constant 0 : index
    %31 = vector.load %arg3[%c5, %c0_29, %c0_30] : memref<9x128x128xbf16, #tpu.memory_space<vmem>>, vector<1x128x128xbf16>
    %32 = vector.shape_cast %31 : vector<1x128x128xbf16> to vector<128x128xbf16>
    %cst_31 = arith.constant dense<0.000000e+00> : vector<288x128xf32>
    %33 = tpu.matmul %30, %32, %cst_31 {dimension_numbers = #tpu.dot_dimension_numbers<[1], [0], [0], [1], [0, 0, 1, 1], [], []>} : vector<288x128xbf16>, vector<128x128xbf16>, vector<288x128xf32> -> vector<288x128xf32>
    %34 = arith.addf %28, %33 : vector<288x128xf32>
    %c0_32 = arith.constant 0 : index
    %c36 = arith.constant 36 : index
    %c0_33 = arith.constant 0 : index
    %35 = vector.load %arg1[%c0_32, %c36, %c0_33] : memref<1x342x128xbf16, #tpu.memory_space<vmem>>, vector<1x288x128xbf16>
    %36 = vector.shape_cast %35 : vector<1x288x128xbf16> to vector<288x128xbf16>
    %c6 = arith.constant 6 : index
    %c0_34 = arith.constant 0 : index
    %c0_35 = arith.constant 0 : index
    %37 = vector.load %arg3[%c6, %c0_34, %c0_35] : memref<9x128x128xbf16, #tpu.memory_space<vmem>>, vector<1x128x128xbf16>
    %38 = vector.shape_cast %37 : vector<1x128x128xbf16> to vector<128x128xbf16>
    %cst_36 = arith.constant dense<0.000000e+00> : vector<288x128xf32>
    %39 = tpu.matmul %36, %38, %cst_36 {dimension_numbers = #tpu.dot_dimension_numbers<[1], [0], [0], [1], [0, 0, 1, 1], [], []>} : vector<288x128xbf16>, vector<128x128xbf16>, vector<288x128xf32> -> vector<288x128xf32>
    %40 = arith.addf %34, %39 : vector<288x128xf32>
    %c0_37 = arith.constant 0 : index
    %c37 = arith.constant 37 : index
    %c0_38 = arith.constant 0 : index
    %41 = vector.load %arg1[%c0_37, %c37, %c0_38] : memref<1x342x128xbf16, #tpu.memory_space<vmem>>, vector<1x288x128xbf16>
    %42 = vector.shape_cast %41 : vector<1x288x128xbf16> to vector<288x128xbf16>
    %c7 = arith.constant 7 : index
    %c0_39 = arith.constant 0 : index
    %c0_40 = arith.constant 0 : index
    %43 = vector.load %arg3[%c7, %c0_39, %c0_40] : memref<9x128x128xbf16, #tpu.memory_space<vmem>>, vector<1x128x128xbf16>
    %44 = vector.shape_cast %43 : vector<1x128x128xbf16> to vector<128x128xbf16>
    %cst_41 = arith.constant dense<0.000000e+00> : vector<288x128xf32>
    %45 = tpu.matmul %42, %44, %cst_41 {dimension_numbers = #tpu.dot_dimension_numbers<[1], [0], [0], [1], [0, 0, 1, 1], [], []>} : vector<288x128xbf16>, vector<128x128xbf16>, vector<288x128xf32> -> vector<288x128xf32>
    %46 = arith.addf %40, %45 : vector<288x128xf32>
    %c0_42 = arith.constant 0 : index
    %c38 = arith.constant 38 : index
    %c0_43 = arith.constant 0 : index
    %47 = vector.load %arg1[%c0_42, %c38, %c0_43] : memref<1x342x128xbf16, #tpu.memory_space<vmem>>, vector<1x288x128xbf16>
    %48 = vector.shape_cast %47 : vector<1x288x128xbf16> to vector<288x128xbf16>
    %c8 = arith.constant 8 : index
    %c0_44 = arith.constant 0 : index
    %c0_45 = arith.constant 0 : index
    %49 = vector.load %arg3[%c8, %c0_44, %c0_45] : memref<9x128x128xbf16, #tpu.memory_space<vmem>>, vector<1x128x128xbf16>
    %50 = vector.shape_cast %49 : vector<1x128x128xbf16> to vector<128x128xbf16>
    %cst_46 = arith.constant dense<0.000000e+00> : vector<288x128xf32>
    %51 = tpu.matmul %48, %50, %cst_46 {dimension_numbers = #tpu.dot_dimension_numbers<[1], [0], [0], [1], [0, 0, 1, 1], [], []>} : vector<288x128xbf16>, vector<128x128xbf16>, vector<288x128xf32> -> vector<288x128xf32>
    %52 = arith.addf %46, %51 : vector<288x128xf32>
    %c0_47 = arith.constant 0 : index
    %c0_48 = arith.constant 0 : index
    %53 = vector.load %arg4[%c0_47, %c0_48] : memref<1x128xf32, #tpu.memory_space<vmem>>, vector<1x128xf32>
    %54 = vector.broadcast %53 : vector<1x128xf32> to vector<288x128xf32>
    %55 = arith.mulf %52, %54 : vector<288x128xf32>
    %c0_49 = arith.constant 0 : index
    %c0_50 = arith.constant 0 : index
    %56 = vector.load %arg5[%c0_49, %c0_50] : memref<1x128xf32, #tpu.memory_space<vmem>>, vector<1x128xf32>
    %57 = vector.broadcast %56 : vector<1x128xf32> to vector<288x128xf32>
    %58 = arith.addf %55, %57 : vector<288x128xf32>
    %cst_51 = arith.constant 0.000000e+00 : f32
    %59 = vector.broadcast %cst_51 : f32 to vector<288x128xf32>
    %60 = arith.maximumf %58, %59 : vector<288x128xf32>
    %c0_52 = arith.constant 0 : index
    %c0_53 = arith.constant 0 : index
    %61 = vector.load %arg2[%c0_52, %c0_53] : memref<288x1xf32, #tpu.memory_space<vmem>>, vector<288x1xf32>
    %62 = vector.broadcast %61 : vector<288x1xf32> to vector<288x128xf32>
    %63 = arith.mulf %60, %62 : vector<288x128xf32>
    %cst_54 = arith.constant 0.000000e+00 : bf16
    %64 = vector.broadcast %cst_54 : bf16 to vector<32x128xbf16>
    %c0_55 = arith.constant 0 : index
    %c0_56 = arith.constant 0 : index
    %65 = vector.load %arg10[%c0_55, %c0_56] : memref<344x128xbf16, #tpu.memory_space<vmem>>, vector<32x128xbf16>
    tpu.vector_store %arg10[%c0_55, %c0_56], %64 {strides = array<i32>} : memref<344x128xbf16, #tpu.memory_space<vmem>>, vector<32x128xbf16>,
    %cst_57 = arith.constant 0.000000e+00 : bf16
    %66 = vector.broadcast %cst_57 : bf16 to vector<24x128xbf16>
    %c320 = arith.constant 320 : index
    %c0_58 = arith.constant 0 : index
    %67 = vector.load %arg10[%c320, %c0_58] : memref<344x128xbf16, #tpu.memory_space<vmem>>, vector<24x128xbf16>
    tpu.vector_store %arg10[%c320, %c0_58], %66 {strides = array<i32>} : memref<344x128xbf16, #tpu.memory_space<vmem>>, vector<24x128xbf16>,
    %68 = arith.truncf %63 : vector<288x128xf32> to vector<288x128xbf16>
    %c32 = arith.constant 32 : index
    %c0_59 = arith.constant 0 : index
    %69 = vector.load %arg10[%c32, %c0_59] : memref<344x128xbf16, #tpu.memory_space<vmem>>, vector<288x128xbf16>
    tpu.vector_store %arg10[%c32, %c0_59], %68 {strides = array<i32>} : memref<344x128xbf16, #tpu.memory_space<vmem>>, vector<288x128xbf16>,
    %c13 = arith.constant 13 : index
    %c0_60 = arith.constant 0 : index
    %70 = vector.load %arg10[%c13, %c0_60] : memref<344x128xbf16, #tpu.memory_space<vmem>>, vector<288x128xbf16>
    %c0_61 = arith.constant 0 : index
    %c0_62 = arith.constant 0 : index
    %c0_63 = arith.constant 0 : index
    %71 = vector.load %arg6[%c0_61, %c0_62, %c0_63] : memref<9x128x128xbf16, #tpu.memory_space<vmem>>, vector<1x128x128xbf16>
    %72 = vector.shape_cast %71 : vector<1x128x128xbf16> to vector<128x128xbf16>
    %cst_64 = arith.constant dense<0.000000e+00> : vector<288x128xf32>
    %73 = tpu.matmul %70, %72, %cst_64 {dimension_numbers = #tpu.dot_dimension_numbers<[1], [0], [0], [1], [0, 0, 1, 1], [], []>} : vector<288x128xbf16>, vector<128x128xbf16>, vector<288x128xf32> -> vector<288x128xf32>
    %c14 = arith.constant 14 : index
    %c0_65 = arith.constant 0 : index
    %74 = vector.load %arg10[%c14, %c0_65] : memref<344x128xbf16, #tpu.memory_space<vmem>>, vector<288x128xbf16>
    %c1_66 = arith.constant 1 : index
    %c0_67 = arith.constant 0 : index
    %c0_68 = arith.constant 0 : index
    %75 = vector.load %arg6[%c1_66, %c0_67, %c0_68] : memref<9x128x128xbf16, #tpu.memory_space<vmem>>, vector<1x128x128xbf16>
    %76 = vector.shape_cast %75 : vector<1x128x128xbf16> to vector<128x128xbf16>
    %cst_69 = arith.constant dense<0.000000e+00> : vector<288x128xf32>
    %77 = tpu.matmul %74, %76, %cst_69 {dimension_numbers = #tpu.dot_dimension_numbers<[1], [0], [0], [1], [0, 0, 1, 1], [], []>} : vector<288x128xbf16>, vector<128x128xbf16>, vector<288x128xf32> -> vector<288x128xf32>
    %78 = arith.addf %73, %77 : vector<288x128xf32>
    %c15 = arith.constant 15 : index
    %c0_70 = arith.constant 0 : index
    %79 = vector.load %arg10[%c15, %c0_70] : memref<344x128xbf16, #tpu.memory_space<vmem>>, vector<288x128xbf16>
    %c2_71 = arith.constant 2 : index
    %c0_72 = arith.constant 0 : index
    %c0_73 = arith.constant 0 : index
    %80 = vector.load %arg6[%c2_71, %c0_72, %c0_73] : memref<9x128x128xbf16, #tpu.memory_space<vmem>>, vector<1x128x128xbf16>
    %81 = vector.shape_cast %80 : vector<1x128x128xbf16> to vector<128x128xbf16>
    %cst_74 = arith.constant dense<0.000000e+00> : vector<288x128xf32>
    %82 = tpu.matmul %79, %81, %cst_74 {dimension_numbers = #tpu.dot_dimension_numbers<[1], [0], [0], [1], [0, 0, 1, 1], [], []>} : vector<288x128xbf16>, vector<128x128xbf16>, vector<288x128xf32> -> vector<288x128xf32>
    %83 = arith.addf %78, %82 : vector<288x128xf32>
    %c31 = arith.constant 31 : index
    %c0_75 = arith.constant 0 : index
    %84 = vector.load %arg10[%c31, %c0_75] : memref<344x128xbf16, #tpu.memory_space<vmem>>, vector<288x128xbf16>
    %c3_76 = arith.constant 3 : index
    %c0_77 = arith.constant 0 : index
    %c0_78 = arith.constant 0 : index
    %85 = vector.load %arg6[%c3_76, %c0_77, %c0_78] : memref<9x128x128xbf16, #tpu.memory_space<vmem>>, vector<1x128x128xbf16>
    %86 = vector.shape_cast %85 : vector<1x128x128xbf16> to vector<128x128xbf16>
    %cst_79 = arith.constant dense<0.000000e+00> : vector<288x128xf32>
    %87 = tpu.matmul %84, %86, %cst_79 {dimension_numbers = #tpu.dot_dimension_numbers<[1], [0], [0], [1], [0, 0, 1, 1], [], []>} : vector<288x128xbf16>, vector<128x128xbf16>, vector<288x128xf32> -> vector<288x128xf32>
    %88 = arith.addf %83, %87 : vector<288x128xf32>
    %c32_80 = arith.constant 32 : index
    %c0_81 = arith.constant 0 : index
    %89 = vector.load %arg10[%c32_80, %c0_81] : memref<344x128xbf16, #tpu.memory_space<vmem>>, vector<288x128xbf16>
    %c4_82 = arith.constant 4 : index
    %c0_83 = arith.constant 0 : index
    %c0_84 = arith.constant 0 : index
    %90 = vector.load %arg6[%c4_82, %c0_83, %c0_84] : memref<9x128x128xbf16, #tpu.memory_space<vmem>>, vector<1x128x128xbf16>
    %91 = vector.shape_cast %90 : vector<1x128x128xbf16> to vector<128x128xbf16>
    %cst_85 = arith.constant dense<0.000000e+00> : vector<288x128xf32>
    %92 = tpu.matmul %89, %91, %cst_85 {dimension_numbers = #tpu.dot_dimension_numbers<[1], [0], [0], [1], [0, 0, 1, 1], [], []>} : vector<288x128xbf16>, vector<128x128xbf16>, vector<288x128xf32> -> vector<288x128xf32>
    %93 = arith.addf %88, %92 : vector<288x128xf32>
    %c33 = arith.constant 33 : index
    %c0_86 = arith.constant 0 : index
    %94 = vector.load %arg10[%c33, %c0_86] : memref<344x128xbf16, #tpu.memory_space<vmem>>, vector<288x128xbf16>
    %c5_87 = arith.constant 5 : index
    %c0_88 = arith.constant 0 : index
    %c0_89 = arith.constant 0 : index
    %95 = vector.load %arg6[%c5_87, %c0_88, %c0_89] : memref<9x128x128xbf16, #tpu.memory_space<vmem>>, vector<1x128x128xbf16>
    %96 = vector.shape_cast %95 : vector<1x128x128xbf16> to vector<128x128xbf16>
    %cst_90 = arith.constant dense<0.000000e+00> : vector<288x128xf32>
    %97 = tpu.matmul %94, %96, %cst_90 {dimension_numbers = #tpu.dot_dimension_numbers<[1], [0], [0], [1], [0, 0, 1, 1], [], []>} : vector<288x128xbf16>, vector<128x128xbf16>, vector<288x128xf32> -> vector<288x128xf32>
    %98 = arith.addf %93, %97 : vector<288x128xf32>
    %c49 = arith.constant 49 : index
    %c0_91 = arith.constant 0 : index
    %99 = vector.load %arg10[%c49, %c0_91] : memref<344x128xbf16, #tpu.memory_space<vmem>>, vector<288x128xbf16>
    %c6_92 = arith.constant 6 : index
    %c0_93 = arith.constant 0 : index
    %c0_94 = arith.constant 0 : index
    %100 = vector.load %arg6[%c6_92, %c0_93, %c0_94] : memref<9x128x128xbf16, #tpu.memory_space<vmem>>, vector<1x128x128xbf16>
    %101 = vector.shape_cast %100 : vector<1x128x128xbf16> to vector<128x128xbf16>
    %cst_95 = arith.constant dense<0.000000e+00> : vector<288x128xf32>
    %102 = tpu.matmul %99, %101, %cst_95 {dimension_numbers = #tpu.dot_dimension_numbers<[1], [0], [0], [1], [0, 0, 1, 1], [], []>} : vector<288x128xbf16>, vector<128x128xbf16>, vector<288x128xf32> -> vector<288x128xf32>
    %103 = arith.addf %98, %102 : vector<288x128xf32>
    %c50 = arith.constant 50 : index
    %c0_96 = arith.constant 0 : index
    %104 = vector.load %arg10[%c50, %c0_96] : memref<344x128xbf16, #tpu.memory_space<vmem>>, vector<288x128xbf16>
    %c7_97 = arith.constant 7 : index
    %c0_98 = arith.constant 0 : index
    %c0_99 = arith.constant 0 : index
    %105 = vector.load %arg6[%c7_97, %c0_98, %c0_99] : memref<9x128x128xbf16, #tpu.memory_space<vmem>>, vector<1x128x128xbf16>
    %106 = vector.shape_cast %105 : vector<1x128x128xbf16> to vector<128x128xbf16>
    %cst_100 = arith.constant dense<0.000000e+00> : vector<288x128xf32>
    %107 = tpu.matmul %104, %106, %cst_100 {dimension_numbers = #tpu.dot_dimension_numbers<[1], [0], [0], [1], [0, 0, 1, 1], [], []>} : vector<288x128xbf16>, vector<128x128xbf16>, vector<288x128xf32> -> vector<288x128xf32>
    %108 = arith.addf %103, %107 : vector<288x128xf32>
    %c51 = arith.constant 51 : index
    %c0_101 = arith.constant 0 : index
    %109 = vector.load %arg10[%c51, %c0_101] : memref<344x128xbf16, #tpu.memory_space<vmem>>, vector<288x128xbf16>
    %c8_102 = arith.constant 8 : index
    %c0_103 = arith.constant 0 : index
    %c0_104 = arith.constant 0 : index
    %110 = vector.load %arg6[%c8_102, %c0_103, %c0_104] : memref<9x128x128xbf16, #tpu.memory_space<vmem>>, vector<1x128x128xbf16>
    %111 = vector.shape_cast %110 : vector<1x128x128xbf16> to vector<128x128xbf16>
    %cst_105 = arith.constant dense<0.000000e+00> : vector<288x128xf32>
    %112 = tpu.matmul %109, %111, %cst_105 {dimension_numbers = #tpu.dot_dimension_numbers<[1], [0], [0], [1], [0, 0, 1, 1], [], []>} : vector<288x128xbf16>, vector<128x128xbf16>, vector<288x128xf32> -> vector<288x128xf32>
    %113 = arith.addf %108, %112 : vector<288x128xf32>
    %c0_106 = arith.constant 0 : index
    %c0_107 = arith.constant 0 : index
    %114 = vector.load %arg7[%c0_106, %c0_107] : memref<1x128xf32, #tpu.memory_space<vmem>>, vector<1x128xf32>
    %115 = vector.broadcast %114 : vector<1x128xf32> to vector<288x128xf32>
    %116 = arith.mulf %113, %115 : vector<288x128xf32>
    %c0_108 = arith.constant 0 : index
    %c0_109 = arith.constant 0 : index
    %117 = vector.load %arg8[%c0_108, %c0_109] : memref<1x128xf32, #tpu.memory_space<vmem>>, vector<1x128xf32>
    %118 = vector.broadcast %117 : vector<1x128xf32> to vector<288x128xf32>
    %119 = arith.addf %116, %118 : vector<288x128xf32>
    %c0_110 = arith.constant 0 : index
    %c19_111 = arith.constant 19 : index
    %c0_112 = arith.constant 0 : index
    %120 = vector.load %arg1[%c0_110, %c19_111, %c0_112] : memref<1x342x128xbf16, #tpu.memory_space<vmem>>, vector<1x288x128xbf16>
    %121 = vector.shape_cast %120 : vector<1x288x128xbf16> to vector<288x128xbf16>
    %122 = arith.extf %121 : vector<288x128xbf16> to vector<288x128xf32>
    %123 = arith.addf %119, %122 : vector<288x128xf32>
    %cst_113 = arith.constant 0.000000e+00 : f32
    %124 = vector.broadcast %cst_113 : f32 to vector<288x128xf32>
    %125 = arith.maximumf %123, %124 : vector<288x128xf32>
    %126 = arith.truncf %125 : vector<288x128xf32> to vector<288x128xbf16>
    %c0_114 = arith.constant 0 : index
    %c0_115 = arith.constant 0 : index
    %c0_116 = arith.constant 0 : index
    %127 = vector.load %arg9[%c0_114, %c0_115, %c0_116] : memref<1x288x128xbf16, #tpu.memory_space<vmem>>, vector<1x288x128xbf16>
    %128 = vector.shape_cast %127 : vector<1x288x128xbf16> to vector<288x128xbf16>
    %129 = vector.shape_cast %126 : vector<288x128xbf16> to vector<1x288x128xbf16>
    tpu.vector_store %arg9[%c0_114, %c0_115, %c0_116], %129 {strides = array<i32>} : memref<1x288x128xbf16, #tpu.memory_space<vmem>>, vector<1x288x128xbf16>,
    return
  }
  func.func @transform_0(%arg0: i32) -> (i32, i32, i32) {
    %c0_i32 = arith.constant 0 : i32
    %c0_i32_0 = arith.constant 0 : i32
    %c0_i32_1 = arith.constant 0 : i32
    return %arg0, %c0_i32, %c0_i32_0 : i32, i32, i32
  }
  func.func @transform_1(%arg0: i32) -> (i32, i32) {
    %c0_i32 = arith.constant 0 : i32
    %c0_i32_0 = arith.constant 0 : i32
    %c0_i32_1 = arith.constant 0 : i32
    return %c0_i32, %c0_i32_0 : i32, i32
  }
  func.func @transform_2(%arg0: i32) -> (i32, i32, i32) {
    %c0_i32 = arith.constant 0 : i32
    %c0_i32_0 = arith.constant 0 : i32
    %c0_i32_1 = arith.constant 0 : i32
    %c0_i32_2 = arith.constant 0 : i32
    return %c0_i32, %c0_i32_0, %c0_i32_1 : i32, i32, i32
  }
  func.func @transform_3(%arg0: i32) -> (i32, i32) {
    %c0_i32 = arith.constant 0 : i32
    %c0_i32_0 = arith.constant 0 : i32
    %c0_i32_1 = arith.constant 0 : i32
    return %c0_i32, %c0_i32_0 : i32, i32
  }
  func.func @transform_4(%arg0: i32) -> (i32, i32) {
    %c0_i32 = arith.constant 0 : i32
    %c0_i32_0 = arith.constant 0 : i32
    %c0_i32_1 = arith.constant 0 : i32
    return %c0_i32, %c0_i32_0 : i32, i32
  }
  func.func @transform_5(%arg0: i32) -> (i32, i32, i32) {
    %c0_i32 = arith.constant 0 : i32
    %c0_i32_0 = arith.constant 0 : i32
    %c0_i32_1 = arith.constant 0 : i32
    %c0_i32_2 = arith.constant 0 : i32
    return %c0_i32, %c0_i32_0, %c0_i32_1 : i32, i32, i32
  }
  func.func @transform_6(%arg0: i32) -> (i32, i32) {
    %c0_i32 = arith.constant 0 : i32
    %c0_i32_0 = arith.constant 0 : i32
    %c0_i32_1 = arith.constant 0 : i32
    return %c0_i32, %c0_i32_0 : i32, i32
  }
  func.func @transform_7(%arg0: i32) -> (i32, i32) {
    %c0_i32 = arith.constant 0 : i32
    %c0_i32_0 = arith.constant 0 : i32
    %c0_i32_1 = arith.constant 0 : i32
    return %c0_i32, %c0_i32_0 : i32, i32
  }
  func.func @transform_8(%arg0: i32) -> (i32, i32, i32) {
    %c0_i32 = arith.constant 0 : i32
    %c0_i32_0 = arith.constant 0 : i32
    %c0_i32_1 = arith.constant 0 : i32
    return %arg0, %c0_i32, %c0_i32_0 : i32, i32, i32
  }
}

</mosaic_0001>

<bundles_post_ra>
// kernel: residual_forward.1
= control target key start
LH: loop header
LB: loop body
LE: loop exit
PB: predicated region body
PF: predicated region fallthrough
CT: control target
= control target key end

     0   :  { %s9706_s27 = smov 0   ;;  %s12703_s0 = inlined_call_operand.vmem [shape: bf16[2,342,128], index: 0, kind: input, shape index: {}]   ;;  %s12704_s1 = inlined_call_operand.vmem [shape: f32[288,1], index: 1, kind: input, shape index: {}]   ;;  %s12705_s2 = inlined_call_operand.vmem [shape: bf16[9,128,128], index: 2, kind: input, shape index: {}]   ;;  %s12706_s3 = inlined_call_operand.vmem [shape: f32[1,128], index: 3, kind: input, shape index: {}]   ;;  %s12707_s4 = inlined_call_operand.vmem [shape: f32[1,128], index: 4, kind: input, shape index: {}]   ;;  %s12708_s5 = inlined_call_operand.vmem [shape: bf16[9,128,128], index: 5, kind: input, shape index: {}]   ;;  %s12709_s6 = inlined_call_operand.vmem [shape: f32[1,128], index: 6, kind: input, shape index: {}]   ;;  %s12710_s7 = inlined_call_operand.vmem [shape: f32[1,128], index: 7, kind: input, shape index: {}]   ;;  %s12711_s8 = inlined_call_operand.vmem [shape: bf16[2,288,128], index: 8, kind: output, shape index: {}]  }
   0x1 LB: > { %s7556_s28 = sadd.s32 4294967295, %s9658_s27   ;;  %p7560_p0 = scmp.ge.s32.totalorder %s9658_s27, 1  ;;  %s9658_s27 = sphi %s9706_s27, %s18_s27  }
   0x2   : > { %p262_p1 = scmp.lt.s32.totalorder %s9658_s27, 3 }
   0x4   : > { %p263_p2 = pnand %p7560_p0, %p262_p1 }
   0x6   : > { %266 = sbr.rel (%p263_p2) target bundleno = 1638 (0x666), region = 52 }
   0xb   : > { %v8841_v0 = vld [vmem:[%s12705_s2 + $0x78] sm:$0xff]  ;;  %p296_p3 = scmp.lt.s32.totalorder %s7556_s28, 1  ;;  %v8840_v2 = vld [vmem:[%s12705_s2 + $0x70] sm:$0xff]  ;;  %v8839_v4 = vld [vmem:[%s12705_s2 + $0x68] sm:$0xff]  ;;  %vm470_vm0 = vsmask.f32 7424 }
   0xc   : > { %v8833_v1 = vld [vmem:[%s12705_s2 + $0x38] sm:$0xff]  ;;  %685 = vmatpush.bf16.msra.mxu0 %v8841_v0  ;;  %9550 = vmatpush.bf16.msra.mxu2 %v8841_v0  ;;  %v8832_v3 = vld [vmem:[%s12705_s2 + $0x30] sm:$0xff]  ;;  %v8831_v5 = vld [vmem:[%s12705_s2 + $0x28] sm:$0xff]  ;;  %vm970_vm1 = vcmask 1046528   ;;  %vm1615_vm2 = vsmask.f32 6400 }
   0xd   : > { %9558 = vmatpush.bf16.msra.mxu3 %v8833_v1  ;;  %850 = vmatpush.bf16.msra.mxu1 %v8833_v1  ;;  %s12945_s28 = smov (!%p296_p3, %s7556_s28), 1  ;;  %v8838_v6 = vld [vmem:[%s12705_s2 + $0x60] sm:$0xff]  ;;  %v8837_v8 = vld [vmem:[%s12705_s2 + $0x58] sm:$0xff]  ;;  %v8836_v13 = vld [vmem:[%s12705_s2 + $0x50] sm:$0xff]  ;;  %vm2008_vm3 = vcmask 1045504   ;;  %vm3046_vm4 = vcmask 1044480  }
   0xe   : > { %s9601_s19 = smul.u32 172, %s12945_s28  ;;  %v8830_v7 = vld [vmem:[%s12705_s2 + $0x20] sm:$0xff]  ;;  %v8829_v10 = vld [vmem:[%s12705_s2 + $0x18] sm:$0xff]  ;;  %v8828_v17 = vld [vmem:[%s12705_s2 + $0x10] sm:$0xff]  ;;  %vm2653_vm5 = vsmask.f32 5376 }
   0xf   : > { %v8835_v20 = vld [vmem:[%s12705_s2 + $0x48] sm:$0xff]  ;;  %v8834_v26 = vld [vmem:[%s12705_s2 + $0x40] sm:$0xff]  ;;  %v8849_v32 = vld [vmem:[%s12705_s2 + $0xb8] sm:$0xff]  ;;  %vm4457_vm6 = vsmask.f32 4352  ;;  %s9602_s25 = smul.u32 144, %s12945_s28 }
  0x10   : > { %686 = vmatpush.bf16.msra.mxu0 %v8840_v2  ;;  %9551 = vmatpush.bf16.msra.mxu2 %v8840_v2  ;;  %s9744_s26 = scalar_lea.vmem %s12703_s0, %s9601_s19  ;;  %v8827_v25 = vld [vmem:[%s12705_s2 + $0x8] sm:$0xff]  ;;  %v8826_v31 = vld [vmem:[%s12705_s2] sm:$0xff]  ;;  %v8874_v33 = vld [vmem:[%s12705_s2 + $0xf8] sm:$0xff] }
  0x11   : > { %9559 = vmatpush.bf16.msra.mxu3 %v8832_v3  ;;  %851 = vmatpush.bf16.msra.mxu1 %v8832_v3  ;;  %v8817_v9 = vld [vmem:[%s9744_s26 + $0x48] sm:$0xff]  ;;  %v9057_v11 = vld [vmem:[%s9744_s26] sm:$0xff]   ;;  %v9761_v15 = vld [vmem:[%s9744_s26 + $0x50] sm:$0xff]  ;;  %s12427_s9 = scalar_lea.vmem %s12711_s8, %s9602_s25 }
  0x12   : > { %v9755_v12 = vld [vmem:[%s9744_s26 + $0x8] sm:$0xff]  ;;  %v474_v14 = vshll.u32 %v9057_v11, 16  ;;  %v543_v16 = vshll.u32 %v8817_v9, 16  ;;  %v472_v18 = vshrl.u32 %v9057_v11, 16  ;;  %v547_v23 = vshrl.u32 %v8817_v9, 16  ;;  %v8882_v36 = vld [vmem:[%s12705_s2 + $0x138] sm:$0xff] }
  0x13   : > { %v479_v19 = vshll.u32 %v9755_v12, 16  ;;  %v551_v24 = vshll.u32 %v9761_v15, 16  ;;  %v8848_v37 = vld [vmem:[%s12705_s2 + $0xb0] sm:$0xff]  ;;  %v8819_v40 = vld [vmem:[%s9744_s26 + $0x58] sm:$0xff]  ;;  %v8847_v42 = vld [vmem:[%s12705_s2 + $0xa8] sm:$0xff]  ;;  %v483_v44 = vshrl.u32 %v9755_v12, 16 }
  0x14   : > { %687 = vmatpush.bf16.msra.mxu0 %v8839_v4  ;;  %9552 = vmatpush.bf16.msra.mxu2 %v8839_v4  ;;  %v476_v21 = vrot.slane %v474_v14, 1  ;;  %v9770_v22 = vrot.slane %v543_v16, 1  ;;  %v8873_v38 = vld [vmem:[%s12705_s2 + $0xf0] sm:$0xff]  ;;  %v8872_v43 = vld [vmem:[%s12705_s2 + $0xe8] sm:$0xff]  ;;  %v555_v46 = vshrl.u32 %v9761_v15, 16  ;;  %v559_v47 = vshll.u32 %v8819_v40, 16 }
  0x15   : > { %9560 = vmatpush.bf16.msra.mxu3 %v8831_v5  ;;  %852 = vmatpush.bf16.msra.mxu1 %v8831_v5  ;;  %v481_v28 = vrot.slane %v479_v19, 1  ;;  %v553_v30 = vrot.slane %v551_v24, 1  ;;  %v9801_v39 = vld [vmem:[%s9744_s26 + $0x10] sm:$0xff]  ;;  %v8880_v48 = vld [vmem:[%s12705_s2 + $0x128] sm:$0xff]  ;;  %v9822_v55 = vld [vmem:[%s9744_s26 + $0x18] sm:$0xff]  ;;  %v563_v61 = vshrl.u32 %v8819_v40, 16 }
  0x16   : > { %v477_v27 = vor.u32 %v476_v21, %v472_v18  ;;  %v549_v29 = vor.u32 %v547_v23, %v9770_v22  ;;  %v8881_v41 = vld [vmem:[%s12705_s2 + $0x130] sm:$0xff]  ;;  %v487_v45 = vshll.u32 %v9801_v39, 16  ;;  %v561_v52 = vrot.slane %v559_v47, 1  ;;  %v8820_v56 = vld [vmem:[%s9744_s26 + $0x60] sm:$0xff]  ;;  %v9856_v21 = vld [vmem:[%s9744_s26 + $0x28] sm:$0xff] }
  0x17   : > { %v485_v49 = vor.u32 %v483_v44, %v481_v28  ;;  %v557_v51 = vor.u32 %v555_v46, %v553_v30  ;;  %v8846_v57 = vld [vmem:[%s12705_s2 + $0xa0] sm:$0xff]  ;;  %v491_v59 = vshrl.u32 %v9801_v39, 16  ;;  %v495_v60 = vshll.u32 %v9822_v55, 16  ;;  %v8822_v23 = vld [vmem:[%s9744_s26 + $0x70] sm:$0xff]  ;;  %v8878_v24 = vld [vmem:[%s12705_s2 + $0x118] sm:$0xff] }
  0x18   : > { %688 = vmatpush.bf16.msra.mxu0 %v8838_v6  ;;  %9553 = vmatpush.bf16.msra.mxu2 %v8838_v6  ;;  %v482_v34 = vsel %vm470_vm0, %v477_v27, %v481_v28  ;;  %v554_v35 = vsel %vm470_vm0, %v549_v29, %v553_v30  ;;  %v489_v50 = vrot.slane %v487_v45, 1  ;;  %v8871_v58 = vld [vmem:[%s12705_s2 + $0xe0] sm:$0xff]  ;;  %v567_v62 = vshll.u32 %v8820_v56, 16  ;;  %v8821_v6 = vld [vmem:[%s9744_s26 + $0x68] sm:$0xff] }
  0x19   : > { %9561 = vmatpush.bf16.msra.mxu3 %v8830_v7  ;;  %853 = vmatpush.bf16.msra.mxu1 %v8830_v7  ;;  %v562_v54 = vsel %vm470_vm0, %v557_v51, %v561_v52  ;;  %v497_v0 = vrot.slane %v495_v60, 1  ;;  %v565_v1 = vor.u32 %v563_v61, %v561_v52  ;;  %v9838_v5 = vld [vmem:[%s9744_s26 + $0x20] sm:$0xff]  ;;  %v575_v14 = vshll.u32 %v8821_v6, 16 }
  0x1a   : > { %v490_v53 = vsel %vm470_vm0, %v485_v49, %v489_v50  ;;  %v493_v63 = vor.u32 %v491_v59, %v489_v50  ;;  %v569_v2 = vrot.slane %v567_v62, 1  ;;  %v8879_v7 = vld [vmem:[%s12705_s2 + $0x120] sm:$0xff]  ;;  %v507_v27 = vshrl.u32 %v9838_v5, 16 }
  0x1b   : > { %v577_v18 = vrot.slane %v575_v14, 1  ;;  %v511_v28 = vshll.u32 %v9856_v21, 16  ;;  %v579_v29 = vshrl.u32 %v8821_v6, 16  ;;  %v583_v30 = vshll.u32 %v8822_v23, 16 }
  0x1c   : > { %689 = vmatpush.bf16.msra.mxu0 %v8837_v8  ;;  %9554 = vmatpush.bf16.msra.mxu2 %v8837_v8  ;;  %v498_v3 = vsel %vm470_vm0, %v493_v63, %v497_v0  ;;  %v570_v4 = vsel %vm470_vm0, %v565_v1, %v569_v2  ;;  %v8845_v8 = vld [vmem:[%s12705_s2 + $0x98] sm:$0xff]  ;;  %v587_v45 = vshrl.u32 %v8822_v23, 16 }
  0x1d   : > { %9562 = vmatpush.bf16.msra.mxu3 %v8829_v10  ;;  %854 = vmatpush.bf16.msra.mxu1 %v8829_v10  ;;  %v499_v10 = vshrl.u32 %v9822_v55, 16  ;;  %v8890_v1 = vld [vmem:[%s12705_s2 + $0x178] sm:$0xff] }
  0x20   : > { %690 = vmatpush.bf16.msra.mxu0 %v8836_v13  ;;  %9555 = vmatpush.bf16.msra.mxu2 %v8836_v13  ;;  %v571_v13 = vshrl.u32 %v8820_v56, 16 }
  0x21   : > { %9563 = vmatpush.bf16.msra.mxu3 %v8828_v17  ;;  %855 = vmatpush.bf16.msra.mxu1 %v8828_v17 }
  0x22   : > { %v573_v17 = vor.u32 %v571_v13, %v569_v2 }
  0x24   : > { %691 = vmatpush.bf16.msra.mxu0 %v8835_v20  ;;  %9556 = vmatpush.bf16.msra.mxu2 %v8835_v20  ;;  %v578_v20 = vsel %vm470_vm0, %v573_v17, %v577_v18  ;;  %v8887_v17 = vld [vmem:[%s12705_s2 + $0x160] sm:$0xff] }
  0x25   : > { %9564 = vmatpush.bf16.msra.mxu3 %v8827_v25  ;;  %856 = vmatpush.bf16.msra.mxu1 %v8827_v25  ;;  %v8844_v25 = vld [vmem:[%s12705_s2 + $0x90] sm:$0xff] }
  0x28   : > { %692 = vmatpush.bf16.msra.mxu0 %v8834_v26  ;;  %9557 = vmatpush.bf16.msra.mxu2 %v8834_v26  ;;  %v8869_v26 = vld [vmem:[%s12705_s2 + $0xd0] sm:$0xff] }
  0x29   : > { %9565 = vmatpush.bf16.msra.mxu3 %v8826_v31  ;;  %857 = vmatpush.bf16.msra.mxu1 %v8826_v31 }
  0x2b   : > { %693 = vmatmul.bf16.vlgmr.msra.gmra.mxu0 %v482_v34  ;;  %738 = vmatmul.bf16.vlgmr.msra.gmra.mxu2 %v554_v35  ;;  %v585_v34 = vrot.slane %v583_v30, 1 }
  0x2c   : > { %1074 = vmatpush.bf16.msrb.mxu2 %v8849_v32  ;;  %903 = vmatmul.bf16.vlgmr.msra.gmra.mxu3 %v8817_v9  ;;  %v8870_v9 = vld [vmem:[%s12705_s2 + $0xd8] sm:$0xff]  ;;  %v513_v32 = vrot.slane %v511_v28, 1 }
  0x2d   : > { %1459 = vmatpush.bf16.msrb.mxu3 %v8874_v33  ;;  %858 = vmatmul.bf16.vlgmr.msra.gmra.mxu1 %v9057_v11  ;;  %v503_v11 = vshll.u32 %v9838_v5, 16  ;;  %v581_v33 = vor.u32 %v579_v29, %v577_v18  ;;  %v589_v49 = vor.u32 %v587_v45, %v585_v34  ;;  %v8885_v29 = vld [vmem:[%s12705_s2 + $0x150] sm:$0xff] }
  0x2e   : > { %1852 = vmatpush.bf16.msrb.mxu0 %v8882_v36  ;;  %2112 = vmatpush.bf16.msrb.mxu1 %v8890_v1 }
  0x2f   : > { %v505_v16 = vrot.slane %v503_v11, 1  ;;  %v586_v36 = vsel %vm470_vm0, %v581_v33, %v585_v34  ;;  %v8884_v34 = vld [vmem:[%s12705_s2 + $0x148] sm:$0xff] }
  0x30   : > { %1075 = vmatpush.bf16.msrb.mxu2 %v8848_v37  ;;  %v9874_v37 = vld [vmem:[%s9744_s26 + $0x30] sm:$0xff] }
  0x31   : > { %1460 = vmatpush.bf16.msrb.mxu3 %v8873_v38  ;;  %v509_v31 = vor.u32 %v507_v27, %v505_v16  ;;  %v8823_v38 = vld [vmem:[%s9744_s26 + $0x78] sm:$0xff]  ;;  %v519_v44 = vshll.u32 %v9874_v37, 16 }
  0x32   : > { %1853 = vmatpush.bf16.msrb.mxu0 %v8881_v41  ;;  %v8843_v41 = vld [vmem:[%s12705_s2 + $0x88] sm:$0xff]  ;;  %v591_v46 = vshll.u32 %v8823_v38, 16  ;;  %v595_v59 = vshrl.u32 %v8823_v38, 16 }
  0x33   : > { %v514_v35 = vsel %vm470_vm0, %v509_v31, %v513_v32  ;;  %v8915_v31 = vld [vmem:[%s12705_s2 + $0x1b8] sm:$0xff] }
  0x34   : > { %1076 = vmatpush.bf16.msrb.mxu2 %v8847_v42  ;;  %v8868_v42 = vld [vmem:[%s12705_s2 + $0xc8] sm:$0xff]  ;;  %v593_v50 = vrot.slane %v591_v46, 1 }
  0x35   : > { %1461 = vmatpush.bf16.msrb.mxu3 %v8872_v43  ;;  %v515_v43 = vshrl.u32 %v9856_v21, 16 }
  0x36   : > { %1854 = vmatpush.bf16.msrb.mxu0 %v8880_v48  ;;  %v521_v48 = vrot.slane %v519_v44, 1  ;;  %v594_v52 = vsel %vm470_vm0, %v589_v49, %v593_v50  ;;  %v597_v63 = vor.u32 %v595_v59, %v593_v50 }
  0x37   : > { %v517_v47 = vor.u32 %v515_v43, %v513_v32  ;;  %v8923_v32 = vld [vmem:[%s12705_s2 + $0x1f8] sm:$0xff] }
  0x38   : > { %1077 = vmatpush.bf16.msrb.mxu2 %v8846_v57  ;;  %v523_v57 = vshrl.u32 %v9874_v37, 16 }
  0x39   : > { %1462 = vmatpush.bf16.msrb.mxu3 %v8871_v58  ;;  %v522_v51 = vsel %vm470_vm0, %v517_v47, %v521_v48 }
  0x3a   : > { %1855 = vmatpush.bf16.msrb.mxu0 %v8879_v7  ;;  %v525_v61 = vor.u32 %v523_v57, %v521_v48  ;;  %v9914_v7 = vld [vmem:[%s9744_s26 + $0x40] sm:$0xff]  ;;  %v1987_v57 = vld [vmem:[%s9744_s26 + $0x8] sm:$0xc] }
  0x3b   : > { %698 = vmatmul.bf16.gmra.mxu0 %v490_v53  ;;  %743 = vmatmul.bf16.gmra.mxu2 %v562_v54  ;;  %v9893_v53 = vld [vmem:[%s9744_s26 + $0x38] sm:$0xff]  ;;  %v8824_v54 = vld [vmem:[%s9744_s26 + $0x80] sm:$0xff]  ;;  %v535_v13 = vshll.u32 %v9914_v7, 16  ;;  %v539_v33 = vshrl.u32 %v9914_v7, 16 }
  0x3c   : > { %908 = vmatmul.bf16.gmra.mxu3 %v9761_v15  ;;  %1078 = vmatpush.bf16.msrb.mxu2 %v8845_v8  ;;  %v501_v15 = vor.u32 %v499_v10, %v497_v0  ;;  %v527_v58 = vshll.u32 %v9893_v53, 16  ;;  %v599_v60 = vshll.u32 %v8824_v54, 16  ;;  %v8825_v8 = vld [vmem:[%s9744_s26 + $0x88] sm:$0xff]  ;;  %v531_v11 = vshrl.u32 %v9893_v53, 16 }
  0x3d   : > { %863 = vmatmul.bf16.gmra.mxu1 %v9755_v12  ;;  %1463 = vmatpush.bf16.msrb.mxu3 %v8870_v9  ;;  %v8867_v9 = vld [vmem:[%s12705_s2 + $0xc0] sm:$0xff]  ;;  %v8888_v10 = vld [vmem:[%s12705_s2 + $0x168] sm:$0xff]  ;;  %v603_v14 = vshrl.u32 %v8824_v54, 16 }
  0x3e   : > { %v506_v19 = vsel %vm470_vm0, %v501_v15, %v505_v16  ;;  %1856 = vmatpush.bf16.msrb.mxu0 %v8878_v24  ;;  %v529_v62 = vrot.slane %v527_v58, 1  ;;  %v601_v0 = vrot.slane %v599_v60, 1  ;;  %v607_v15 = vshll.u32 %v8825_v8, 16  ;;  %v8875_v16 = vld [vmem:[%s12705_s2 + $0x100] sm:$0xff]  ;;  %v359_v24 = vld [vmem:[%s9744_s26 + $0x90] sm:$0x1] }
  0x3f   : > { %v450_v28 = vunpack.c.l.b16 %v359_v24  ;;  %v9384_v60 = vld [vmem:[%s9744_s26] sm:$0xf0] }
  0x40   : > { %1079 = vmatpush.bf16.msrb.mxu2 %v8844_v25  ;;  %v530_v2 = vsel %vm470_vm0, %v525_v61, %v529_v62  ;;  %v533_v18 = vor.u32 %v531_v11, %v529_v62  ;;  %v8886_v25 = vld [vmem:[%s12705_s2 + $0x158] sm:$0xff]  ;;  %v9385_v61 = vld [vmem:[%s9744_s26] sm:$0xe] }
  0x41   : > { %1464 = vmatpush.bf16.msrb.mxu3 %v8869_v26  ;;  %v9941_v30 = vpack.c.b16 %v450_v28, %v450_v28 }
  0x44   : > { %1080 = vmatpush.bf16.msrb.mxu2 %v8843_v41  ;;  %v8883_v41 = vld [vmem:[%s12705_s2 + $0x140] sm:$0xff] }
  0x45   : > { %1465 = vmatpush.bf16.msrb.mxu3 %v8868_v42  ;;  %v8931_v42 = vld [vmem:[%s12705_s2 + $0x238] sm:$0xff] }
  0x49   : > { %1466 = vmatpush.bf16.msrb.mxu3 %v8867_v9 }
  0x4b   : > { %703 = vmatmul.bf16.gmra.mxu0 %v498_v3  ;;  %748 = vmatmul.bf16.gmra.mxu2 %v570_v4  ;;  %v602_v3 = vsel %vm470_vm0, %v597_v63, %v601_v0  ;;  %v8842_v4 = vld [vmem:[%s12705_s2 + $0x80] sm:$0xff]  ;;  %v2006_v63 = vunpack.c.l.b16 %v1987_v57 }
  0x4c   : > { %913 = vmatmul.bf16.gmra.mxu3 %v8819_v40  ;;  %v8877_v40 = vld [vmem:[%s12705_s2 + $0x110] sm:$0xff]  ;;  %1081 = vmatpush.bf16.msrb.mxu2 %v8842_v4 }
  0x4d   : > { %868 = vmatmul.bf16.gmra.mxu1 %v9801_v39  ;;  %1857 = vmatpush.bf16.msrb.mxu0 %v8877_v40  ;;  %v1210_v40 = vld [vmem:[%s9744_s26 + $0xc] sm:$0xf] }
  0x4e   : > { %2890 = vmatpush.bf16.msra.mxu3 %v8923_v32  ;;  %v1301_v44 = vunpack.c.l.b16 %v1210_v40 }
  0x50   : > { %2497 = vmatpush.bf16.msra.mxu2 %v8915_v31  ;;  %v9988_v31 = vld [vmem:[%s9744_s26 + $0x18] sm:$0xff] }
  0x5b   : > { %708 = vmatmul.bf16.gmra.mxu0 %v506_v19  ;;  %753 = vmatmul.bf16.gmra.mxu2 %v578_v20  ;;  %v537_v19 = vrot.slane %v535_v13, 1  ;;  %v605_v20 = vor.u32 %v603_v14, %v601_v0  ;;  %v2007_v13 = vpack.c.b16 %v1301_v44, %v2006_v63 }
  0x5c   : > { %918 = vmatmul.bf16.gmra.mxu3 %v8820_v56  ;;  %v8876_v56 = vld [vmem:[%s12705_s2 + $0x108] sm:$0xff] }
  0x5d   : > { %873 = vmatmul.bf16.gmra.mxu1 %v9822_v55  ;;  %1858 = vmatpush.bf16.msrb.mxu0 %v8876_v56  ;;  %v538_v26 = vsel %vm470_vm0, %v533_v18, %v537_v19  ;;  %v541_v45 = vor.u32 %v539_v33, %v537_v19 }
  0x5f   : > { %v546_v50 = vsel %vm470_vm0, %v541_v45, %v9770_v22 }
  0x61   : > { %1859 = vmatpush.bf16.msrb.mxu0 %v8875_v16  ;;  %v972_v16 = vrot.slane %v9755_v12, 1 }
  0x65   : > { %3150 = vmatpush.bf16.msra.mxu0 %v8931_v42 }
  0x6b   : > { %713 = vmatmul.bf16.gmra.mxu0 %v514_v35  ;;  %758 = vmatmul.bf16.gmra.mxu2 %v586_v36  ;;  %v611_v35 = vshrl.u32 %v8825_v8, 16  ;;  %v615_v36 = vshll.u32 %v9941_v30, 16 }
  0x6c   : > { %923 = vmatmul.bf16.gmra.mxu3 %v8821_v6  ;;  %v8889_v6 = vld [vmem:[%s12705_s2 + $0x170] sm:$0xff] }
  0x6d   : > { %878 = vmatmul.bf16.gmra.mxu1 %v9838_v5  ;;  %v617_v47 = vrot.slane %v615_v36, 1  ;;  %v1634_v36 = vshrl.u32 %v9988_v31, 16 }
  0x6e   : > { %2113 = vmatpush.bf16.msrb.mxu1 %v8889_v6 }
  0x72   : > { %2114 = vmatpush.bf16.msrb.mxu1 %v8888_v10 }
  0x76   : > { %2115 = vmatpush.bf16.msrb.mxu1 %v8887_v17 }
  0x7a   : > { %2116 = vmatpush.bf16.msrb.mxu1 %v8886_v25 }
  0x7b   : > { %718 = vmatmul.bf16.gmra.mxu0 %v522_v51  ;;  %763 = vmatmul.bf16.gmra.mxu2 %v594_v52  ;;  %v9966_v52 = vld [vmem:[%s9744_s26 + $0x10] sm:$0xff] }
  0x7c   : > { %928 = vmatmul.bf16.gmra.mxu3 %v8822_v23  ;;  %v609_v23 = vrot.slane %v607_v15, 1  ;;  %v1625_v62 = vshrl.u32 %v9966_v52, 16  ;;  %v1628_v22 = vshll.u32 %v9966_v52, 16  ;;  %v1357_v18 = vrot.slane %v9966_v52, 1 }
  0x7d   : > { %883 = vmatmul.bf16.gmra.mxu1 %v9856_v21  ;;  %v2010_v24 = vrot.slane %v9966_v52, 2  ;;  %v1359_v52 = vrot.slane %v9988_v31, 1 }
  0x7e   : > { %v610_v27 = vsel %vm470_vm0, %v605_v20, %v609_v23  ;;  %2117 = vmatpush.bf16.msrb.mxu1 %v8885_v29  ;;  %v613_v46 = vor.u32 %v611_v35, %v609_v23  ;;  %v1627_v10 = vrot.slane %v1625_v62, 1  ;;  %v1630_v11 = vrot.slane %v1628_v22, 2  ;;  %v10014_v22 = vld [vmem:[%s9744_s26 + $0x20] sm:$0xff] }
  0x7f   : > { %v2009_v23 = vrot.slane %v2007_v13, 2 }
  0x80   : > { %v618_v51 = vsel %vm470_vm0, %v613_v46, %v617_v47  ;;  %v1631_v20 = vor.u32 %v1630_v11, %v1627_v10  ;;  %v8914_v46 = vld [vmem:[%s12705_s2 + $0x1b0] sm:$0xff] }
  0x81   : > { %v8922_v47 = vld [vmem:[%s12705_s2 + $0x1f0] sm:$0xff]  ;;  %2498 = vmatpush.bf16.msra.mxu2 %v8914_v46 }
  0x82   : > { %2118 = vmatpush.bf16.msrb.mxu1 %v8884_v34  ;;  %v2011_v34 = vsel %vm2008_vm3, %v2009_v23, %v2010_v24  ;;  %2891 = vmatpush.bf16.msra.mxu3 %v8922_v47  ;;  %v2014_v23 = vrot.slane %v10014_v22, 2 }
  0x86   : > { %2119 = vmatpush.bf16.msrb.mxu1 %v8883_v41 }
  0x8b   : > { %723 = vmatmul.bf16.gmra.mxu0 %v530_v2  ;;  %768 = vmatmul.bf16.gmra.mxu2 %v602_v3  ;;  %v9386_v2 = vor.u32 %v9385_v61, %v9384_v60 }
  0x8c   : > { %933 = vmatmul.bf16.gmra.mxu3 %v8823_v38  ;;  %v1209_v38 = vld [vmem:[%s9744_s26 + $0x8] sm:$0xe] }
  0x8d   : > { %888 = vmatmul.bf16.gmra.mxu1 %v9874_v37  ;;  %v1300_v43 = vunpack.c.l.b16 %v1209_v38  ;;  %v971_v15 = vrot.slane %v9386_v2, 1  ;;  %v1637_v38 = vshll.u32 %v9988_v31, 16 }
  0x8f   : > { %v1337_v48 = vpack.c.b16 %v1301_v44, %v1300_v43  ;;  %v973_v29 = vsel %vm970_vm1, %v971_v15, %v972_v16  ;;  %v1636_v44 = vrot.slane %v1634_v36, 1  ;;  %v1639_v45 = vrot.slane %v1637_v38, 2 }
  0x91   : > { %v1617_v58 = vshrl.u32 %v1337_v48, 16  ;;  %v1620_v59 = vshll.u32 %v1337_v48, 16  ;;  %v1356_v17 = vrot.slane %v1337_v48, 1 }
  0x93   : > { %v1619_v3 = vrot.slane %v1617_v58, 1  ;;  %v1622_v9 = vrot.slane %v1620_v59, 2  ;;  %v1358_v33 = vsel %vm970_vm1, %v1356_v17, %v1357_v18 }
  0x95   : > { %v1623_v19 = vor.u32 %v1622_v9, %v1619_v3  ;;  %v1643_v3 = vshrl.u32 %v10014_v22, 16 }
  0x97   : > { %v1632_v12 = vsel %vm1615_vm2, %v1623_v19, %v1631_v20  ;;  %v1645_v13 = vrot.slane %v1643_v3, 1 }
  0x9b   : > { %728 = vmatmul.bf16.gmra.mxu0 %v538_v26  ;;  %773 = vmatmul.bf16.gmra.mxu2 %v610_v27 }
  0x9c   : > { %938 = vmatmul.bf16.gmra.mxu3 %v8824_v54 }
  0x9d   : > { %893 = vmatmul.bf16.gmra.mxu1 %v9893_v53 }
  0xa8   : > { %v694_v49 = vpop.f32.mrf.mxu0 }
  0xaa   : > { %v859_v54 = vpop.f32.mrf.mxu1 }
  0xab   : > { %v9968_v56 = vadd.f32 %v859_v54, %v694_v49  ;;  %733 = vmatmul.bf16.gmra.mxu0 %v546_v50  ;;  %778 = vmatmul.bf16.gmra.mxu2 %v618_v51  ;;  %v974_v50 = vrot.slane %v9801_v39, 1  ;;  %v1640_v51 = vor.u32 %v1639_v45, %v1636_v44  ;;  %v2012_v54 = vrot.slane %v9988_v31, 2  ;;  %v8930_v39 = vld [vmem:[%s12705_s2 + $0x230] sm:$0xff]  ;;  %v10037_v31 = vld [vmem:[%s9744_s26 + $0x28] sm:$0xff] }
  0xac   : > { %943 = vmatmul.bf16.gmra.mxu3 %v8825_v8  ;;  %3151 = vmatpush.bf16.msra.mxu0 %v8930_v39  ;;  %v1652_v36 = vshrl.u32 %v10037_v31, 16  ;;  %v1655_v38 = vshll.u32 %v10037_v31, 16 }
  0xad   : > { %898 = vmatmul.bf16.gmra.mxu1 %v9914_v7  ;;  %v975_v61 = vsel %vm970_vm1, %v972_v16, %v974_v50  ;;  %v1641_v62 = vsel %vm1615_vm2, %v1631_v20, %v1640_v51  ;;  %v1361_v20 = vrot.slane %v10014_v22, 1 }
  0xae   : > { %v739_v0 = vpop.f32.mrf.mxu2  ;;  %v1654_v45 = vrot.slane %v1652_v36, 1  ;;  %v1657_v46 = vrot.slane %v1655_v38, 2 }
  0xaf   : > { %v904_v1 = vpop.f32.mrf.mxu3 }
  0xb0   : > { %v9976_v4 = vadd.f32 %v904_v1, %v739_v0  ;;  %v696_v6 = vpop.f32.mrf.mxu0  ;;  %v1360_v0 = vsel %vm970_vm1, %v1357_v18, %v1359_v52  ;;  %v2013_v1 = vsel %vm2008_vm3, %v2010_v24, %v2012_v54  ;;  %v976_v18 = vrot.slane %v9822_v55, 1 }
  0xb1   : > { %v2015_v55 = vsel %vm2008_vm3, %v2012_v54, %v2014_v23  ;;  %v1658_v54 = vor.u32 %v1657_v46, %v1654_v45 }
  0xb2   : > { %v861_v8 = vpop.f32.mrf.mxu1 }
  0xb3   : > { %v9978_v14 = vadd.f32 %v861_v8, %v696_v6  ;;  %v1646_v6 = vshll.u32 %v10014_v22, 16 }
  0xb5   : > { %v1648_v15 = vrot.slane %v1646_v6, 2 }
  0xb6   : > { %v741_v25 = vpop.f32.mrf.mxu2 }
  0xb7   : > { %v906_v26 = vpop.f32.mrf.mxu3  ;;  %v1649_v19 = vor.u32 %v1648_v15, %v1645_v13 }
  0xb8   : > { %v9983_v27 = vadd.f32 %v906_v26, %v741_v25  ;;  %v699_v28 = vpop.f32.mrf.mxu0 }
  0xba   : > { %v864_v32 = vpop.f32.mrf.mxu1 }
  0xbb   : > { %v9992_v35 = vadd.f32 %v864_v32, %v699_v28  ;;  %1082 = vmatmul.bf16.vlgmr.msrb.gmra.mxu2 %v973_v29  ;;  %1860 = vmatmul.bf16.vlgmr.msrb.gmra.mxu0 %v1632_v12  ;;  %v977_v29 = vsel %vm970_vm1, %v974_v50, %v976_v18  ;;  %v1650_v12 = vsel %vm1615_vm2, %v1640_v51, %v1649_v19  ;;  %v8913_v50 = vld [vmem:[%s12705_s2 + $0x1a8] sm:$0xff] }
  0xbc   : > { %1467 = vmatmul.bf16.vlgmr.msrb.gmra.mxu3 %v1358_v33  ;;  %v1362_v33 = vsel %vm970_vm1, %v1359_v52, %v1361_v20  ;;  %v8921_v51 = vld [vmem:[%s12705_s2 + $0x1e8] sm:$0xff]  ;;  %v978_v52 = vrot.slane %v9838_v5, 1  ;;  %2499 = vmatpush.bf16.msra.mxu2 %v8913_v50 }
  0xbd   : > { %2120 = vmatmul.bf16.vlgmr.msrb.gmra.mxu1 %v2011_v34  ;;  %2892 = vmatpush.bf16.msra.mxu3 %v8921_v51 }
  0xbe   : > { %v744_v40 = vpop.f32.mrf.mxu2  ;;  %v979_v39 = vsel %vm970_vm1, %v976_v18, %v978_v52 }
  0xbf   : > { %v909_v41 = vpop.f32.mrf.mxu3 }
  0xc0   : > { %v9996_v42 = vadd.f32 %v909_v41, %v744_v40  ;;  %v701_v43 = vpop.f32.mrf.mxu0 }
  0xc2   : > { %v866_v48 = vpop.f32.mrf.mxu1 }
  0xc3   : > { %v10004_v49 = vadd.f32 %v866_v48, %v701_v43 }
  0xc6   : > { %v746_v57 = vpop.f32.mrf.mxu2 }
  0xc7   : > { %v911_v58 = vpop.f32.mrf.mxu3 }
  0xc8   : > { %v10009_v59 = vadd.f32 %v911_v58, %v746_v57  ;;  %v704_v60 = vpop.f32.mrf.mxu0  ;;  %v1363_v57 = vrot.slane %v10037_v31, 1  ;;  %v2016_v58 = vrot.slane %v10037_v31, 2 }
  0xca   : > { %v869_v63 = vpop.f32.mrf.mxu1  ;;  %v1364_v5 = vsel %vm970_vm1, %v1361_v20, %v1363_v57  ;;  %v2017_v3 = vsel %vm2008_vm3, %v2014_v23, %v2016_v58 }
  0xcb   : > { %v10021_v2 = vadd.f32 %v869_v63, %v704_v60  ;;  %1087 = vmatmul.bf16.gmra.mxu2 %v975_v61  ;;  %1865 = vmatmul.bf16.gmra.mxu0 %v1641_v62  ;;  %v1659_v63 = vsel %vm1615_vm2, %v1649_v19, %v1658_v54 }
  0xcc   : > { %1472 = vmatmul.bf16.gmra.mxu3 %v1360_v0  ;;  %v10063_v0 = vld [vmem:[%s9744_s26 + $0x30] sm:$0xff] }
  0xcd   : > { %2125 = vmatmul.bf16.gmra.mxu1 %v2013_v1 }
  0xce   : > { %v749_v9 = vpop.f32.mrf.mxu2 }
  0xcf   : > { %v914_v10 = vpop.f32.mrf.mxu3 }
  0xd0   : > { %v10025_v11 = vadd.f32 %v914_v10, %v749_v9  ;;  %v706_v8 = vpop.f32.mrf.mxu0  ;;  %v1661_v9 = vshrl.u32 %v10063_v0, 16  ;;  %v1664_v10 = vshll.u32 %v10063_v0, 16 }
  0xd2   : > { %v871_v16 = vpop.f32.mrf.mxu1  ;;  %v1663_v19 = vrot.slane %v1661_v9, 1  ;;  %v1666_v20 = vrot.slane %v1664_v10, 2 }
  0xd3   : > { %v10027_v17 = vadd.f32 %v871_v16, %v706_v8  ;;  %v8929_v8 = vld [vmem:[%s12705_s2 + $0x228] sm:$0xff] }
  0xd4   : > { %3152 = vmatpush.bf16.msra.mxu0 %v8929_v8 }
  0xd6   : > { %v751_v24 = vpop.f32.mrf.mxu2 }
  0xd7   : > { %v916_v25 = vpop.f32.mrf.mxu3 }
  0xd8   : > { %v10032_v26 = vadd.f32 %v916_v25, %v751_v24  ;;  %v709_v28 = vpop.f32.mrf.mxu0  ;;  %v980_v25 = vrot.slane %v9856_v21, 1 }
  0xda   : > { %v874_v32 = vpop.f32.mrf.mxu1  ;;  %v981_v36 = vsel %vm970_vm1, %v978_v52, %v980_v25 }
  0xdb   : > { %v10041_v34 = vadd.f32 %v874_v32, %v709_v28  ;;  %1092 = vmatmul.bf16.gmra.mxu2 %v977_v29  ;;  %1870 = vmatmul.bf16.gmra.mxu0 %v1650_v12  ;;  %v1667_v28 = vor.u32 %v1666_v20, %v1663_v19  ;;  %v1365_v29 = vrot.slane %v10063_v0, 1  ;;  %v2018_v12 = vrot.slane %v10063_v0, 2 }
  0xdc   : > { %1477 = vmatmul.bf16.gmra.mxu3 %v1362_v33 }
  0xdd   : > { %2130 = vmatmul.bf16.gmra.mxu1 %v2015_v55  ;;  %v1668_v38 = vsel %vm1615_vm2, %v1658_v54, %v1667_v28  ;;  %v2019_v21 = vsel %vm2008_vm3, %v2016_v58, %v2018_v12 }
  0xde   : > { %v754_v40 = vpop.f32.mrf.mxu2 }
  0xdf   : > { %v919_v41 = vpop.f32.mrf.mxu3 }
  0xe0   : > { %v10045_v43 = vadd.f32 %v919_v41, %v754_v40  ;;  %v711_v44 = vpop.f32.mrf.mxu0  ;;  %v10086_v40 = vld [vmem:[%s9744_s26 + $0x38] sm:$0xff] }
  0xe1   : > { %v1670_v46 = vshrl.u32 %v10086_v40, 16  ;;  %v2020_v0 = vrot.slane %v10086_v40, 2 }
  0xe2   : > { %v876_v47 = vpop.f32.mrf.mxu1 }
  0xe3   : > { %v10047_v48 = vadd.f32 %v876_v47, %v711_v44  ;;  %v1366_v44 = vsel %vm970_vm1, %v1363_v57, %v1365_v29  ;;  %v1673_v47 = vshll.u32 %v10086_v40, 16  ;;  %v2021_v20 = vsel %vm2008_vm3, %v2018_v12, %v2020_v0 }
  0xe5   : > { %v1675_v57 = vrot.slane %v1673_v47, 2 }
  0xe6   : > { %v756_v60 = vpop.f32.mrf.mxu2 }
  0xe7   : > { %v921_v61 = vpop.f32.mrf.mxu3 }
  0xe8   : > { %v10058_v62 = vadd.f32 %v921_v61, %v756_v60  ;;  %v714_v22 = vpop.f32.mrf.mxu0  ;;  %v1672_v60 = vrot.slane %v1670_v46, 1 }
  0xea   : > { %v879_v1 = vpop.f32.mrf.mxu1 }
  0xeb   : > { %v10067_v6 = vadd.f32 %v879_v1, %v714_v22  ;;  %1097 = vmatmul.bf16.gmra.mxu2 %v979_v39  ;;  %1875 = vmatmul.bf16.gmra.mxu0 %v1659_v63  ;;  %v982_v22 = vrot.slane %v9874_v37, 1  ;;  %v1676_v39 = vor.u32 %v1675_v57, %v1672_v60  ;;  %v1367_v63 = vrot.slane %v10086_v40, 1  ;;  %v8912_v37 = vld [vmem:[%s12705_s2 + $0x1a0] sm:$0xff] }
  0xec   : > { %1482 = vmatmul.bf16.gmra.mxu3 %v1364_v5  ;;  %2500 = vmatpush.bf16.msra.mxu2 %v8912_v37 }
  0xed   : > { %2135 = vmatmul.bf16.gmra.mxu1 %v2017_v3  ;;  %v983_v10 = vsel %vm970_vm1, %v980_v25, %v982_v22  ;;  %v1677_v8 = vsel %vm1615_vm2, %v1667_v28, %v1676_v39  ;;  %v1368_v19 = vsel %vm970_vm1, %v1365_v29, %v1367_v63 }
  0xee   : > { %v759_v13 = vpop.f32.mrf.mxu2 }
  0xef   : > { %v924_v15 = vpop.f32.mrf.mxu3 }
  0xf0   : > { %v10074_v16 = vadd.f32 %v924_v15, %v759_v13  ;;  %v716_v18 = vpop.f32.mrf.mxu0  ;;  %v10106_v13 = vld [vmem:[%s9744_s26 + $0x40] sm:$0xff] }
  0xf1   : > { %v8920_v15 = vld [vmem:[%s12705_s2 + $0x1e0] sm:$0xff]  ;;  %v1679_v25 = vshrl.u32 %v10106_v13, 16  ;;  %v1682_v28 = vshll.u32 %v10106_v13, 16  ;;  %v1369_v46 = vrot.slane %v10106_v13, 1  ;;  %v2022_v47 = vrot.slane %v10106_v13, 2 }
  0xf2   : > { %v881_v23 = vpop.f32.mrf.mxu1  ;;  %2893 = vmatpush.bf16.msra.mxu3 %v8920_v15 }
  0xf3   : > { %v10076_v24 = vadd.f32 %v881_v23, %v716_v18  ;;  %v1681_v29 = vrot.slane %v1679_v25, 1  ;;  %v1684_v12 = vrot.slane %v1682_v28, 2 }
  0xf6   : > { %v761_v31 = vpop.f32.mrf.mxu2 }
  0xf7   : > { %v926_v32 = vpop.f32.mrf.mxu3 }
  0xf8   : > { %v10081_v33 = vadd.f32 %v926_v32, %v761_v31  ;;  %v719_v55 = vpop.f32.mrf.mxu0 }
  0xfa   : > { %v884_v41 = vpop.f32.mrf.mxu1 }
  0xfb   : > { %v10090_v45 = vadd.f32 %v884_v41, %v719_v55  ;;  %1102 = vmatmul.bf16.gmra.mxu2 %v981_v36  ;;  %1880 = vmatmul.bf16.gmra.mxu0 %v1668_v38  ;;  %v8928_v38 = vld [vmem:[%s12705_s2 + $0x220] sm:$0xff] }
  0xfc   : > { %1487 = vmatmul.bf16.gmra.mxu3 %v1366_v44  ;;  %3153 = vmatpush.bf16.msra.mxu0 %v8928_v38  ;;  %v984_v44 = vrot.slane %v9893_v53, 1  ;;  %v2023_v53 = vsel %vm2008_vm3, %v2020_v0, %v2022_v47 }
  0xfd   : > { %2140 = vmatmul.bf16.gmra.mxu1 %v2019_v21  ;;  %v1685_v21 = vor.u32 %v1684_v12, %v1681_v29 }
  0xfe   : > { %v764_v50 = vpop.f32.mrf.mxu2  ;;  %v985_v57 = vsel %vm970_vm1, %v982_v22, %v984_v44 }
  0xff   : > { %v929_v51 = vpop.f32.mrf.mxu3 }
 0x100   : > { %v10094_v52 = vadd.f32 %v929_v51, %v764_v50  ;;  %v721_v54 = vpop.f32.mrf.mxu0 }
 0x102   : > { %v886_v61 = vpop.f32.mrf.mxu1 }
 0x103   : > { %v10096_v58 = vadd.f32 %v886_v61, %v721_v54  ;;  %v1686_v61 = vsel %vm1615_vm2, %v1676_v39, %v1685_v21 }
 0x106   : > { %v766_v1 = vpop.f32.mrf.mxu2 }
 0x107   : > { %v931_v5 = vpop.f32.mrf.mxu3 }
 0x108   : > { %v10101_v3 = vadd.f32 %v931_v5, %v766_v1  ;;  %v724_v9 = vpop.f32.mrf.mxu0  ;;  %v10135_v1 = vld [vmem:[%s9744_s26 + $0x48] sm:$0xff] }
 0x109   : > { %v1691_v13 = vshll.u32 %v10135_v1, 16  ;;  %v1371_v28 = vrot.slane %v10135_v1, 1 }
 0x10a   : > { %v889_v18 = vpop.f32.mrf.mxu1 }
 0x10b   : > { %v10116_v23 = vadd.f32 %v889_v18, %v724_v9  ;;  %1107 = vmatmul.bf16.gmra.mxu2 %v983_v10  ;;  %1885 = vmatmul.bf16.gmra.mxu0 %v1677_v8  ;;  %v1370_v9 = vsel %vm970_vm1, %v1367_v63, %v1369_v46  ;;  %v1688_v8 = vshrl.u32 %v10135_v1, 16  ;;  %v1693_v63 = vrot.slane %v1691_v13, 2 }
 0x10c   : > { %1492 = vmatmul.bf16.gmra.mxu3 %v1368_v19 }
 0x10d   : > { %2145 = vmatmul.bf16.gmra.mxu1 %v2021_v20  ;;  %v1690_v18 = vrot.slane %v1688_v8, 1  ;;  %v986_v20 = vrot.slane %v9914_v7, 1 }
 0x10e   : > { %v769_v31 = vpop.f32.mrf.mxu2 }
 0x10f   : > { %v934_v32 = vpop.f32.mrf.mxu3  ;;  %v1694_v25 = vor.u32 %v1693_v63, %v1690_v18  ;;  %v987_v38 = vsel %vm970_vm1, %v984_v44, %v986_v20 }
 0x110   : > { %v10120_v55 = vadd.f32 %v934_v32, %v769_v31  ;;  %v726_v36 = vpop.f32.mrf.mxu0  ;;  %v2024_v31 = vrot.slane %v10135_v1, 2 }
 0x112   : > { %v891_v40 = vpop.f32.mrf.mxu1  ;;  %v2025_v7 = vsel %vm2008_vm3, %v2022_v47, %v2024_v31 }
 0x113   : > { %v10125_v41 = vadd.f32 %v891_v40, %v726_v36  ;;  %v1695_v40 = vsel %vm1615_vm2, %v1685_v21, %v1694_v25  ;;  %v8911_v21 = vld [vmem:[%s12705_s2 + $0x198] sm:$0xff] }
 0x114   : > { %2501 = vmatpush.bf16.msra.mxu2 %v8911_v21 }
 0x116   : > { %v771_v50 = vpop.f32.mrf.mxu2 }
 0x117   : > { %v936_v51 = vpop.f32.mrf.mxu3 }
 0x118   : > { %v10130_v54 = vadd.f32 %v936_v51, %v771_v50  ;;  %v729_v60 = vpop.f32.mrf.mxu0  ;;  %v10155_v50 = vld [vmem:[%s9744_s26 + $0x50] sm:$0xff] }
 0x119   : > { %v1700_v44 = vshll.u32 %v10155_v50, 16  ;;  %v1373_v63 = vrot.slane %v10155_v50, 1 }
 0x11a   : > { %v894_v5 = vpop.f32.mrf.mxu1 }
 0x11b   : > { %v10139_v10 = vadd.f32 %v894_v5, %v729_v60  ;;  %1112 = vmatmul.bf16.gmra.mxu2 %v985_v57  ;;  %1890 = vmatmul.bf16.gmra.mxu0 %v1686_v61  ;;  %v1372_v60 = vsel %vm970_vm1, %v1369_v46, %v1371_v28  ;;  %v1697_v61 = vshrl.u32 %v10155_v50, 16  ;;  %v8919_v46 = vld [vmem:[%s12705_s2 + $0x1d8] sm:$0xff]  ;;  %v1702_v8 = vrot.slane %v1700_v44, 2 }
 0x11c   : > { %1497 = vmatmul.bf16.gmra.mxu3 %v1370_v9 }
 0x11d   : > { %2150 = vmatmul.bf16.gmra.mxu1 %v2023_v53  ;;  %2894 = vmatpush.bf16.msra.mxu3 %v8919_v46  ;;  %v1699_v53 = vrot.slane %v1697_v61, 1  ;;  %v1374_v61 = vsel %vm970_vm1, %v1371_v28, %v1373_v63 }
 0x11e   : > { %v774_v22 = vpop.f32.mrf.mxu2 }
 0x11f   : > { %v939_v37 = vpop.f32.mrf.mxu3  ;;  %v1703_v18 = vor.u32 %v1702_v8, %v1699_v53 }
 0x120   : > { %v10143_v39 = vadd.f32 %v939_v37, %v774_v22  ;;  %v731_v15 = vpop.f32.mrf.mxu0  ;;  %v9619_v37 = vld [vmem:[%s9744_s26 + $0x48] sm:$0xff] }
 0x122   : > { %v896_v19 = vpop.f32.mrf.mxu1 }
 0x123   : > { %v10145_v0 = vadd.f32 %v896_v19, %v731_v15  ;;  %v988_v15 = vrot.slane %v9619_v37, 1  ;;  %v2026_v19 = vrot.slane %v10155_v50, 2 }
 0x125   : > { %v2027_v50 = vsel %vm2008_vm3, %v2024_v31, %v2026_v19 }
 0x126   : > { %v776_v32 = vpop.f32.mrf.mxu2 }
 0x127   : > { %v941_v36 = vpop.f32.mrf.mxu3 }
 0x128   : > { %v10150_v29 = vadd.f32 %v941_v36, %v776_v32  ;;  %v734_v12 = vpop.f32.mrf.mxu0  ;;  %v8927_v32 = vld [vmem:[%s12705_s2 + $0x218] sm:$0xff] }
 0x129   : > { %3154 = vmatpush.bf16.msra.mxu0 %v8927_v32 }
 0x12a   : > { %v899_v51 = vpop.f32.mrf.mxu1 }
 0x12b   : > { %v10159_v57 = vadd.f32 %v899_v51, %v734_v12  ;;  %1117 = vmatmul.bf16.gmra.mxu2 %v987_v38  ;;  %1895 = vmatmul.bf16.gmra.mxu0 %v1695_v40  ;;  %v989_v51 = vsel %vm970_vm1, %v986_v20, %v988_v15 }
 0x12c   : > { %1502 = vmatmul.bf16.gmra.mxu3 %v1372_v60  ;;  %v1704_v60 = vsel %vm1615_vm2, %v1694_v25, %v1703_v18 }
 0x12d   : > { %2155 = vmatmul.bf16.gmra.mxu1 %v2025_v7  ;;  %v10184_v7 = vld [vmem:[%s9744_s26 + $0x58] sm:$0xff] }
 0x12e   : > { %v779_v47 = vpop.f32.mrf.mxu2  ;;  %v1706_v21 = vshrl.u32 %v10184_v7, 16  ;;  %v1709_v46 = vshll.u32 %v10184_v7, 16 }
 0x12f   : > { %v944_v1 = vpop.f32.mrf.mxu3 }
 0x130   : > { %v10169_v5 = vadd.f32 %v944_v1, %v779_v47  ;;  %v736_v9 = vpop.f32.mrf.mxu0  ;;  %v1711_v53 = vrot.slane %v1709_v46, 2 }
 0x132   : > { %v901_v13 = vpop.f32.mrf.mxu1 }
 0x133   : > { %v10171_v22 = vadd.f32 %v901_v13, %v736_v9  ;;  %v1708_v9 = vrot.slane %v1706_v21, 1  ;;  %v9620_v13 = vld [vmem:[%s9744_s26 + $0x50] sm:$0xff] }
 0x134   : > { %v990_v37 = vrot.slane %v9620_v13, 1 }
 0x135   : > { %v1712_v32 = vor.u32 %v1711_v53, %v1708_v9 }
 0x136   : > { %v781_v36 = vpop.f32.mrf.mxu2 }
 0x137   : > { %v946_v12 = vpop.f32.mrf.mxu3  ;;  %v1713_v46 = vsel %vm1615_vm2, %v1703_v18, %v1712_v32 }
 0x138   : > { %v10179_v38 = vadd.f32 %v946_v12, %v781_v36  ;;  %v1861_v40 = vpop.f32.mrf.mxu0  ;;  %v1375_v12 = vrot.slane %v10184_v7, 1 }
 0x13a   : > { %v2121_v44 = vpop.f32.mrf.mxu1 }
 0x13b   : > { %1122 = vmatmul.bf16.gmra.mxu2 %v989_v51  ;;  %1900 = vmatmul.bf16.gmra.mxu0 %v1704_v60  ;;  %v2028_v51 = vrot.slane %v10184_v7, 2 }
 0x13c   : > { %1507 = vmatmul.bf16.gmra.mxu3 %v1374_v61 }
 0x13d   : > { %2160 = vmatmul.bf16.gmra.mxu1 %v2027_v50 }
 0x13e   : > { %v1083_v47 = vpop.f32.mrf.mxu2 }
 0x13f   : > { %v1173_v20 = vadd.f32 %v1083_v47, %v9968_v56  ;;  %v1468_v25 = vpop.f32.mrf.mxu3  ;;  %v8964_v56 = vld [vmem:[%s12708_s5 + $0x78] sm:$0xff] }
 0x140   : > { %v1863_v1 = vpop.f32.mrf.mxu0  ;;  %3999 = vmatpush.bf16.msra.mxu1 %v8964_v56 }
 0x141   : > { %v1558_v28 = vadd.f32 %v1468_v25, %v1173_v20  ;;  %v1376_v20 = vsel %vm970_vm1, %v1373_v63, %v1375_v12  ;;  %v2029_v25 = vsel %vm2008_vm3, %v2026_v19, %v2028_v51 }
 0x142   : > { %v2123_v8 = vpop.f32.mrf.mxu1 }
 0x143   : > { %v1951_v31 = vadd.f32 %v1861_v40, %v1558_v28  ;;  %v991_v40 = vsel %vm970_vm1, %v988_v15, %v990_v37 }
 0x145   : > { %v10192_v36 = vadd.f32 %v2121_v44, %v1951_v31  ;;  %v10203_v44 = vld [vmem:[%s9744_s26 + $0x60] sm:$0xff] }
 0x146   : > { %v1085_v60 = vpop.f32.mrf.mxu2  ;;  %v1718_v15 = vshll.u32 %v10203_v44, 16 }
 0x147   : > { %v1174_v61 = vadd.f32 %v1085_v60, %v9978_v14  ;;  %v1470_v50 = vpop.f32.mrf.mxu3  ;;  %v1715_v14 = vshrl.u32 %v10203_v44, 16 }
 0x148   : > { %v1866_v21 = vpop.f32.mrf.mxu0  ;;  %v1720_v56 = vrot.slane %v1718_v15, 2 }
 0x149   : > { %v1559_v47 = vadd.f32 %v1470_v50, %v1174_v61  ;;  %v1717_v13 = vrot.slane %v1715_v14, 1  ;;  %v8918_v61 = vld [vmem:[%s12705_s2 + $0x1d0] sm:$0xff]  ;;  %v9621_v50 = vld [vmem:[%s9744_s26 + $0x58] sm:$0xff] }
 0x14a   : > { %v2126_v7 = vpop.f32.mrf.mxu1  ;;  %2895 = vmatpush.bf16.msra.mxu3 %v8918_v61 }
 0x14b   : > { %1127 = vmatmul.bf16.gmra.mxu2 %v991_v40  ;;  %1905 = vmatmul.bf16.gmra.mxu0 %v1713_v46  ;;  %v1952_v9 = vadd.f32 %v1863_v1, %v1559_v47  ;;  %v8910_v1 = vld [vmem:[%s12705_s2 + $0x190] sm:$0xff]  ;;  %v1721_v40 = vor.u32 %v1720_v56, %v1717_v13  ;;  %v1377_v47 = vrot.slane %v10203_v44, 1 }
 0x14c   : > { %1512 = vmatmul.bf16.gmra.mxu3 %v1376_v20  ;;  %2502 = vmatpush.bf16.msra.mxu2 %v8910_v1  ;;  %v2030_v20 = vrot.slane %v10203_v44, 2  ;;  %v8926_v44 = vld [vmem:[%s12705_s2 + $0x210] sm:$0xff] }
 0x14d   : > { %2165 = vmatmul.bf16.gmra.mxu1 %v2029_v25  ;;  %v10209_v53 = vadd.f32 %v2123_v8, %v1952_v9  ;;  %v1378_v13 = vsel %vm970_vm1, %v1375_v12, %v1377_v47  ;;  %3155 = vmatpush.bf16.msra.mxu0 %v8926_v44 }
 0x14e   : > { %v1088_v18 = vpop.f32.mrf.mxu2  ;;  %v2031_v56 = vsel %vm2008_vm3, %v2028_v51, %v2030_v20 }
 0x14f   : > { %v1175_v28 = vadd.f32 %v1088_v18, %v9992_v35  ;;  %v1473_v31 = vpop.f32.mrf.mxu3  ;;  %v992_v35 = vrot.slane %v9621_v50, 1 }
 0x150   : > { %v1868_v63 = vpop.f32.mrf.mxu0 }
 0x151   : > { %v1560_v19 = vadd.f32 %v1473_v31, %v1175_v28  ;;  %v993_v18 = vsel %vm970_vm1, %v990_v37, %v992_v35  ;;  %v10227_v28 = vld [vmem:[%s9744_s26 + $0x68] sm:$0xff] }
 0x152   : > { %v2128_v60 = vpop.f32.mrf.mxu1  ;;  %v1724_v37 = vshrl.u32 %v10227_v28, 16 }
 0x153   : > { %v1953_v8 = vadd.f32 %v1866_v21, %v1560_v19  ;;  %v1722_v21 = vsel %vm1615_vm2, %v1712_v32, %v1721_v40  ;;  %v1727_v32 = vshll.u32 %v10227_v28, 16 }
 0x155   : > { %v10219_v46 = vadd.f32 %v2126_v7, %v1953_v8  ;;  %v1726_v8 = vrot.slane %v1724_v37, 1  ;;  %v1729_v50 = vrot.slane %v1727_v32, 2 }
 0x156   : > { %v1090_v25 = vpop.f32.mrf.mxu2 }
 0x157   : > { %v1176_v9 = vadd.f32 %v1090_v25, %v10004_v49  ;;  %v1475_v14 = vpop.f32.mrf.mxu3 }
 0x158   : > { %v1871_v15 = vpop.f32.mrf.mxu0 }
 0x159   : > { %v1561_v31 = vadd.f32 %v1475_v14, %v1176_v9  ;;  %v9622_v14 = vld [vmem:[%s9744_s26 + $0x60] sm:$0xff] }
 0x15a   : > { %v2131_v7 = vpop.f32.mrf.mxu1 }
 0x15b   : > { %1132 = vmatmul.bf16.gmra.mxu2 %v993_v18  ;;  %1910 = vmatmul.bf16.gmra.mxu0 %v1722_v21  ;;  %v1954_v49 = vadd.f32 %v1868_v63, %v1561_v31  ;;  %v994_v18 = vrot.slane %v9622_v14, 1  ;;  %v1730_v21 = vor.u32 %v1729_v50, %v1726_v8 }
 0x15c   : > { %1517 = vmatmul.bf16.gmra.mxu3 %v1378_v13  ;;  %v2032_v13 = vrot.slane %v10227_v28, 2 }
 0x15d   : > { %2170 = vmatmul.bf16.gmra.mxu1 %v2031_v56  ;;  %v10236_v19 = vadd.f32 %v2128_v60, %v1954_v49  ;;  %v1379_v60 = vrot.slane %v10227_v28, 1  ;;  %v995_v37 = vsel %vm970_vm1, %v992_v35, %v994_v18  ;;  %v1731_v32 = vsel %vm1615_vm2, %v1721_v40, %v1730_v21  ;;  %v8963_v28 = vld [vmem:[%s12708_s5 + $0x70] sm:$0xff] }
 0x15e   : > { %v1093_v12 = vpop.f32.mrf.mxu2  ;;  %4000 = vmatpush.bf16.msra.mxu1 %v8963_v28 }
 0x15f   : > { %v1177_v51 = vadd.f32 %v1093_v12, %v10021_v2  ;;  %v1478_v1 = vpop.f32.mrf.mxu3  ;;  %v10248_v12 = vld [vmem:[%s9744_s26 + $0x70] sm:$0xff] }
 0x160   : > { %v1873_v61 = vpop.f32.mrf.mxu0  ;;  %v1733_v35 = vshrl.u32 %v10248_v12, 16  ;;  %v1736_v40 = vshll.u32 %v10248_v12, 16 }
 0x161   : > { %v1562_v25 = vadd.f32 %v1478_v1, %v1177_v51  ;;  %v1380_v51 = vsel %vm970_vm1, %v1377_v47, %v1379_v60  ;;  %v2033_v1 = vsel %vm2008_vm3, %v2030_v20, %v2032_v13 }
 0x162   : > { %v2133_v63 = vpop.f32.mrf.mxu1  ;;  %v1738_v14 = vrot.slane %v1736_v40, 2 }
 0x163   : > { %v1955_v9 = vadd.f32 %v1871_v15, %v1562_v25 }
 0x165   : > { %v10240_v31 = vadd.f32 %v2131_v7, %v1955_v9  ;;  %v1735_v9 = vrot.slane %v1733_v35, 1 }
 0x166   : > { %v1095_v56 = vpop.f32.mrf.mxu2 }
 0x167   : > { %v1178_v2 = vadd.f32 %v1095_v56, %v10027_v17  ;;  %v1480_v44 = vpop.f32.mrf.mxu3 }
 0x168   : > { %v1876_v49 = vpop.f32.mrf.mxu0 }
 0x169   : > { %v1563_v15 = vadd.f32 %v1480_v44, %v1178_v2 }
 0x16a   : > { %v2136_v7 = vpop.f32.mrf.mxu1 }
 0x16b   : > { %1137 = vmatmul.bf16.gmra.mxu2 %v995_v37  ;;  %1915 = vmatmul.bf16.gmra.mxu0 %v1731_v32  ;;  %v1956_v17 = vadd.f32 %v1873_v61, %v1563_v15  ;;  %v8909_v61 = vld [vmem:[%s12705_s2 + $0x188] sm:$0xff]  ;;  %v1739_v32 = vor.u32 %v1738_v14, %v1735_v9 }
 0x16c   : > { %1522 = vmatmul.bf16.gmra.mxu3 %v1380_v51  ;;  %2503 = vmatpush.bf16.msra.mxu2 %v8909_v61  ;;  %v9623_v37 = vld [vmem:[%s9744_s26 + $0x68] sm:$0xff]  ;;  %v2034_v51 = vrot.slane %v10248_v12, 2 }
 0x16d   : > { %2175 = vmatmul.bf16.gmra.mxu1 %v2033_v1  ;;  %v10257_v8 = vadd.f32 %v2133_v63, %v1956_v17  ;;  %v996_v63 = vrot.slane %v9623_v37, 1  ;;  %v8917_v1 = vld [vmem:[%s12705_s2 + $0x1c8] sm:$0xff] }
 0x16e   : > { %v1098_v47 = vpop.f32.mrf.mxu2  ;;  %2896 = vmatpush.bf16.msra.mxu3 %v8917_v1  ;;  %v2035_v14 = vsel %vm2008_vm3, %v2032_v13, %v2034_v51 }
 0x16f   : > { %v1179_v20 = vadd.f32 %v1098_v47, %v10041_v34  ;;  %v1483_v50 = vpop.f32.mrf.mxu3  ;;  %v1381_v34 = vrot.slane %v10248_v12, 1  ;;  %v997_v40 = vsel %vm970_vm1, %v994_v18, %v996_v63  ;;  %v1740_v47 = vsel %vm1615_vm2, %v1730_v21, %v1739_v32 }
 0x170   : > { %v1878_v25 = vpop.f32.mrf.mxu0 }
 0x171   : > { %v1564_v56 = vadd.f32 %v1483_v50, %v1179_v20  ;;  %v1382_v50 = vsel %vm970_vm1, %v1379_v60, %v1381_v34  ;;  %v8925_v60 = vld [vmem:[%s12705_s2 + $0x208] sm:$0xff] }
 0x172   : > { %v2138_v2 = vpop.f32.mrf.mxu1  ;;  %3156 = vmatpush.bf16.msra.mxu0 %v8925_v60 }
 0x173   : > { %v1957_v44 = vadd.f32 %v1876_v49, %v1564_v56 }
 0x175   : > { %v10264_v15 = vadd.f32 %v2136_v7, %v1957_v44  ;;  %v10275_v7 = vld [vmem:[%s9744_s26 + $0x78] sm:$0xff] }
 0x176   : > { %v1100_v28 = vpop.f32.mrf.mxu2  ;;  %v1742_v56 = vshrl.u32 %v10275_v7, 16  ;;  %v1745_v18 = vshll.u32 %v10275_v7, 16 }
 0x177   : > { %v1180_v17 = vadd.f32 %v1100_v28, %v10047_v48  ;;  %v1485_v35 = vpop.f32.mrf.mxu3  ;;  %v9660_v28 = vmov 0  }
 0x178   : > { %v1881_v49 = vpop.f32.mrf.mxu0  ;;  %v1747_v1 = vrot.slane %v1745_v18, 2  ;;  %9612 = vset.pattern.permute.xlu0 %v9660_v28  ;;  %9613 = vset.pattern.permute.xlu1 %v9660_v28  ;;  %3654 = vst [vmem:[#allocation2 + $0x4] sm:$0xf] %v9660_v28 }
 0x179   : > { %v1565_v20 = vadd.f32 %v1485_v35, %v1180_v17  ;;  %9614 = vset.pattern.permute.xlu2 %v9660_v28  ;;  %3655 = vst [vmem:[#allocation2 + $0x8] sm:$0xf] %v9660_v28 }
 0x17a   : > { %v2141_v9 = vpop.f32.mrf.mxu1  ;;  %3656 = vst [vmem:[#allocation2 + $0xc] sm:$0xf] %v9660_v28 }
 0x17b   : > { %1142 = vmatmul.bf16.gmra.mxu2 %v997_v40  ;;  %1920 = vmatmul.bf16.gmra.mxu0 %v1740_v47  ;;  %v1958_v48 = vadd.f32 %v1878_v25, %v1565_v20  ;;  %v1744_v25 = vrot.slane %v1742_v56, 1  ;;  %v9624_v40 = vld [vmem:[%s9744_s26 + $0x70] sm:$0xff]  ;;  %3657 = vst [vmem:[#allocation2 + $0xa0] sm:$0xf] %v9660_v28 }
 0x17c   : > { %1527 = vmatmul.bf16.gmra.mxu3 %v1382_v50  ;;  %v998_v47 = vrot.slane %v9624_v40, 1  ;;  %3658 = vst [vmem:[#allocation2 + $0xa4] sm:$0xf] %v9660_v28 }
 0x17d   : > { %2180 = vmatmul.bf16.gmra.mxu1 %v2035_v14  ;;  %v10283_v21 = vadd.f32 %v2138_v2, %v1958_v48  ;;  %v3401_v2 = vld [vmem:[%s12704_s1] sm:$0xff]  ;;  %v1748_v20 = vor.u32 %v1747_v1, %v1744_v25  ;;  %v1383_v14 = vrot.slane %v10275_v7, 1  ;;  %v2036_v48 = vrot.slane %v10275_v7, 2  ;;  %3659 = vst [vmem:[#allocation2 + $0xa8] sm:$0xf] %v9660_v28 }
 0x17e   : > { %v1103_v61 = vpop.f32.mrf.mxu2  ;;  %3439 = vperm.xlu0 %9612, %v3401_v2  }
 0x17f   : > { %v1181_v44 = vadd.f32 %v1103_v61, %v10067_v6  ;;  %v1488_v37 = vpop.f32.mrf.mxu3  ;;  %v1384_v7 = vsel %vm970_vm1, %v1381_v34, %v1383_v14  ;;  %v8962_v34 = vld [vmem:[%s12708_s5 + $0x68] sm:$0xff] }
 0x180   : > { %v1883_v13 = vpop.f32.mrf.mxu0  ;;  %4001 = vmatpush.bf16.msra.mxu1 %v8962_v34 }
 0x181   : > { %v1566_v17 = vadd.f32 %v1488_v37, %v1181_v44  ;;  %v1749_v44 = vsel %vm1615_vm2, %v1739_v32, %v1748_v20  ;;  %v10301_v37 = vld [vmem:[%s9744_s26 + $0x80] sm:$0xff] }
 0x182   : > { %v2143_v35 = vpop.f32.mrf.mxu1  ;;  %v1751_v32 = vshrl.u32 %v10301_v37, 16  ;;  %v1754_v28 = vshll.u32 %v10301_v37, 16 }
 0x183   : > { %v1959_v6 = vadd.f32 %v1881_v49, %v1566_v17  ;;  %v999_v49 = vsel %vm970_vm1, %v996_v63, %v998_v47 }
 0x184   : > { %v1756_v40 = vrot.slane %v1754_v28, 2 }
 0x185   : > { %v10293_v50 = vadd.f32 %v2141_v9, %v1959_v6  ;;  %v3402_v9 = vld [vmem:[%s12704_s1 + $0x8] sm:$0xff] }
 0x186   : > { %v1105_v56 = vpop.f32.mrf.mxu2  ;;  %3444 = vperm.xlu0 %9612, %v3402_v9  }
 0x187   : > { %v1182_v18 = vadd.f32 %v1105_v56, %v10076_v24  ;;  %v1490_v60 = vpop.f32.mrf.mxu3  ;;  %v2037_v24 = vsel %vm2008_vm3, %v2034_v51, %v2036_v48  ;;  %v3403_v56 = vld [vmem:[%s12704_s1 + $0x10] sm:$0xff] }
 0x188   : > { %v1886_v61 = vpop.f32.mrf.mxu0  ;;  %3449 = vperm.xlu1 %9613, %v3403_v56  }
 0x189   : > { %v1567_v25 = vadd.f32 %v1490_v60, %v1182_v18 }
 0x18a   : > { %v2146_v1 = vpop.f32.mrf.mxu1 }
 0x18b   : > { %1147 = vmatmul.bf16.gmra.mxu2 %v999_v49  ;;  %1925 = vmatmul.bf16.gmra.mxu0 %v1749_v44  ;;  %v1960_v63 = vadd.f32 %v1883_v13, %v1567_v25  ;;  %v1753_v13 = vrot.slane %v1751_v32, 1 }
 0x18c   : > { %1532 = vmatmul.bf16.gmra.mxu3 %v1384_v7  ;;  %v1385_v7 = vrot.slane %v10301_v37, 1 }
 0x18d   : > { %2185 = vmatmul.bf16.gmra.mxu1 %v2037_v24  ;;  %v10312_v2 = vadd.f32 %v2143_v35, %v1960_v63  ;;  %v3407_v35 = vld [vmem:[%s12704_s1 + $0x30] sm:$0xff]  ;;  %v1757_v9 = vor.u32 %v1756_v40, %v1753_v13  ;;  %v2038_v24 = vrot.slane %v10301_v37, 2 }
 0x18e   : > { %v1108_v12 = vpop.f32.mrf.mxu2  ;;  %3469 = vperm.xlu0 %9612, %v3407_v35   ;;  %v1386_v13 = vsel %vm970_vm1, %v1383_v14, %v1385_v7 }
 0x18f   : > { %v1183_v51 = vadd.f32 %v1108_v12, %v10090_v45  ;;  %v1493_v17 = vpop.f32.mrf.mxu3  ;;  %v9625_v45 = vld [vmem:[%s9744_s26 + $0x78] sm:$0xff]  ;;  %v2039_v40 = vsel %vm2008_vm3, %v2036_v48, %v2038_v24 }
 0x190   : > { %v1888_v6 = vpop.f32.mrf.mxu0  ;;  %v1000_v44 = vrot.slane %v9625_v45, 1 }
 0x191   : > { %v1568_v18 = vadd.f32 %v1493_v17, %v1183_v51  ;;  %v1758_v51 = vsel %vm1615_vm2, %v1748_v20, %v1757_v9  ;;  %v10333_v17 = vld [vmem:[%s9744_s26 + $0x88] sm:$0xff]  ;;  %v8916_v20 = vld [vmem:[%s12705_s2 + $0x1c0] sm:$0xff] }
 0x192   : > { %v2148_v60 = vpop.f32.mrf.mxu1  ;;  %v1001_v12 = vsel %vm970_vm1, %v998_v47, %v1000_v44  ;;  %v8908_v47 = vld [vmem:[%s12705_s2 + $0x180] sm:$0xff]  ;;  %v1760_v14 = vshrl.u32 %v10333_v17, 16  ;;  %v1763_v35 = vshll.u32 %v10333_v17, 16  ;;  %2897 = vmatpush.bf16.msra.mxu3 %v8916_v20  ;;  %v2040_v20 = vrot.slane %v10333_v17, 2 }
 0x193   : > { %v1961_v49 = vadd.f32 %v1886_v61, %v1568_v18  ;;  %v3404_v61 = vld [vmem:[%s12704_s1 + $0x18] sm:$0xff]  ;;  %2504 = vmatpush.bf16.msra.mxu2 %v8908_v47  ;;  %v1387_v47 = vrot.slane %v10333_v17, 1 }
 0x194   : > { %3454 = vperm.xlu1 %9613, %v3404_v61  }
 0x195   : > { %v10325_v25 = vadd.f32 %v2146_v1, %v1961_v49  ;;  %v3410_v1 = vld [vmem:[%s12704_s1 + $0x48] sm:$0xff] }
 0x196   : > { %v1110_v63 = vpop.f32.mrf.mxu2  ;;  %3484 = vperm.xlu0 %9612, %v3410_v1   ;;  %v9626_v1 = vld [vmem:[%s9744_s26 + $0x80] sm:$0xff] }
 0x197   : > { %v1184_v32 = vadd.f32 %v1110_v63, %v10096_v58  ;;  %v1495_v28 = vpop.f32.mrf.mxu3 }
 0x198   : > { %v1891_v34 = vpop.f32.mrf.mxu0 }
 0x199   : > { %v1569_v37 = vadd.f32 %v1495_v28, %v1184_v32  ;;  %v1762_v32 = vrot.slane %v1760_v14, 1  ;;  %v1765_v28 = vrot.slane %v1763_v35, 2 }
 0x19a   : > { %v2151_v58 = vpop.f32.mrf.mxu1 }
 0x19b   : > { %1152 = vmatmul.bf16.gmra.mxu2 %v1001_v12  ;;  %1930 = vmatmul.bf16.gmra.mxu0 %v1758_v51  ;;  %v1962_v56 = vadd.f32 %v1888_v6, %v1569_v37  ;;  %v3408_v6 = vld [vmem:[%s12704_s1 + $0x38] sm:$0xff]  ;;  %v3413_v12 = vld [vmem:[%s12704_s1 + $0x60] sm:$0xff]  ;;  %v1002_v37 = vrot.slane %v9626_v1, 1 }
 0x19c   : > { %1537 = vmatmul.bf16.gmra.mxu3 %v1386_v13  ;;  %3474 = vperm.xlu1 %9613, %v3408_v6   ;;  %v1766_v13 = vor.u32 %v1765_v28, %v1762_v32  ;;  %v3416_v32 = vld [vmem:[%s12704_s1 + $0x78] sm:$0xff]  ;;  %v1388_v28 = vsel %vm970_vm1, %v1385_v7, %v1387_v47  ;;  %v2041_v6 = vsel %vm2008_vm3, %v2038_v24, %v2040_v20 }
 0x19d   : > { %2190 = vmatmul.bf16.gmra.mxu1 %v2039_v40  ;;  %v10351_v48 = vadd.f32 %v2148_v60, %v1962_v56 }
 0x19e   : > { %v1113_v18 = vpop.f32.mrf.mxu2  ;;  %3499 = vperm.xlu0 %9612, %v3413_v12  }
 0x19f   : > { %v1185_v49 = vadd.f32 %v1113_v18, %v10116_v23  ;;  %v1498_v45 = vpop.f32.mrf.mxu3  ;;  %v8924_v23 = vld [vmem:[%s12705_s2 + $0x200] sm:$0xff] }
 0x1a0   : > { %v1893_v63 = vpop.f32.mrf.mxu0  ;;  %3157 = vmatpush.bf16.msra.mxu0 %v8924_v23 }
 0x1a1   : > { %v1570_v60 = vadd.f32 %v1498_v45, %v1185_v49  ;;  %v1003_v49 = vsel %vm970_vm1, %v1000_v44, %v1002_v37  ;;  %v1767_v45 = vsel %vm1615_vm2, %v1757_v9, %v1766_v13 }
 0x1a2   : > { %v10360_v51 = vpop.f32.mrf.mxu1 }
 0x1a3   : > { %v1963_v61 = vadd.f32 %v1891_v34, %v1570_v60  ;;  %v10374_v34 = vld [vmem:[%s9744_s26 + $0x90] sm:$0xff] }
 0x1a4   : > { %v1769_v9 = vshrl.u32 %v10374_v34, 16  ;;  %v1772_v12 = vshll.u32 %v10374_v34, 16 }
 0x1a5   : > { %v10366_v40 = vadd.f32 %v2151_v58, %v1963_v61  ;;  %v3411_v58 = vld [vmem:[%s12704_s1 + $0x50] sm:$0xff] }
 0x1a6   : > { %v1115_v56 = vpop.f32.mrf.mxu2  ;;  %3489 = vperm.xlu1 %9613, %v3411_v58   ;;  %3514 = vperm.xlu0 %9612, %v3416_v32   ;;  %v1771_v24 = vrot.slane %v1769_v9, 1  ;;  %v1774_v1 = vrot.slane %v1772_v12, 2  ;;  %v10402_v58 = vld [vmem:[%s9744_s26 + $0x88] sm:$0xff]  ;;  %v1389_v9 = vrot.slane %v10374_v34, 1  ;;  %v12713_v12 = vrot.slane %v10374_v34, 2 }
 0x1a7   : > { %v1186_v14 = vadd.f32 %v1115_v56, %v10125_v41  ;;  %v1500_v35 = vpop.f32.mrf.mxu3  ;;  %v3414_v56 = vld [vmem:[%s12704_s1 + $0x68] sm:$0xff]  ;;  %v12712_v32 = vrot.slane %v10402_v58, 1 }
 0x1a8   : > { %v1896_v18 = vpop.f32.mrf.mxu0 }
 0x1a9   : > { %v1571_v17 = vadd.f32 %v1500_v35, %v1186_v14 }
 0x1aa   : > { %v2156_v41 = vpop.f32.mrf.mxu1 }
 0x1ab   : > { %1157 = vmatmul.bf16.gmra.mxu2 %v1003_v49  ;;  %1935 = vmatmul.bf16.gmra.mxu0 %v1767_v45  ;;  %v10384_v44 = vadd.f32 %v1893_v63, %v1571_v17  ;;  %v3419_v63 = vld [vmem:[%s12704_s1 + $0x90] sm:$0xff]  ;;  %v1594_v49 = vld [vmem:[%s9744_s26 + $0x98] sm:$0x3]  ;;  %v10405_v17 = vor.u32 %v1774_v1, %v1771_v24 }
 0x1ac   : > { %1542 = vmatmul.bf16.gmra.mxu3 %v1388_v28  ;;  %v1613_v28 = vunpack.c.l.b16 %v1594_v49  ;;  %v1390_v49 = vsel %vm970_vm1, %v1387_v47, %v1389_v9 }
 0x1ad   : > { %2195 = vmatmul.bf16.gmra.mxu1 %v2041_v6  ;;  %v1776_v24 = vsel %vm1615_vm2, %v1766_v13, %v10405_v17  ;;  %v2043_v13 = vsel %vm2008_vm3, %v2040_v20, %v12713_v12 }
 0x1ae   : > { %v1118_v60 = vpop.f32.mrf.mxu2  ;;  %3504 = vperm.xlu1 %9613, %v3414_v56   ;;  %3529 = vperm.xlu0 %9612, %v3419_v63   ;;  %v1005_v56 = vsel %vm970_vm1, %v1002_v37, %v12712_v32  ;;  %v1614_v1 = vpack.c.b16 %v1613_v28, %v1613_v28  ;;  %v3417_v63 = vld [vmem:[%s12704_s1 + $0x80] sm:$0xff] }
 0x1af   : > { %v1187_v7 = vadd.f32 %v1118_v60, %v10139_v10  ;;  %v1503_v23 = vpop.f32.mrf.mxu3  ;;  %v8961_v10 = vld [vmem:[%s12708_s5 + $0x60] sm:$0xff] }
 0x1b0   : > { %v1898_v61 = vpop.f32.mrf.mxu0  ;;  %4002 = vmatpush.bf16.msra.mxu1 %v8961_v10  ;;  %v1245_v10 = vld [vmem:[%s9744_s26 + $0x98] sm:$0x1] }
 0x1b1   : > { %v1572_v14 = vadd.f32 %v1503_v23, %v1187_v7  ;;  %v1336_v28 = vunpack.c.l.b16 %v1245_v10  ;;  %v1006_v10 = vrot.slane %v9941_v30, 1 }
 0x1b2   : > { %v10395_v35 = vpop.f32.mrf.mxu1 }
 0x1b3   : > { %12794 = vst [vmem:[#allocation3_spill] sm:$0xff] %v10395_v35  ;;  %v1965_v45 = vadd.f32 %v1896_v18, %v1572_v14  ;;  %v1355_v12 = vpack.c.b16 %v1336_v28, %v1336_v28 }
 0x1b5   : > { %v10407_v6 = vadd.f32 %v2156_v41, %v1965_v45  ;;  %v3405_v41 = vld [vmem:[%s12704_s1 + $0x20] sm:$0xff]  ;;  %v1391_v28 = vrot.slane %v1355_v12, 1 }
 0x1b6   : > { %v1120_v60 = vpop.f32.mrf.mxu2  ;;  %3459 = vperm.xlu2 %9614, %v3405_v41   ;;  %3519 = vperm.xlu1 %9613, %v3417_v63  }
 0x1b7   : > { %v1188_v7 = vadd.f32 %v1120_v60, %v10145_v0  ;;  %v1505_v23 = vpop.f32.mrf.mxu3  ;;  %v3422_v0 = vld [vmem:[%s12704_s1 + $0xa8] sm:$0xff]  ;;  %v1778_v60 = vshrl.u32 %v1614_v1, 16  ;;  %v1392_v30 = vsel %vm970_vm1, %v1389_v9, %v1391_v28 }
 0x1b8   : > { %v1901_v18 = vpop.f32.mrf.mxu0  ;;  %3544 = vperm.xlu0 %9612, %v3422_v0  }
 0x1b9   : > { %v1573_v14 = vadd.f32 %v1505_v23, %v1188_v7  ;;  %v1781_v7 = vshll.u32 %v1614_v1, 16  ;;  %v1780_v41 = vrot.slane %v1778_v60, 1 }
 0x1ba   : > { %v2161_v37 = vpop.f32.mrf.mxu1 }
 0x1bb   : > { %1162 = vmatmul.bf16.gmra.mxu2 %v1005_v56  ;;  %1940 = vmatmul.bf16.gmra.mxu0 %v1776_v24  ;;  %v10431_v45 = vadd.f32 %v1898_v61, %v1573_v14  ;;  %v1783_v63 = vrot.slane %v1781_v7, 2  ;;  %v3406_v61 = vld [vmem:[%s12704_s1 + $0x28] sm:$0xff]  ;;  %v3420_v56 = vld [vmem:[%s12704_s1 + $0x98] sm:$0xff]  ;;  %v3425_v24 = vld [vmem:[%s12704_s1 + $0xc0] sm:$0xff] }
 0x1bc   : > { %1547 = vmatmul.bf16.gmra.mxu3 %v1390_v49  ;;  %v2248_v49 = vld [vmem:[%s9744_s26 + $0x14] sm:$0xf] }
 0x1bd   : > { %12795 = vst [vmem:[#allocation4_spill] sm:$0xff] %v10431_v45  ;;  %2200 = vmatmul.bf16.gmra.mxu1 %v2043_v13  ;;  %v1784_v60 = vor.u32 %v1783_v63, %v1780_v41  ;;  %v2339_v45 = vunpack.c.l.b16 %v2248_v49  ;;  %v12798_v63 = vrot.slane %v10374_v34, 2 }
 0x1be   : > { %v1123_v47 = vpop.f32.mrf.mxu2  ;;  %3464 = vperm.xlu2 %9614, %v3406_v61   ;;  %3534 = vperm.xlu1 %9613, %v3420_v56  }
 0x1bf   : > { %v1189_v23 = vadd.f32 %v1123_v47, %v10159_v57  ;;  %v1508_v32 = vpop.f32.mrf.mxu3  ;;  %v2247_v57 = vld [vmem:[%s9744_s26 + $0x10] sm:$0xc]  ;;  %v2044_v47 = vrot.slane %v1614_v1, 2  ;;  %v1785_v12 = vsel %vm1615_vm2, %v10405_v17, %v1784_v60  ;;  %v3409_v1 = vld [vmem:[%s12704_s1 + $0x40] sm:$0xff] }
 0x1c0   : > { %v1903_v20 = vpop.f32.mrf.mxu0  ;;  %3559 = vperm.xlu0 %9612, %v3425_v24   ;;  %v2338_v35 = vunpack.c.l.b16 %v2247_v57  ;;  %v12797_v24 = vrot.slane %v10402_v58, 1  ;;  %v3025_v17 = vld [vmem:[%s9744_s26 + $0x10] sm:$0x8] }
 0x1c1   : > { %v1574_v0 = vadd.f32 %v1508_v32, %v1189_v23  ;;  %v2045_v9 = vsel %vm2008_vm3, %v12798_v63, %v2044_v47 }
 0x1c2   : > { %v10443_v14 = vpop.f32.mrf.mxu1 }
 0x1c3   : > { %12796 = vst [vmem:[#allocation5_spill] sm:$0xff] %v10443_v14  ;;  %v1967_v13 = vadd.f32 %v1901_v18, %v1574_v0  ;;  %v10452_v14 = vld [vmem:[%s9744_s26 + $0x18] sm:$0xff]  ;;  %v1007_v18 = vsel %vm970_vm1, %v12797_v24, %v1006_v10  ;;  %v2375_v0 = vpack.c.b16 %v2339_v45, %v2338_v35  ;;  %v3426_v24 = vld [vmem:[%s12704_s1 + $0xc8] sm:$0xff] }
 0x1c4   : > { %v2663_v49 = vshrl.u32 %v10452_v14, 16  ;;  %v2666_v34 = vshll.u32 %v10452_v14, 16 }
 0x1c5   : > { %v10448_v7 = vadd.f32 %v2161_v37, %v1967_v13  ;;  %v3428_v37 = vld [vmem:[%s12704_s1 + $0xd8] sm:$0xff]  ;;  %v3044_v13 = vunpack.c.l.b16 %v3025_v17  ;;  %v2655_v10 = vshrl.u32 %v2375_v0, 16  ;;  %v2658_v28 = vshll.u32 %v2375_v0, 16 }
 0x1c6   : > { %v1125_v32 = vpop.f32.mrf.mxu2  ;;  %3479 = vperm.xlu2 %9614, %v3409_v1  }
 0x1c7   : > { %v1190_v23 = vadd.f32 %v1125_v32, %v10171_v22  ;;  %v1510_v61 = vpop.f32.mrf.mxu3  ;;  %v3423_v22 = vld [vmem:[%s12704_s1 + $0xb0] sm:$0xff]  ;;  %v2660_v1 = vrot.slane %v2658_v28, 3 }
 0x1c8   : > { %v1906_v56 = vpop.f32.mrf.mxu0  ;;  %3549 = vperm.xlu1 %9613, %v3423_v22   ;;  %3574 = vperm.xlu0 %9612, %v3428_v37   ;;  %v2394_v37 = vrot.slane %v2375_v0, 2 }
 0x1c9   : > { %v1575_v58 = vadd.f32 %v1510_v61, %v1190_v23  ;;  %v2665_v23 = vrot.slane %v2663_v49, 2  ;;  %v3045_v61 = vpack.c.b16 %v2339_v45, %v3044_v13 }
 0x1ca   : > { %v2166_v41 = vpop.f32.mrf.mxu1 }
 0x1cb   : > { %1167 = vmatmul.bf16.gmra.mxu2 %v1007_v18  ;;  %1945 = vmatmul.bf16.gmra.mxu0 %v1785_v12  ;;  %v10473_v57 = vadd.f32 %v1903_v20, %v1575_v58  ;;  %v3412_v20 = vld [vmem:[%s12704_s1 + $0x58] sm:$0xff]  ;;  %v3431_v18 = vld [vmem:[%s12704_s1 + $0xf0] sm:$0xff]  ;;  %v2657_v12 = vrot.slane %v2655_v10, 2  ;;  %v2395_v58 = vrot.slane %v10452_v14, 2  ;;  %v3047_v63 = vrot.slane %v3045_v61, 3 }
 0x1cc   : > { %1552 = vmatmul.bf16.gmra.mxu3 %v1392_v30  ;;  %v8960_v10 = vld [vmem:[%s12708_s5 + $0x58] sm:$0xff] }
 0x1cd   : > { %2205 = vmatmul.bf16.gmra.mxu1 %v2045_v9  ;;  %v3048_v9 = vrot.slane %v10452_v14, 3  ;;  %v2661_v49 = vor.u32 %v2660_v1, %v2657_v12 }
 0x1ce   : > { %v1128_v60 = vpop.f32.mrf.mxu2  ;;  %3494 = vperm.xlu2 %9614, %v3412_v20   ;;  %4003 = vmatpush.bf16.msra.mxu1 %v8960_v10  ;;  %v10510_v20 = vld [vmem:[%s9744_s26 + $0x20] sm:$0xff] }
 0x1cf   : > { %v1191_v35 = vadd.f32 %v1128_v60, %v9976_v4  ;;  %v1513_v47 = vpop.f32.mrf.mxu3  ;;  %v2668_v4 = vrot.slane %v2666_v34, 3  ;;  %v2396_v60 = vsel %vm2008_vm3, %v2394_v37, %v2395_v58  ;;  %v3049_v14 = vsel %vm3046_vm4, %v3047_v63, %v3048_v9  ;;  %v3418_v37 = vld [vmem:[%s12704_s1 + $0x88] sm:$0xff]  ;;  %v3432_v63 = vld [vmem:[%s12704_s1 + $0xf8] sm:$0xff] }
 0x1d0   : > { %v1908_v32 = vpop.f32.mrf.mxu0  ;;  %3564 = vperm.xlu1 %9613, %v3426_v24   ;;  %3589 = vperm.xlu0 %9612, %v3431_v18   ;;  %v2672_v18 = vshrl.u32 %v10510_v20, 16 }
 0x1d1   : > { %v1576_v30 = vadd.f32 %v1513_v47, %v1191_v35  ;;  %v2669_v13 = vor.u32 %v2668_v4, %v2665_v23  ;;  %v3429_v35 = vld [vmem:[%s12704_s1 + $0xe0] sm:$0xff]  ;;  %v3434_v47 = vld [vmem:[%s12704_s1 + $0x108] sm:$0xff] }
 0x1d2   : > { %v10487_v22 = vpop.f32.mrf.mxu1 }
 0x1d3   : > { %v1969_v45 = vadd.f32 %v1906_v56, %v1576_v30  ;;  %v2670_v23 = vsel %vm2653_vm5, %v2661_v49, %v2669_v13  ;;  %v2675_v30 = vshll.u32 %v10510_v20, 16  ;;  %v2674_v49 = vrot.slane %v2672_v18, 2 }
 0x1d5   : > { %v10491_v17 = vadd.f32 %v2166_v41, %v1969_v45  ;;  %v3415_v41 = vld [vmem:[%s12704_s1 + $0x70] sm:$0xff]  ;;  %v2677_v10 = vrot.slane %v2675_v30, 3 }
 0x1d6   : > { %v1130_v28 = vpop.f32.mrf.mxu2  ;;  %3509 = vperm.xlu2 %9614, %v3415_v41  }
 0x1d7   : > { %v1192_v56 = vadd.f32 %v1130_v28, %v9983_v27  ;;  %v1515_v0 = vpop.f32.mrf.mxu3 }
 0x1d8   : > { %v1911_v34 = vpop.f32.mrf.mxu0  ;;  %3579 = vperm.xlu1 %9613, %v3429_v35   ;;  %3604 = vperm.xlu0 %9612, %v3434_v47  }
 0x1d9   : > { %v1577_v27 = vadd.f32 %v1515_v0, %v1192_v56  ;;  %v3050_v0 = vrot.slane %v10510_v20, 3 }
 0x1da   : > { %v2171_v61 = vpop.f32.mrf.mxu1 }
 0x1db   : > { %2505 = vmatmul.bf16.vlgmr.msra.gmra.mxu2 %v2396_v60  ;;  %3158 = vmatmul.bf16.vlgmr.msra.gmra.mxu0 %v3049_v14  ;;  %v10512_v24 = vadd.f32 %v1908_v32, %v1577_v27  ;;  %v2678_v14 = vor.u32 %v2677_v10, %v2674_v49  ;;  %v3051_v18 = vsel %vm3046_vm4, %v3048_v9, %v3050_v0 }
 0x1dc   : > { %2898 = vmatmul.bf16.vlgmr.msra.gmra.mxu3 %v2670_v23 }
 0x1dd   : > { %v2679_v30 = vsel %vm2653_vm5, %v2669_v13, %v2678_v14  ;;  %v3424_v13 = vld [vmem:[%s12704_s1 + $0xb8] sm:$0xff] }
 0x1de   : > { %v1133_v12 = vpop.f32.mrf.mxu2  ;;  %3524 = vperm.xlu2 %9614, %v3418_v37  }
 0x1df   : > { %v1193_v1 = vadd.f32 %v1133_v12, %v9996_v42  ;;  %v1518_v4 = vpop.f32.mrf.mxu3  ;;  %v2397_v42 = vrot.slane %v10510_v20, 2  ;;  %v3435_v20 = vld [vmem:[%s12704_s1 + $0x110] sm:$0xff] }
 0x1e0   : > { %v1913_v45 = vpop.f32.mrf.mxu0  ;;  %3594 = vperm.xlu1 %9613, %v3432_v63  }
 0x1e1   : > { %v1578_v32 = vadd.f32 %v1518_v4, %v1193_v1  ;;  %v2398_v23 = vsel %vm2008_vm3, %v2395_v58, %v2397_v42  ;;  %v10540_v1 = vld [vmem:[%s9744_s26 + $0x28] sm:$0xff] }
 0x1e2   : > { %v10523_v28 = vpop.f32.mrf.mxu1  ;;  %v2681_v58 = vshrl.u32 %v10540_v1, 16  ;;  %v2684_v9 = vshll.u32 %v10540_v1, 16 }
 0x1e3   : > { %v1971_v56 = vadd.f32 %v1911_v34, %v1578_v32  ;;  %v3421_v34 = vld [vmem:[%s12704_s1 + $0xa0] sm:$0xff] }
 0x1e4   : > { %v2683_v10 = vrot.slane %v2681_v58, 2 }
 0x1e5   : > { %v10527_v60 = vadd.f32 %v2171_v61, %v1971_v56  ;;  %v2686_v56 = vrot.slane %v2684_v9, 3 }
 0x1e6   : > { %v1135_v41 = vpop.f32.mrf.mxu2  ;;  %3539 = vperm.xlu2 %9614, %v3421_v34  }
 0x1e7   : > { %v1194_v35 = vadd.f32 %v1135_v41, %v10009_v59  ;;  %v1520_v47 = vpop.f32.mrf.mxu3 }
 0x1e8   : > { %v1916_v27 = vpop.f32.mrf.mxu0  ;;  %3609 = vperm.xlu1 %9613, %v3435_v20  }
 0x1e9   : > { %v1579_v61 = vadd.f32 %v1520_v47, %v1194_v35  ;;  %v2399_v35 = vrot.slane %v10540_v1, 2  ;;  %v3052_v47 = vrot.slane %v10540_v1, 3 }
 0x1ea   : > { %v2176_v12 = vpop.f32.mrf.mxu1 }
 0x1eb   : > { %2510 = vmatmul.bf16.gmra.mxu2 %v2398_v23  ;;  %3163 = vmatmul.bf16.gmra.mxu0 %v3051_v18  ;;  %v10542_v59 = vadd.f32 %v1913_v45, %v1579_v61  ;;  %v3053_v58 = vsel %vm3046_vm4, %v3050_v0, %v3052_v47 }
 0x1ec   : > { %2903 = vmatmul.bf16.gmra.mxu3 %v2679_v30  ;;  %v2400_v30 = vsel %vm2008_vm3, %v2397_v42, %v2399_v35 }
 0x1ee   : > { %v1138_v4 = vpop.f32.mrf.mxu2  ;;  %3554 = vperm.xlu2 %9614, %v3424_v13  }
 0x1ef   : > { %v1195_v37 = vadd.f32 %v1138_v4, %v10025_v11  ;;  %v1523_v63 = vpop.f32.mrf.mxu3  ;;  %v2687_v11 = vor.u32 %v2686_v56, %v2683_v10  ;;  %v3430_v10 = vld [vmem:[%s12704_s1 + $0xe8] sm:$0xff] }
 0x1f0   : > { %v1918_v32 = vpop.f32.mrf.mxu0 }
 0x1f1   : > { %v1580_v49 = vadd.f32 %v1523_v63, %v1195_v37  ;;  %v2688_v4 = vsel %vm2653_vm5, %v2678_v14, %v2687_v11 }
 0x1f2   : > { %v10550_v41 = vpop.f32.mrf.mxu1 }
 0x1f3   : > { %v1973_v45 = vadd.f32 %v1916_v27, %v1580_v49  ;;  %v3427_v27 = vld [vmem:[%s12704_s1 + $0xd0] sm:$0xff] }
 0x1f5   : > { %v10554_v23 = vadd.f32 %v2176_v12, %v1973_v45  ;;  %v10564_v12 = vld [vmem:[%s9744_s26 + $0x30] sm:$0xff] }
 0x1f6   : > { %v1140_v18 = vpop.f32.mrf.mxu2  ;;  %3569 = vperm.xlu2 %9614, %v3427_v27   ;;  %v2690_v0 = vshrl.u32 %v10564_v12, 16  ;;  %v2693_v37 = vshll.u32 %v10564_v12, 16 }
 0x1f7   : > { %v1196_v34 = vadd.f32 %v1140_v18, %v10032_v26  ;;  %v1525_v20 = vpop.f32.mrf.mxu3  ;;  %v8959_v26 = vld [vmem:[%s12708_s5 + $0x50] sm:$0xff] }
 0x1f8   : > { %v1921_v61 = vpop.f32.mrf.mxu0  ;;  %4004 = vmatpush.bf16.msra.mxu1 %v8959_v26  ;;  %v2692_v45 = vrot.slane %v2690_v0, 2  ;;  %v2695_v18 = vrot.slane %v2693_v37, 3 }
 0x1f9   : > { %v1581_v9 = vadd.f32 %v1525_v20, %v1196_v34  ;;  %v2401_v20 = vrot.slane %v10564_v12, 2 }
 0x1fa   : > { %v2181_v1 = vpop.f32.mrf.mxu1 }
 0x1fb   : > { %2515 = vmatmul.bf16.gmra.mxu2 %v2400_v30  ;;  %3168 = vmatmul.bf16.gmra.mxu0 %v3053_v58  ;;  %v10569_v42 = vadd.f32 %v1918_v32, %v1581_v9  ;;  %v3054_v30 = vrot.slane %v10564_v12, 3  ;;  %v2402_v0 = vsel %vm2008_vm3, %v2399_v35, %v2401_v20 }
 0x1fc   : > { %2908 = vmatmul.bf16.gmra.mxu3 %v2688_v4 }
 0x1fd   : > { %v3055_v37 = vsel %vm3046_vm4, %v3052_v47, %v3054_v30 }
 0x1fe   : > { %v1143_v63 = vpop.f32.mrf.mxu2  ;;  %3584 = vperm.xlu2 %9614, %v3430_v10  }
 0x1ff   : > { %v1197_v14 = vadd.f32 %v1143_v63, %v10045_v43  ;;  %v1528_v13 = vpop.f32.mrf.mxu3  ;;  %v2696_v43 = vor.u32 %v2695_v18, %v2692_v45  ;;  %v3436_v18 = vld [vmem:[%s12704_s1 + $0x118] sm:$0xff] }
 0x200   : > { %v1923_v49 = vpop.f32.mrf.mxu0 }
 0x201   : > { %v1582_v56 = vadd.f32 %v1528_v13, %v1197_v14  ;;  %v2697_v14 = vsel %vm2653_vm5, %v2687_v11, %v2696_v43 }
 0x202   : > { %v10577_v32 = vpop.f32.mrf.mxu1 }
 0x203   : > { %12799 = vst [vmem:[#allocation6_spill] sm:$0xff] %v10577_v32  ;;  %v1975_v34 = vadd.f32 %v1921_v61, %v1582_v56  ;;  %v3433_v61 = vld [vmem:[%s12704_s1 + $0x100] sm:$0xff] }
 0x205   : > { %v10581_v58 = vadd.f32 %v2181_v1, %v1975_v34  ;;  %v8895_v1 = vld [vmem:[%s9744_s26 + $0x38] sm:$0xff] }
 0x206   : > { %v1145_v27 = vpop.f32.mrf.mxu2  ;;  %3599 = vperm.xlu2 %9614, %v3433_v61   ;;  %v2702_v10 = vshll.u32 %v8895_v1, 16 }
 0x207   : > { %v1198_v9 = vadd.f32 %v1145_v27, %v10058_v62  ;;  %v1530_v4 = vpop.f32.mrf.mxu3  ;;  %v2699_v62 = vshrl.u32 %v8895_v1, 16 }
 0x208   : > { %v1926_v26 = vpop.f32.mrf.mxu0  ;;  %v2704_v27 = vrot.slane %v2702_v10, 3 }
 0x209   : > { %v1583_v63 = vadd.f32 %v1530_v4, %v1198_v9  ;;  %v2701_v34 = vrot.slane %v2699_v62, 2  ;;  %v2403_v4 = vrot.slane %v8895_v1, 2 }
 0x20a   : > { %v2186_v12 = vpop.f32.mrf.mxu1 }
 0x20b   : > { %2520 = vmatmul.bf16.gmra.mxu2 %v2402_v0  ;;  %3173 = vmatmul.bf16.gmra.mxu0 %v3055_v37  ;;  %v10591_v13 = vadd.f32 %v1923_v49, %v1583_v63  ;;  %v3056_v0 = vrot.slane %v8895_v1, 3  ;;  %v2705_v61 = vor.u32 %v2704_v27, %v2701_v34  ;;  %v2404_v32 = vsel %vm2008_vm3, %v2401_v20, %v2403_v4 }
 0x20c   : > { %2913 = vmatmul.bf16.gmra.mxu3 %v2697_v14 }
 0x20d   : > { %v3057_v62 = vsel %vm3046_vm4, %v3054_v30, %v3056_v0 }
 0x20e   : > { %v1148_v35 = vpop.f32.mrf.mxu2  ;;  %3614 = vperm.xlu2 %9614, %v3436_v18   ;;  %v8896_v18 = vld [vmem:[%s9744_s26 + $0x40] sm:$0xff] }
 0x20f   : > { %v1199_v47 = vadd.f32 %v1148_v35, %v10074_v16  ;;  %v1533_v56 = vpop.f32.mrf.mxu3  ;;  %v2711_v1 = vshll.u32 %v8896_v18, 16 }
 0x210   : > { %v1928_v45 = vpop.f32.mrf.mxu0 }
 0x211   : > { %v1584_v11 = vadd.f32 %v1533_v56, %v1199_v47  ;;  %v2706_v47 = vsel %vm2653_vm5, %v2696_v43, %v2705_v61 }
 0x212   : > { %v10597_v9 = vpop.f32.mrf.mxu1 }
 0x213   : > { %12800 = vst [vmem:[#allocation7_spill] sm:$0xff] %v10597_v9  ;;  %v1977_v49 = vadd.f32 %v1926_v26, %v1584_v11 }
 0x215   : > { %v10599_v37 = vadd.f32 %v2186_v12, %v1977_v49  ;;  %v2708_v12 = vshrl.u32 %v8896_v18, 16 }
 0x216   : > { %v1150_v16 = vpop.f32.mrf.mxu2 }
 0x217   : > { %v1200_v63 = vadd.f32 %v1150_v16, %v10081_v33  ;;  %v1535_v14 = vpop.f32.mrf.mxu3  ;;  %v8958_v33 = vld [vmem:[%s12708_s5 + $0x48] sm:$0xff]  ;;  %v2710_v27 = vrot.slane %v2708_v12, 2  ;;  %v2405_v16 = vrot.slane %v8896_v18, 2 }
 0x218   : > { %v1931_v35 = vpop.f32.mrf.mxu0  ;;  %4005 = vmatpush.bf16.msra.mxu1 %v8958_v33 }
 0x219   : > { %v1585_v10 = vadd.f32 %v1535_v14, %v1200_v63  ;;  %v3058_v63 = vrot.slane %v8896_v18, 3  ;;  %v2406_v33 = vsel %vm2008_vm3, %v2403_v4, %v2405_v16 }
 0x21a   : > { %v2191_v56 = vpop.f32.mrf.mxu1 }
 0x21b   : > { %2525 = vmatmul.bf16.gmra.mxu2 %v2404_v32  ;;  %3178 = vmatmul.bf16.gmra.mxu0 %v3057_v62  ;;  %v10606_v26 = vadd.f32 %v1928_v45, %v1585_v10  ;;  %v2713_v32 = vrot.slane %v2711_v1, 3 }
 0x21c   : > { %2918 = vmatmul.bf16.gmra.mxu3 %v2706_v47 }
 0x21d   : > { %v2714_v62 = vor.u32 %v2713_v32, %v2710_v27 }
 0x21e   : > { %v1153_v11 = vpop.f32.mrf.mxu2 }
 0x21f   : > { %v1201_v20 = vadd.f32 %v1153_v11, %v10094_v52  ;;  %v1538_v30 = vpop.f32.mrf.mxu3  ;;  %v3059_v11 = vsel %vm3046_vm4, %v3056_v0, %v3058_v63  ;;  %v2715_v1 = vsel %vm2653_vm5, %v2705_v61, %v2714_v62 }
 0x220   : > { %v1933_v34 = vpop.f32.mrf.mxu0 }
 0x221   : > { %v1586_v43 = vadd.f32 %v1538_v30, %v1201_v20  ;;  %v8897_v20 = vld [vmem:[%s9744_s26 + $0x48] sm:$0xff] }
 0x222   : > { %v10612_v49 = vpop.f32.mrf.mxu1  ;;  %v2720_v18 = vshll.u32 %v8897_v20, 16  ;;  %v2407_v61 = vrot.slane %v8897_v20, 2 }
 0x223   : > { %12801 = vst [vmem:[#allocation8_spill] sm:$0xff] %v10612_v49  ;;  %v1979_v45 = vadd.f32 %v1931_v35, %v1586_v43 }
 0x225   : > { %v10614_v14 = vadd.f32 %v2191_v56, %v1979_v45  ;;  %v2717_v56 = vshrl.u32 %v8897_v20, 16 }
 0x226   : > { %v1155_v10 = vpop.f32.mrf.mxu2 }
 0x227   : > { %v1202_v47 = vadd.f32 %v1155_v10, %v10101_v3  ;;  %v1540_v9 = vpop.f32.mrf.mxu3  ;;  %v2719_v45 = vrot.slane %v2717_v56, 2  ;;  %v3060_v10 = vrot.slane %v8897_v20, 3 }
 0x228   : > { %v1936_v52 = vpop.f32.mrf.mxu0 }
 0x229   : > { %v1587_v12 = vadd.f32 %v1540_v9, %v1202_v47  ;;  %v2722_v9 = vrot.slane %v2720_v18, 3 }
 0x22a   : > { %v2196_v30 = vpop.f32.mrf.mxu1 }
 0x22b   : > { %2530 = vmatmul.bf16.gmra.mxu2 %v2406_v33  ;;  %3183 = vmatmul.bf16.gmra.mxu0 %v3059_v11  ;;  %v10621_v35 = vadd.f32 %v1933_v34, %v1587_v12  ;;  %v2723_v34 = vor.u32 %v2722_v9, %v2719_v45 }
 0x22c   : > { %2923 = vmatmul.bf16.gmra.mxu3 %v2715_v1 }
 0x22d   : > { %12802 = vst [vmem:[#allocation9_spill] sm:$0xff] %v10621_v35  ;;  %v2724_v18 = vsel %vm2653_vm5, %v2714_v62, %v2723_v34 }
 0x22e   : > { %v1158_v43 = vpop.f32.mrf.mxu2 }
 0x22f   : > { %v1203_v3 = vadd.f32 %v1158_v43, %v10120_v55  ;;  %v1543_v27 = vpop.f32.mrf.mxu3  ;;  %v2408_v55 = vsel %vm2008_vm3, %v2405_v16, %v2407_v61  ;;  %v3061_v43 = vsel %vm3046_vm4, %v3058_v63, %v3060_v10 }
 0x230   : > { %v1938_v32 = vpop.f32.mrf.mxu0 }
 0x231   : > { %v1588_v4 = vadd.f32 %v1543_v27, %v1203_v3 }
 0x232   : > { %v10624_v47 = vpop.f32.mrf.mxu1 }
 0x233   : > { %v1981_v0 = vadd.f32 %v1936_v52, %v1588_v4  ;;  %12803 = vst [vmem:[#allocation10_spill] sm:$0xff] %v10624_v47  ;;  %v8898_v52 = vld [vmem:[%s9744_s26 + $0x50] sm:$0xff] }
 0x234   : > { %v2729_v3 = vshll.u32 %v8898_v52, 16  ;;  %v2409_v62 = vrot.slane %v8898_v52, 2 }
 0x235   : > { %v10626_v33 = vadd.f32 %v2196_v30, %v1981_v0  ;;  %v2726_v30 = vshrl.u32 %v8898_v52, 16 }
 0x236   : > { %v1160_v11 = vpop.f32.mrf.mxu2  ;;  %v2731_v63 = vrot.slane %v2729_v3, 3  ;;  %v2410_v47 = vsel %vm2008_vm3, %v2407_v61, %v2409_v62 }
 0x237   : > { %12804 = vst [vmem:[#allocation11_spill] sm:$0xff] %v10626_v33  ;;  %v1204_v12 = vadd.f32 %v1160_v11, %v10130_v54  ;;  %v1545_v1 = vpop.f32.mrf.mxu3  ;;  %v2728_v0 = vrot.slane %v2726_v30, 2 }
 0x238   : > { %v1941_v49 = vpop.f32.mrf.mxu0 }
 0x239   : > { %v1589_v56 = vadd.f32 %v1545_v1, %v1204_v12  ;;  %v3062_v12 = vrot.slane %v8898_v52, 3 }
 0x23a   : > { %v2201_v4 = vpop.f32.mrf.mxu1 }
 0x23b   : > { %2535 = vmatmul.bf16.gmra.mxu2 %v2408_v55  ;;  %3188 = vmatmul.bf16.gmra.mxu0 %v3061_v43  ;;  %v10633_v20 = vadd.f32 %v1938_v32, %v1589_v56  ;;  %v2732_v32 = vor.u32 %v2731_v63, %v2728_v0 }
 0x23c   : > { %2928 = vmatmul.bf16.gmra.mxu3 %v2724_v18 }
 0x23d   : > { %12805 = vst [vmem:[#allocation12_spill] sm:$0xff] %v10633_v20  ;;  %v2733_v3 = vsel %vm2653_vm5, %v2723_v34, %v2732_v32 }
 0x23e   : > { %v1163_v27 = vpop.f32.mrf.mxu2 }
 0x23f   : > { %v1205_v54 = vadd.f32 %v1163_v27, %v10143_v39  ;;  %v1548_v45 = vpop.f32.mrf.mxu3  ;;  %v3063_v39 = vsel %vm3046_vm4, %v3060_v10, %v3062_v12 }
 0x240   : > { %v1943_v9 = vpop.f32.mrf.mxu0 }
 0x241   : > { %v1590_v16 = vadd.f32 %v1548_v45, %v1205_v54 }
 0x242   : > { %v10641_v27 = vpop.f32.mrf.mxu1 }
 0x243   : > { %v1983_v11 = vadd.f32 %v1941_v49, %v1590_v16  ;;  %12807 = vst [vmem:[#allocation14_spill] sm:$0xff] %v10641_v27  ;;  %v8899_v49 = vld [vmem:[%s9744_s26 + $0x58] sm:$0xff] }
 0x244   : > { %v2738_v54 = vshll.u32 %v8899_v49, 16 }
 0x245   : > { %v10636_v1 = vadd.f32 %v2201_v4, %v1983_v11  ;;  %v2735_v4 = vshrl.u32 %v8899_v49, 16  ;;  %v2411_v11 = vrot.slane %v8899_v49, 2 }
 0x246   : > { %v1165_v55 = vpop.f32.mrf.mxu2 }
 0x247   : > { %12806 = vst [vmem:[#allocation13_spill] sm:$0xff] %v10636_v1  ;;  %v1206_v43 = vadd.f32 %v1165_v55, %v10150_v29  ;;  %v1550_v56 = vpop.f32.mrf.mxu3  ;;  %v8957_v29 = vld [vmem:[%s12708_s5 + $0x40] sm:$0xff]  ;;  %v2737_v34 = vrot.slane %v2735_v4, 2  ;;  %v3064_v55 = vrot.slane %v8899_v49, 3 }
 0x248   : > { %v1946_v18 = vpop.f32.mrf.mxu0  ;;  %4006 = vmatpush.bf16.msra.mxu1 %v8957_v29 }
 0x249   : > { %v1591_v30 = vadd.f32 %v1550_v56, %v1206_v43 }
 0x24a   : > { %v2206_v63 = vpop.f32.mrf.mxu1 }
 0x24b   : > { %2540 = vmatmul.bf16.gmra.mxu2 %v2410_v47  ;;  %3193 = vmatmul.bf16.gmra.mxu0 %v3063_v39  ;;  %v10645_v52 = vadd.f32 %v1943_v9, %v1591_v30  ;;  %v2740_v47 = vrot.slane %v2738_v54, 3  ;;  %v10658_v54 = vld [vmem:[%s9744_s26 + $0x60] sm:$0xff] }
 0x24c   : > { %2933 = vmatmul.bf16.gmra.mxu3 %v2733_v3  ;;  %v2744_v49 = vshrl.u32 %v10658_v54, 16 }
 0x24d   : > { %12808 = vst [vmem:[#allocation15_spill] sm:$0xff] %v10645_v52  ;;  %v2741_v56 = vor.u32 %v2740_v47, %v2737_v34 }
 0x24e   : > { %v1168_v61 = vpop.f32.mrf.mxu2  ;;  %v2746_v47 = vrot.slane %v2744_v49, 2  ;;  %v3440_v49 = vpop.permute.xlu0 %3439 }
 0x24f   : > { %v1207_v10 = vadd.f32 %v1168_v61, %v10169_v5  ;;  %v1553_v45 = vpop.f32.mrf.mxu3  ;;  %v2412_v5 = vsel %vm2008_vm3, %v2409_v62, %v2411_v11  ;;  %v3065_v61 = vsel %vm3046_vm4, %v3062_v12, %v3064_v55  ;;  %v2742_v4 = vsel %vm2653_vm5, %v2732_v32, %v2741_v56 }
 0x250   : > { %v1948_v16 = vpop.f32.mrf.mxu0 }
 0x251   : > { %v1592_v0 = vadd.f32 %v1553_v45, %v1207_v10 }
 0x253   : > { %v1985_v9 = vadd.f32 %v1946_v18, %v1592_v0 }
 0x255   : > { %v10651_v43 = vadd.f32 %v2206_v63, %v1985_v9  ;;  %v10668_v9 = vld [vmem:[%s12706_s3] ss:$0 sm:$0xff] }
 0x256   : > { %v1170_v39 = vpop.f32.mrf.mxu2  ;;  %v3445_v27 = vpop.permute.xlu0 %3444 }
 0x257   : > { %12809 = vst [vmem:[#allocation16_spill] sm:$0xff] %v10651_v43  ;;  %v1208_v30 = vadd.f32 %v1170_v39, %v10179_v38  ;;  %v1555_v3 = vpop.f32.mrf.mxu3  ;;  %v2747_v38 = vshll.u32 %v10658_v54, 16  ;;  %v12714_v39 = vrot.slane %v10658_v54, 3 }
 0x258   : > { %v3159_v29 = vpop.f32.mrf.mxu0 }
 0x259   : > { %v1593_v10 = vadd.f32 %v1555_v3, %v1208_v30  ;;  %v2749_v63 = vrot.slane %v2747_v38, 3 }
 0x25b   : > { %2545 = vmatmul.bf16.gmra.mxu2 %v2412_v5  ;;  %3198 = vmatmul.bf16.gmra.mxu0 %v3065_v61  ;;  %v10660_v18 = vadd.f32 %v1948_v16, %v1593_v10  ;;  %v12715_v16 = vrot.slane %v10658_v54, 2  ;;  %v10672_v30 = vor.u32 %v2749_v63, %v2746_v47  ;;  %v10678_v5 = vld [vmem:[%s12707_s4] ss:$0 sm:$0xff]  ;;  %v8956_v10 = vld [vmem:[%s12708_s5 + $0x38] sm:$0xff] }
 0x25c   : > { %2938 = vmatmul.bf16.gmra.mxu3 %v2742_v4  ;;  %v8972_v4 = vld [vmem:[%s12708_s5 + $0xb8] sm:$0xff]  ;;  %4337 = vmatpush.bf16.msrb.mxu2 %v8956_v10 }
 0x25d   : > { %12810 = vst [vmem:[#allocation17_spill] sm:$0xff] %v10660_v18  ;;  %4609 = vmatpush.bf16.msrb.mxu3 %v8972_v4 }
 0x25e   : > { %v2506_v45 = vpop.f32.mrf.mxu2 }
 0x25f   : > { %v2596_v0 = vadd.f32 %v2506_v45, %v10192_v36  ;;  %v2899_v62 = vpop.f32.mrf.mxu3  ;;  %v2414_v45 = vsel %vm2008_vm3, %v2411_v11, %v12715_v16  ;;  %v8980_v11 = vld [vmem:[%s12708_s5 + $0xf8] sm:$0xff] }
 0x260   : > { %v3161_v34 = vpop.f32.mrf.mxu0  ;;  %5127 = vmatpush.bf16.msrb.mxu0 %v8980_v11 }
 0x261   : > { %v2989_v12 = vadd.f32 %v2899_v62, %v2596_v0  ;;  %v3067_v0 = vsel %vm3046_vm4, %v3064_v55, %v12714_v39  ;;  %v2751_v62 = vsel %vm2653_vm5, %v2741_v56, %v10672_v30  ;;  %v8988_v55 = vld [vmem:[%s12708_s5 + $0x138] sm:$0xff] }
 0x262   : > { %5363 = vmatpush.bf16.msrb.mxu1 %v8988_v55 }
 0x263   : > { %v3249_v32 = vadd.f32 %v3159_v29, %v2989_v12  ;;  %v10696_v12 = vld [vmem:[%s9744_s26 + $0x68] sm:$0xff] }
 0x265   : > { %v3289_v36 = vmul.f32 %v10668_v9, %v3249_v32  ;;  %v2753_v32 = vshrl.u32 %v10696_v12, 16 }
 0x266   : > { %v2508_v3 = vpop.f32.mrf.mxu2 }
 0x267   : > { %v2597_v29 = vadd.f32 %v2508_v3, %v10209_v53  ;;  %v2901_v61 = vpop.f32.mrf.mxu3  ;;  %v3329_v47 = vadd.f32 %v10678_v5, %v3289_v36  ;;  %v2756_v3 = vshll.u32 %v10696_v12, 16  ;;  %v3733_v36 = vld [vmem:[#allocation2 + $0x8] sm:$0xf]  ;;  %v2755_v18 = vrot.slane %v2753_v32, 2 }
 0x268   : > { %v3164_v38 = vpop.f32.mrf.mxu0 }
 0x269   : > { %v2990_v53 = vadd.f32 %v2901_v61, %v2597_v29  ;;  %v3365_v61 = vmax.f32 %v3329_v47, 0.0  ;;  %v2758_v43 = vrot.slane %v2756_v3, 3  ;;  %v12717_v47 = vrot.slane %v10696_v12, 2 }
 0x26b   : > { %v3250_v63 = vadd.f32 %v3161_v34, %v2990_v53  ;;  %2550 = vmatmul.bf16.gmra.mxu2 %v2414_v45  ;;  %3203 = vmatmul.bf16.gmra.mxu0 %v3067_v0  ;;  %v3732_v34 = vld [vmem:[#allocation2 + $0x4] sm:$0xc]  ;;  %v3617_v52 = vmul.f32 %v3440_v49, %v3365_v61  ;;  %v3450_v49 = vpop.permute.xlu1 %3449  ;;  %v10730_v61 = vld [vmem:[%s9744_s26 + $0x70] sm:$0xff] }
 0x26c   : > { %2943 = vmatmul.bf16.gmra.mxu3 %v2751_v62  ;;  %v3785_v0 = vld [vmem:[#allocation2 + $0x4] sm:$0x8]  ;;  %v3841_v62 = vunpack.c.l.b16 %v3733_v36  ;;  %v4099_v39 = vunpack.c.l.b16 %v3732_v34 }
 0x26d   : > { %v3290_v56 = vmul.f32 %v10668_v9, %v3250_v63  ;;  %v3840_v11 = vunpack.c.l.b16 %v3785_v0 }
 0x26e   : > { %v2511_v29 = vpop.f32.mrf.mxu2  ;;  %v4100_v20 = vpack.c.b16 %v3841_v62, %v4099_v39 }
 0x26f   : > { %v3330_v10 = vadd.f32 %v10678_v5, %v3290_v56  ;;  %v2598_v4 = vadd.f32 %v2511_v29, %v10219_v46  ;;  %v2904_v45 = vpop.f32.mrf.mxu3  ;;  %v12716_v56 = vrot.slane %v10696_v12, 3  ;;  %v10712_v29 = vor.u32 %v2758_v43, %v2755_v18 }
 0x270   : > { %v3166_v53 = vpop.f32.mrf.mxu0  ;;  %v3877_v34 = vpack.c.b16 %v3841_v62, %v3840_v11  ;;  %v4102_v18 = vshrl.u32 %v4100_v20, 16 }
 0x271   : > { %v3366_v63 = vmax.f32 %v3330_v10, 0.0  ;;  %v2991_v16 = vadd.f32 %v2904_v45, %v2598_v4 }
 0x272   : > { %v4459_v4 = vshrl.u32 %v3877_v34, 16  ;;  %v4462_v62 = vshll.u32 %v3877_v34, 16 }
 0x273   : > { %v3618_v55 = vmul.f32 %v3445_v27, %v3366_v63  ;;  %v3251_v1 = vadd.f32 %v3164_v38, %v2991_v16  ;;  %v12811_v16 = vrot.slane %v10658_v54, 2  ;;  %v4105_v38 = vshll.u32 %v4100_v20, 16 }
 0x274   : > { %v2762_v20 = vshrl.u32 %v10730_v61, 16 }
 0x275   : > { %v9063_v46 = vpack.c.bf16 %v3618_v55, %v3617_v52  ;;  %v3291_v32 = vmul.f32 %v10668_v9, %v3251_v1  ;;  %v2416_v39 = vsel %vm2008_vm3, %v12811_v16, %v12717_v47  ;;  %v12812_v52 = vrot.slane %v10658_v54, 3 }
 0x276   : > { %v2513_v36 = vpop.f32.mrf.mxu2  ;;  %v4104_v54 = vrot.slane %v4102_v18, 2  ;;  %v4107_v63 = vrot.slane %v4105_v38, 3  ;;  %v2765_v55 = vshll.u32 %v10730_v61, 16 }
 0x277   : > { %9387 = vst [vmem:[#allocation2 + $0x10] sm:$0xff] %v9063_v46   ;;  %v2599_v3 = vadd.f32 %v2513_v36, %v10236_v19  ;;  %v2906_v10 = vpop.f32.mrf.mxu3  ;;  %v3069_v43 = vsel %vm3046_vm4, %v12812_v52, %v12716_v56  ;;  %v2760_v19 = vsel %vm2653_vm5, %v10672_v30, %v10712_v29  ;;  %v3331_v45 = vadd.f32 %v10678_v5, %v3291_v32 }
 0x278   : > { %v3169_v27 = vpop.f32.mrf.mxu0  ;;  %v3896_v36 = vrot.slane %v3877_v34, 3  ;;  %v4108_v18 = vor.u32 %v4107_v63, %v4104_v54  ;;  %v2764_v56 = vrot.slane %v2762_v20, 2  ;;  %v2767_v34 = vrot.slane %v2765_v55, 3 }
 0x279   : > { %v2992_v1 = vadd.f32 %v2906_v10, %v2599_v3  ;;  %v4461_v3 = vrot.slane %v4459_v4, 3  ;;  %v3367_v10 = vmax.f32 %v3331_v45, 0.0  ;;  %v3455_v4 = vpop.permute.xlu1 %3454  ;;  %v2417_v63 = vrot.slane %v10730_v61, 2 }
 0x27b   : > { %v3252_v0 = vadd.f32 %v3166_v53, %v2992_v1  ;;  %2555 = vmatmul.bf16.gmra.mxu2 %v2416_v39  ;;  %3208 = vmatmul.bf16.gmra.mxu0 %v3069_v43  ;;  %v4464_v39 = vrot.slane %v4462_v62, 4 }
 0x27c   : > { %2948 = vmatmul.bf16.gmra.mxu3 %v2760_v19 }
 0x27d   : > { %v3292_v11 = vmul.f32 %v10668_v9, %v3252_v0  ;;  %v4465_v20 = vor.u32 %v4464_v39, %v4461_v3 }
 0x27e   : > { %v2516_v46 = vpop.f32.mrf.mxu2  ;;  %v10736_v30 = vld [vmem:[#allocation2 + $0xc] sm:$0xff] }
 0x27f   : > { %v3332_v53 = vadd.f32 %v10678_v5, %v3292_v11  ;;  %v2600_v32 = vadd.f32 %v2516_v46, %v10240_v31  ;;  %v2909_v16 = vpop.f32.mrf.mxu3  ;;  %v3897_v43 = vrot.slane %v10736_v30, 3  ;;  %v4110_v38 = vshrl.u32 %v10736_v30, 16 }
 0x280   : > { %v3171_v52 = vpop.f32.mrf.mxu0  ;;  %v4113_v1 = vshll.u32 %v10736_v30, 16  ;;  %v3619_v46 = vmul.f32 %v3450_v49, %v3367_v10 }
 0x281   : > { %v3368_v19 = vmax.f32 %v3332_v53, 0.0  ;;  %v2993_v0 = vadd.f32 %v2909_v16, %v2600_v32  ;;  %v3898_v45 = vsel %vm3046_vm4, %v3896_v36, %v3897_v43  ;;  %v4112_v31 = vrot.slane %v4110_v38, 2 }
 0x282   : > { %v4115_v11 = vrot.slane %v4113_v1, 3  ;;  %v4466_v62 = vrot.slane %v4110_v38, 3  ;;  %4007 = vmatmul.bf16.vlgmr.msra.gmra.mxu1 %v3898_v45  ;;  %v4467_v54 = vrot.slane %v4113_v1, 4  ;;  %v3070_v53 = vrot.slane %v10730_v61, 3 }
 0x283   : > { %v3620_v47 = vmul.f32 %v3455_v4, %v3368_v19  ;;  %v3253_v33 = vadd.f32 %v3169_v27, %v2993_v0  ;;  %v10750_v16 = vor.u32 %v2767_v34, %v2764_v56  ;;  %v3460_v56 = vpop.permute.xlu2 %3459 }
 0x284   : > { %v10748_v32 = vor.u32 %v4115_v11, %v4112_v31  ;;  %v10757_v27 = vor.u32 %v4467_v54, %v4466_v62 }
 0x285   : > { %v9068_v55 = vpack.c.bf16 %v3620_v47, %v3619_v46  ;;  %v3293_v36 = vmul.f32 %v10668_v9, %v3253_v33  ;;  %v8955_v47 = vld [vmem:[%s12708_s5 + $0x30] sm:$0xff]  ;;  %v12813_v33 = vrot.slane %v10696_v12, 2  ;;  %v2769_v4 = vsel %vm2653_vm5, %v10712_v29, %v10750_v16 }
 0x286   : > { %v2518_v38 = vpop.f32.mrf.mxu2  ;;  %v10755_v49 = vsel %vm2653_vm5, %v4108_v18, %v10748_v32  ;;  %v12814_v18 = vrot.slane %v10696_v12, 3  ;;  %v10778_v0 = vsel %vm4457_vm6, %v4465_v20, %v10757_v27  ;;  %4338 = vmatpush.bf16.msrb.mxu2 %v8955_v47  ;;  %v8971_v12 = vld [vmem:[%s12708_s5 + $0xb0] sm:$0xff] }
 0x287   : > { %9388 = vst [vmem:[#allocation2 + $0x18] sm:$0xff] %v9068_v55   ;;  %v2601_v10 = vadd.f32 %v2518_v38, %v10257_v8  ;;  %v2911_v1 = vpop.f32.mrf.mxu3  ;;  %v2418_v39 = vsel %vm2008_vm3, %v12813_v33, %v2417_v63  ;;  %v10774_v8 = vld [vmem:[%s9744_s26 + $0x78] sm:$0xff]  ;;  %v3333_v45 = vadd.f32 %v10678_v5, %v3293_v36  ;;  %4610 = vmatpush.bf16.msrb.mxu3 %v8971_v12 }
 0x288   : > { %v3174_v3 = vpop.f32.mrf.mxu0  ;;  %v3071_v19 = vsel %vm3046_vm4, %v12814_v18, %v3070_v53  ;;  %v2771_v11 = vshrl.u32 %v10774_v8, 16  ;;  %v2774_v46 = vshll.u32 %v10774_v8, 16 }
 0x289   : > { %v2994_v34 = vadd.f32 %v2911_v1, %v2601_v10  ;;  %v3369_v54 = vmax.f32 %v3333_v45, 0.0 }
 0x28a   : > { %v2773_v1 = vrot.slane %v2771_v11, 2  ;;  %v2776_v18 = vrot.slane %v2774_v46, 3  ;;  %v3072_v46 = vrot.slane %v10774_v8, 3 }
 0x28b   : > { %v3254_v31 = vadd.f32 %v3171_v52, %v2994_v34  ;;  %2560 = vmatmul.bf16.gmra.mxu2 %v2418_v39  ;;  %3213 = vmatmul.bf16.gmra.mxu0 %v3071_v19  ;;  %v3465_v34 = vpop.permute.xlu2 %3464 }
 0x28c   : > { %2953 = vmatmul.bf16.gmra.mxu3 %v2769_v4  ;;  %v3621_v4 = vmul.f32 %v3460_v56, %v3369_v54  ;;  %v10804_v56 = vor.u32 %v2776_v18, %v2773_v1  ;;  %v8987_v1 = vld [vmem:[%s12708_s5 + $0x130] sm:$0xff] }
 0x28d   : > { %v3294_v62 = vmul.f32 %v10668_v9, %v3254_v31  ;;  %5364 = vmatpush.bf16.msrb.mxu1 %v8987_v1 }
 0x28e   : > { %v2521_v29 = vpop.f32.mrf.mxu2  ;;  %v10790_v20 = vld [vmem:[#allocation2 + $0x14] sm:$0xff] }
 0x28f   : > { %v3334_v52 = vadd.f32 %v10678_v5, %v3294_v62  ;;  %v2602_v55 = vadd.f32 %v2521_v29, %v10264_v15  ;;  %v2914_v36 = vpop.f32.mrf.mxu3  ;;  %v3899_v10 = vrot.slane %v10790_v20, 3  ;;  %v4119_v47 = vshrl.u32 %v10790_v20, 16 }
 0x290   : > { %v3176_v38 = vpop.f32.mrf.mxu0  ;;  %v4122_v19 = vshll.u32 %v10790_v20, 16  ;;  %v2419_v29 = vrot.slane %v10774_v8, 2 }
 0x291   : > { %v3370_v33 = vmax.f32 %v3334_v52, 0.0  ;;  %v2995_v39 = vadd.f32 %v2914_v36, %v2602_v55  ;;  %v3900_v15 = vsel %vm3046_vm4, %v3897_v43, %v3899_v10  ;;  %v4121_v45 = vrot.slane %v4119_v47, 2 }
 0x292   : > { %4012 = vmatmul.bf16.gmra.mxu1 %v3900_v15  ;;  %v4124_v11 = vrot.slane %v4122_v19, 3  ;;  %v4470_v62 = vrot.slane %v4119_v47, 3  ;;  %v4471_v52 = vrot.slane %v4122_v19, 4  ;;  %v2420_v18 = vsel %vm2008_vm3, %v2417_v63, %v2419_v29  ;;  %v10829_v19 = vld [vmem:[%s9744_s26 + $0x80] sm:$0xff] }
 0x293   : > { %v3622_v31 = vmul.f32 %v3465_v34, %v3370_v33  ;;  %v3255_v12 = vadd.f32 %v3174_v3, %v2995_v39  ;;  %v8979_v33 = vld [vmem:[%s12708_s5 + $0xf0] sm:$0xff]  ;;  %v2778_v63 = vsel %vm2653_vm5, %v10750_v16, %v10804_v56 }
 0x294   : > { %v10807_v36 = vor.u32 %v4124_v11, %v4121_v45  ;;  %v10809_v43 = vor.u32 %v4471_v52, %v4470_v62  ;;  %5128 = vmatpush.bf16.msrb.mxu0 %v8979_v33 }
 0x295   : > { %v9073_v55 = vpack.c.bf16 %v3622_v31, %v3621_v4  ;;  %v3295_v54 = vmul.f32 %v10668_v9, %v3255_v12 }
 0x296   : > { %v2523_v30 = vpop.f32.mrf.mxu2  ;;  %v10834_v34 = vsel %vm2653_vm5, %v10748_v32, %v10807_v36  ;;  %v10839_v4 = vsel %vm4457_vm6, %v10757_v27, %v10809_v43  ;;  %v2780_v32 = vshrl.u32 %v10829_v19, 16  ;;  %v2783_v27 = vshll.u32 %v10829_v19, 16 }
 0x297   : > { %9389 = vst [vmem:[#allocation2 + $0x20] sm:$0xff] %v9073_v55   ;;  %v2603_v3 = vadd.f32 %v2523_v30, %v10283_v21  ;;  %v2916_v47 = vpop.f32.mrf.mxu3  ;;  %v3073_v21 = vsel %vm3046_vm4, %v3070_v53, %v3072_v46  ;;  %v3335_v61 = vadd.f32 %v10678_v5, %v3295_v54 }
 0x298   : > { %v3179_v39 = vpop.f32.mrf.mxu0  ;;  %v2782_v54 = vrot.slane %v2780_v32, 2  ;;  %v2785_v1 = vrot.slane %v2783_v27, 3  ;;  %v12721_v27 = vrot.slane %v10829_v19, 2 }
 0x299   : > { %v2996_v15 = vadd.f32 %v2916_v47, %v2603_v3  ;;  %v3371_v31 = vmax.f32 %v3335_v61, 0.0  ;;  %v3470_v3 = vpop.permute.xlu0 %3469 }
 0x29b   : > { %v3256_v53 = vadd.f32 %v3176_v38, %v2996_v15  ;;  %2565 = vmatmul.bf16.gmra.mxu2 %v2420_v18  ;;  %3218 = vmatmul.bf16.gmra.mxu0 %v3073_v21  ;;  %v3475_v21 = vpop.permute.xlu1 %3474  ;;  %v3623_v15 = vmul.f32 %v3470_v3, %v3371_v31 }
 0x29c   : > { %2958 = vmatmul.bf16.gmra.mxu3 %v2778_v63 }
 0x29d   : > { %v3296_v45 = vmul.f32 %v10668_v9, %v3256_v53 }
 0x29e   : > { %v2526_v12 = vpop.f32.mrf.mxu2  ;;  %v10848_v11 = vld [vmem:[#allocation2 + $0x1c] sm:$0xff] }
 0x29f   : > { %v3336_v16 = vadd.f32 %v10678_v5, %v3296_v45  ;;  %v2604_v62 = vadd.f32 %v2526_v12, %v10293_v50  ;;  %v2919_v52 = vpop.f32.mrf.mxu3  ;;  %v3901_v38 = vrot.slane %v10848_v11, 3  ;;  %v4128_v30 = vshrl.u32 %v10848_v11, 16  ;;  %v10860_v12 = vld [vmem:[#allocation2 + $0x20] sm:$0xff] }
 0x2a0   : > { %v3181_v55 = vpop.f32.mrf.mxu0  ;;  %v4131_v18 = vshll.u32 %v10848_v11, 16  ;;  %12815 = vst [vmem:[#allocation18_spill] sm:$0xff] %v10860_v12 }
 0x2a1   : > { %v3372_v47 = vmax.f32 %v3336_v16, 0.0  ;;  %v2997_v33 = vadd.f32 %v2919_v52, %v2604_v62  ;;  %v3902_v50 = vsel %vm3046_vm4, %v3899_v10, %v3901_v38  ;;  %v4130_v63 = vrot.slane %v4128_v30, 2 }
 0x2a2   : > { %4017 = vmatmul.bf16.gmra.mxu1 %v3902_v50  ;;  %v4133_v32 = vrot.slane %v4131_v18, 3  ;;  %v4474_v45 = vrot.slane %v4128_v30, 3  ;;  %v12720_v16 = vrot.slane %v10829_v19, 3  ;;  %v4475_v31 = vrot.slane %v4131_v18, 4  ;;  %v10884_v18 = vld [vmem:[%s9744_s26 + $0x88] sm:$0xff] }
 0x2a3   : > { %v3624_v61 = vmul.f32 %v3475_v21, %v3372_v47  ;;  %v3257_v53 = vadd.f32 %v3179_v39, %v2997_v33  ;;  %v10864_v52 = vor.u32 %v2785_v1, %v2782_v54  ;;  %v12719_v33 = vshll.u32 %v10860_v12, 16 }
 0x2a4   : > { %v10867_v3 = vor.u32 %v4133_v32, %v4130_v63  ;;  %v10869_v39 = vor.u32 %v4475_v31, %v4474_v45  ;;  %v2422_v54 = vsel %vm2008_vm3, %v2419_v29, %v12721_v27  ;;  %v3075_v1 = vsel %vm3046_vm4, %v3072_v46, %v12720_v16  ;;  %v9424_v46 = vld [vmem:[#allocation2 + $0x18] sm:$0xf0]  ;;  %v9425_v63 = vld [vmem:[#allocation2 + $0x18] sm:$0xe] }
 0x2a5   : > { %v9078_v62 = vpack.c.bf16 %v3624_v61, %v3623_v15  ;;  %v3297_v20 = vmul.f32 %v10668_v9, %v3257_v53  ;;  %v2787_v29 = vsel %vm2653_vm5, %v10804_v56, %v10864_v52  ;;  %v12718_v61 = vshrl.u32 %v10860_v12, 16 }
 0x2a6   : > { %v2528_v10 = vpop.f32.mrf.mxu2  ;;  %v10894_v15 = vsel %vm4457_vm6, %v10809_v43, %v10869_v39  ;;  %v8970_v43 = vld [vmem:[%s12708_s5 + $0xa8] sm:$0xff]  ;;  %v6779_v56 = vrot.slane %v12719_v33, 2  ;;  %v2789_v32 = vshrl.u32 %v10884_v18, 16  ;;  %v2792_v45 = vshll.u32 %v10884_v18, 16 }
 0x2a7   : > { %9390 = vst [vmem:[#allocation2 + $0x28] sm:$0xff] %v9078_v62   ;;  %v2605_v30 = vadd.f32 %v2528_v10, %v10312_v2  ;;  %v2921_v47 = vpop.f32.mrf.mxu3  ;;  %v10889_v2 = vsel %vm2653_vm5, %v10807_v36, %v10867_v3  ;;  %v3337_v8 = vadd.f32 %v10678_v5, %v3297_v20  ;;  %v8954_v36 = vld [vmem:[%s12708_s5 + $0x28] sm:$0xff]  ;;  %4611 = vmatpush.bf16.msrb.mxu3 %v8970_v43  ;;  %v6778_v62 = vrot.slane %v12718_v61, 1  ;;  %v3480_v43 = vpop.permute.xlu2 %3479 }
 0x2a8   : > { %v3184_v21 = vpop.f32.mrf.mxu0  ;;  %4339 = vmatpush.bf16.msrb.mxu2 %v8954_v36  ;;  %v10912_v31 = vor.u32 %v9425_v63, %v9424_v46  ;;  %v2791_v36 = vrot.slane %v2789_v32, 2  ;;  %v2794_v46 = vrot.slane %v2792_v45, 3 }
 0x2a9   : > { %v2998_v50 = vadd.f32 %v2921_v47, %v2605_v30  ;;  %v3373_v20 = vmax.f32 %v3337_v8, 0.0 }
 0x2aa   : > { %12816 = vst [vmem:[#allocation19_spill] sm:$0xff] %v10912_v31  ;;  %v6771_v16 = vshrl.u32 %v10912_v31, 16  ;;  %v6774_v32 = vshll.u32 %v10912_v31, 16  ;;  %v10936_v35 = vor.u32 %v2794_v46, %v2791_v36  ;;  %v2283_v31 = vld [vmem:[%s9744_s26 + $0xa0] sm:$0x3] }
 0x2ab   : > { %v3258_v53 = vadd.f32 %v3181_v55, %v2998_v50  ;;  %2570 = vmatmul.bf16.gmra.mxu2 %v2422_v54  ;;  %3223 = vmatmul.bf16.gmra.mxu0 %v3075_v1  ;;  %v10920_v50 = vor.u32 %v6779_v56, %v6778_v62  ;;  %v3625_v27 = vmul.f32 %v3480_v43, %v3373_v20  ;;  %v12727_v20 = vrot.slane %v10884_v18, 3 }
 0x2ac   : > { %2963 = vmatmul.bf16.gmra.mxu3 %v2787_v29  ;;  %v6776_v46 = vrot.slane %v6774_v32, 2 }
 0x2ad   : > { %v3298_v55 = vmul.f32 %v10668_v9, %v3258_v53 }
 0x2ae   : > { %v2531_v10 = vpop.f32.mrf.mxu2  ;;  %v10916_v30 = vld [vmem:[#allocation2 + $0x24] sm:$0xff] }
 0x2af   : > { %v3338_v47 = vadd.f32 %v10678_v5, %v3298_v55  ;;  %v2606_v54 = vadd.f32 %v2531_v10, %v10325_v25  ;;  %v2924_v1 = vpop.f32.mrf.mxu3  ;;  %v12724_v53 = vrot.slane %v10916_v30, 3  ;;  %v4137_v63 = vshrl.u32 %v10916_v30, 16  ;;  %v3485_v55 = vpop.permute.xlu0 %3484 }
 0x2b0   : > { %v3186_v29 = vpop.f32.mrf.mxu0  ;;  %v4140_v33 = vshll.u32 %v10916_v30, 16 }
 0x2b1   : > { %v3374_v61 = vmax.f32 %v3338_v47, 0.0  ;;  %v2999_v8 = vadd.f32 %v2924_v1, %v2606_v54  ;;  %v3904_v25 = vsel %vm3046_vm4, %v3901_v38, %v12724_v53  ;;  %v4139_v56 = vrot.slane %v4137_v63, 2  ;;  %v10932_v54 = vld [vmem:[#allocation2 + $0x28] sm:$0xff] }
 0x2b2   : > { %4022 = vmatmul.bf16.gmra.mxu1 %v3904_v25  ;;  %v4142_v10 = vrot.slane %v4140_v33, 3  ;;  %v4478_v47 = vrot.slane %v4137_v63, 3  ;;  %12817 = vst [vmem:[#allocation20_spill] sm:$0xff] %v10932_v54  ;;  %v12728_v1 = vrot.slane %v10884_v18, 2  ;;  %v4479_v43 = vrot.slane %v4140_v33, 4  ;;  %v8978_v33 = vld [vmem:[%s12708_s5 + $0xe8] sm:$0xff] }
 0x2b3   : > { %v3626_v45 = vmul.f32 %v3485_v55, %v3374_v61  ;;  %v3259_v62 = vadd.f32 %v3184_v21, %v2999_v8  ;;  %v6773_v21 = vrot.slane %v6771_v16, 1  ;;  %v12726_v36 = vshll.u32 %v10932_v54, 16  ;;  %5129 = vmatpush.bf16.msrb.mxu0 %v8978_v33 }
 0x2b4   : > { %v10938_v38 = vor.u32 %v4142_v10, %v4139_v56  ;;  %v10940_v53 = vor.u32 %v4479_v43, %v4478_v47  ;;  %v10962_v56 = vld [vmem:[%s9744_s26 + $0x90] sm:$0xff]  ;;  %v2796_v10 = vsel %vm2653_vm5, %v10864_v52, %v10936_v35 }
 0x2b5   : > { %v9083_v12 = vpack.c.bf16 %v3626_v45, %v3625_v27  ;;  %v3299_v61 = vmul.f32 %v10668_v9, %v3259_v62  ;;  %v8986_v27 = vld [vmem:[%s12708_s5 + $0x128] sm:$0xff]  ;;  %v2801_v52 = vshll.u32 %v10962_v56, 16 }
 0x2b6   : > { %v2533_v11 = vpop.f32.mrf.mxu2  ;;  %v10967_v45 = vsel %vm2653_vm5, %v10867_v3, %v10938_v38  ;;  %v10972_v32 = vsel %vm4457_vm6, %v10869_v39, %v10940_v53  ;;  %5365 = vmatpush.bf16.msrb.mxu1 %v8986_v27  ;;  %v6777_v3 = vor.u32 %v6776_v46, %v6773_v21  ;;  %v2798_v39 = vshrl.u32 %v10962_v56, 16 }
 0x2b7   : > { %9391 = vst [vmem:[#allocation2 + $0x30] sm:$0xff] %v9083_v12   ;;  %v2607_v63 = vadd.f32 %v2533_v11, %v10351_v48  ;;  %v2926_v8 = vpop.f32.mrf.mxu3  ;;  %v12818_v12 = vrot.slane %v10829_v19, 2  ;;  %v12819_v48 = vrot.slane %v10829_v19, 3  ;;  %v12725_v19 = vshrl.u32 %v10932_v54, 16 }
 0x2b8   : > { %v3189_v55 = vpop.f32.mrf.mxu0  ;;  %v3339_v47 = vadd.f32 %v10678_v5, %v3299_v61  ;;  %v6783_v11 = vrot.slane %v12726_v36, 2 }
 0x2b9   : > { %v2424_v16 = vsel %vm2008_vm3, %v12818_v12, %v12728_v1  ;;  %v3077_v25 = vsel %vm3046_vm4, %v12819_v48, %v12727_v20  ;;  %v3000_v62 = vadd.f32 %v2926_v8, %v2607_v63  ;;  %v10986_v8 = vsel %vm1615_vm2, %v6777_v3, %v10920_v50  ;;  %v3490_v20 = vpop.permute.xlu1 %3489 }
 0x2ba   : > { %12820 = vst [vmem:[#allocation21_spill] sm:$0xff] %v10986_v8  ;;  %v3375_v21 = vmax.f32 %v3339_v47, 0.0  ;;  %v3495_v47 = vpop.permute.xlu2 %3494  ;;  %v2224_v8 = vadd.f32 %v10360_v51, %v10384_v44  ;;  %v8953_v51 = vld [vmem:[%s12708_s5 + $0x20] sm:$0xff] }
 0x2bb   : > { %v3260_v43 = vadd.f32 %v3186_v29, %v3000_v62  ;;  %2575 = vmatmul.bf16.gmra.mxu2 %v2424_v16  ;;  %3228 = vmatmul.bf16.gmra.mxu0 %v3077_v25  ;;  %v6782_v29 = vrot.slane %v12725_v19, 1  ;;  %v2800_v62 = vrot.slane %v2798_v39, 2  ;;  %v2803_v19 = vrot.slane %v2801_v52, 3  ;;  %v8969_v44 = vld [vmem:[%s12708_s5 + $0xa0] sm:$0xff] }
 0x2bc   : > { %2968 = vmatmul.bf16.gmra.mxu3 %v2796_v10  ;;  %v12733_v52 = vrot.slane %v10962_v56, 3  ;;  %4340 = vmatpush.bf16.msrb.mxu2 %v8953_v51 }
 0x2bd   : > { %v3300_v63 = vmul.f32 %v10668_v9, %v3260_v43  ;;  %v10994_v16 = vor.u32 %v6783_v11, %v6782_v29  ;;  %v3627_v29 = vmul.f32 %v3490_v20, %v3375_v21  ;;  %4612 = vmatpush.bf16.msrb.mxu3 %v8969_v44 }
 0x2be   : > { %v2536_v61 = vpop.f32.mrf.mxu2  ;;  %v10990_v33 = vld [vmem:[#allocation2 + $0x2c] sm:$0xff] }
 0x2bf   : > { %v3340_v27 = vadd.f32 %v10678_v5, %v3300_v63  ;;  %v2608_v46 = vadd.f32 %v2536_v61, %v10366_v40  ;;  %v2929_v12 = vpop.f32.mrf.mxu3  ;;  %v12735_v25 = vrot.slane %v10990_v33, 3  ;;  %v4146_v10 = vshrl.u32 %v10990_v33, 16 }
 0x2c0   : > { %v3191_v48 = vpop.f32.mrf.mxu0  ;;  %v4149_v36 = vshll.u32 %v10990_v33, 16  ;;  %v12821_v40 = vrot.slane %v10916_v30, 3  ;;  %v11008_v30 = vor.u32 %v2803_v19, %v2800_v62  ;;  %v12823_v19 = vrot.slane %v10884_v18, 2 }
 0x2c1   : > { %v3376_v43 = vmax.f32 %v3340_v27, 0.0  ;;  %v3001_v3 = vadd.f32 %v2929_v12, %v2608_v46  ;;  %v4148_v63 = vrot.slane %v4146_v10, 2  ;;  %v12734_v27 = vrot.slane %v10962_v56, 2 }
 0x2c2   : > { %v3906_v11 = vsel %vm3046_vm4, %v12821_v40, %v12735_v25  ;;  %v4151_v39 = vrot.slane %v4149_v36, 3  ;;  %v4482_v46 = vrot.slane %v4146_v10, 3  ;;  %v4483_v12 = vrot.slane %v4149_v36, 4 }
 0x2c3   : > { %v3628_v61 = vmul.f32 %v3495_v47, %v3376_v43  ;;  %v3261_v1 = vadd.f32 %v3189_v55, %v3001_v3  ;;  %4027 = vmatmul.bf16.gmra.mxu1 %v3906_v11  ;;  %v11015_v43 = vld [vmem:[#allocation2 + $0x30] sm:$0xff]  ;;  %v11037_v47 = vld [vmem:[%s9744_s26 + $0x98] sm:$0xff] }
 0x2c4   : > { %v11011_v21 = vor.u32 %v4151_v39, %v4148_v63  ;;  %v11013_v55 = vor.u32 %v4483_v12, %v4482_v46  ;;  %12822 = vst [vmem:[#allocation22_spill] sm:$0xff] %v11015_v43  ;;  %v12732_v39 = vshll.u32 %v11015_v43, 16  ;;  %v12731_v12 = vshrl.u32 %v11015_v43, 16 }
 0x2c5   : > { %v9088_v54 = vpack.c.bf16 %v3628_v61, %v3627_v29  ;;  %v3301_v40 = vmul.f32 %v10668_v9, %v3261_v1  ;;  %v8977_v1 = vld [vmem:[%s12708_s5 + $0xe0] sm:$0xff]  ;;  %v2805_v61 = vsel %vm2653_vm5, %v10936_v35, %v11008_v30  ;;  %v8976_v35 = vld [vmem:[%s12708_s5 + $0xd8] sm:$0xff] }
 0x2c6   : > { %v2538_v20 = vpop.f32.mrf.mxu2  ;;  %v11042_v11 = vsel %vm2653_vm5, %v10938_v38, %v11011_v21  ;;  %v11047_v63 = vsel %vm4457_vm6, %v10940_v53, %v11013_v55  ;;  %5130 = vmatpush.bf16.msrb.mxu0 %v8977_v1  ;;  %v8952_v53 = vld [vmem:[%s12708_s5 + $0x18] sm:$0xff]  ;;  %v6786_v1 = vrot.slane %v12731_v12, 1  ;;  %v2632_v12 = vld [vmem:[%s9744_s26 + $0xa0] sm:$0x7] }
 0x2c7   : > { %9392 = vst [vmem:[#allocation2 + $0x38] sm:$0xff] %v9088_v54   ;;  %v2609_v3 = vadd.f32 %v2538_v20, %v2224_v8  ;;  %v2931_v10 = vpop.f32.mrf.mxu3  ;;  %v2426_v54 = vsel %vm2008_vm3, %v12823_v19, %v12734_v27  ;;  %v12824_v8 = vrot.slane %v10884_v18, 3  ;;  %v3341_v18 = vadd.f32 %v10678_v5, %v3301_v40  ;;  %v8968_v38 = vld [vmem:[%s12708_s5 + $0x98] sm:$0xff]  ;;  %4341 = vmatpush.bf16.msrb.mxu2 %v8952_v53  ;;  %v3505_v27 = vpop.permute.xlu1 %3504 }
 0x2c8   : > { %v3194_v36 = vpop.f32.mrf.mxu0  ;;  %v2807_v40 = vshrl.u32 %v11037_v47, 16  ;;  %4613 = vmatpush.bf16.msrb.mxu3 %v8968_v38  ;;  %v6787_v19 = vrot.slane %v12732_v39, 2 }
 0x2c9   : > { %v3079_v62 = vsel %vm3046_vm4, %v12824_v8, %v12733_v52  ;;  %v3002_v29 = vadd.f32 %v2931_v10, %v2609_v3  ;;  %v11070_v3 = vsel %vm1615_vm2, %v10920_v50, %v10994_v16  ;;  %v3377_v10 = vmax.f32 %v3341_v18, 0.0  ;;  %v8951_v50 = vld [vmem:[%s12708_s5 + $0x10] sm:$0xff] }
 0x2ca   : > { %12825 = vst [vmem:[#allocation23_spill] sm:$0xff] %v11070_v3  ;;  %5131 = vmatpush.bf16.msrb.mxu0 %v8976_v35  ;;  %v2809_v53 = vrot.slane %v2807_v40, 2  ;;  %v3500_v35 = vpop.permute.xlu0 %3499  ;;  %v11095_v52 = vor.u32 %v6787_v19, %v6786_v1  ;;  %v12826_v3 = vrot.slane %v10990_v33, 3  ;;  %v8950_v1 = vld [vmem:[%s12708_s5 + $0x8] sm:$0xff] }
 0x2cb   : > { %v3262_v46 = vadd.f32 %v3191_v48, %v3002_v29  ;;  %2580 = vmatmul.bf16.gmra.mxu2 %v2426_v54  ;;  %3233 = vmatmul.bf16.gmra.mxu0 %v3079_v62  ;;  %v2810_v48 = vshll.u32 %v11037_v47, 16  ;;  %v8967_v29 = vld [vmem:[%s12708_s5 + $0x90] sm:$0xff]  ;;  %v3629_v25 = vmul.f32 %v3500_v35, %v3377_v10  ;;  %v8966_v33 = vld [vmem:[%s12708_s5 + $0x88] sm:$0xff]  ;;  %v2651_v35 = vunpack.c.l.b16 %v2632_v12 }
 0x2cc   : > { %2973 = vmatmul.bf16.gmra.mxu3 %v2805_v61  ;;  %v8975_v61 = vld [vmem:[%s12708_s5 + $0xd0] sm:$0xff]  ;;  %4342 = vmatpush.bf16.msrb.mxu2 %v8951_v50 }
 0x2cd   : > { %v3302_v20 = vmul.f32 %v10668_v9, %v3262_v46  ;;  %v2812_v38 = vrot.slane %v2810_v48, 3  ;;  %4614 = vmatpush.bf16.msrb.mxu3 %v8967_v29  ;;  %v12828_v29 = vld [vmem:[#allocation4_spill] sm:$0xff] }
 0x2ce   : > { %v2541_v51 = vpop.f32.mrf.mxu2  ;;  %v11072_v44 = vld [vmem:[#allocation2 + $0x34] sm:$0xff]  ;;  %5132 = vmatpush.bf16.msrb.mxu0 %v8975_v61  ;;  %v12829_v61 = vld [vmem:[#allocation3_spill] sm:$0xff] }
 0x2cf   : > { %v3342_v54 = vadd.f32 %v10678_v5, %v3302_v20  ;;  %v2610_v8 = vadd.f32 %v2541_v51, %v10407_v6  ;;  %v2934_v62 = vpop.f32.mrf.mxu3  ;;  %v12736_v46 = vrot.slane %v11072_v44, 3  ;;  %v4155_v6 = vshrl.u32 %v11072_v44, 16 }
 0x2d0   : > { %v11089_v18 = vpop.f32.mrf.mxu0  ;;  %v4158_v39 = vshll.u32 %v11072_v44, 16  ;;  %4343 = vmatpush.bf16.msrb.mxu2 %v8950_v1  ;;  %v12832_v1 = vrot.slane %v10962_v56, 3 }
 0x2d1   : > { %v3378_v20 = vmax.f32 %v3342_v54, 0.0  ;;  %v3003_v51 = vadd.f32 %v2934_v62, %v2610_v8  ;;  %v3908_v40 = vsel %vm3046_vm4, %v12826_v3, %v12736_v46  ;;  %v4157_v54 = vrot.slane %v4155_v6, 2  ;;  %v11103_v8 = vld [vmem:[#allocation2 + $0x38] sm:$0xff]  ;;  %v8974_v3 = vld [vmem:[%s12708_s5 + $0xc8] sm:$0xff]  ;;  %4615 = vmatpush.bf16.msrb.mxu3 %v8966_v33 }
 0x2d2   : > { %12827 = vst [vmem:[#allocation24_spill] sm:$0xff] %v11103_v8  ;;  %v4160_v10 = vrot.slane %v4158_v39, 3  ;;  %v4486_v19 = vrot.slane %v4155_v6, 3  ;;  %5133 = vmatpush.bf16.msrb.mxu0 %v8974_v3  ;;  %v11150_v3 = vpack.c.b16 %v2651_v35, %v2651_v35 }
 0x2d3   : > { %v3630_v62 = vmul.f32 %v3505_v27, %v3378_v20  ;;  %v3263_v50 = vadd.f32 %v3194_v36, %v3003_v51  ;;  %4032 = vmatmul.bf16.gmra.mxu1 %v3908_v40  ;;  %v2226_v27 = vadd.f32 %v12829_v61, %v12828_v29  ;;  %v12742_v36 = vrot.slane %v11037_v47, 3 }
 0x2d4   : > { %v4487_v20 = vrot.slane %v4158_v39, 4  ;;  %v11117_v40 = vor.u32 %v2812_v38, %v2809_v53  ;;  %v11119_v46 = vor.u32 %v4160_v10, %v4157_v54  ;;  %v12741_v29 = vshll.u32 %v11103_v8, 16  ;;  %v8949_v38 = vld [vmem:[%s12708_s5] sm:$0xff] }
 0x2d5   : > { %v9093_v51 = vpack.c.bf16 %v3630_v62, %v3629_v25  ;;  %v3303_v48 = vmul.f32 %v10668_v9, %v3263_v50  ;;  %v12830_v25 = vrot.slane %v11037_v47, 2  ;;  %v12831_v39 = vrot.slane %v10962_v56, 2  ;;  %v8965_v54 = vld [vmem:[%s12708_s5 + $0x80] sm:$0xff]  ;;  %4344 = vmatpush.bf16.msrb.mxu2 %v8949_v38 }
 0x2d6   : > { %v2543_v43 = vpop.f32.mrf.mxu2  ;;  %v11123_v6 = vor.u32 %v4487_v20, %v4486_v19  ;;  %v8973_v62 = vld [vmem:[%s12708_s5 + $0xc0] sm:$0xff]  ;;  %v3081_v33 = vsel %vm3046_vm4, %v12832_v1, %v12742_v36  ;;  %v12740_v19 = vshrl.u32 %v11103_v8, 16  ;;  %4616 = vmatpush.bf16.msrb.mxu3 %v8965_v54  ;;  %v11164_v56 = vsel %vm1615_vm2, %v10994_v16, %v11095_v52 }
 0x2d7   : > { %9393 = vst [vmem:[#allocation2 + $0x40] sm:$0xff] %v9093_v51   ;;  %v2611_v61 = vadd.f32 %v2543_v43, %v2226_v27  ;;  %v2936_v12 = vpop.f32.mrf.mxu3  ;;  %v2428_v53 = vsel %vm2008_vm3, %v12831_v39, %v12830_v25  ;;  %v11143_v43 = vsel %vm2653_vm5, %v11011_v21, %v11119_v46  ;;  %v2814_v21 = vsel %vm2653_vm5, %v11008_v30, %v11117_v40  ;;  %v8985_v30 = vld [vmem:[%s12708_s5 + $0x120] sm:$0xff] }
 0x2d8   : > { %v3199_v50 = vpop.f32.mrf.mxu0  ;;  %v11155_v10 = vsel %vm4457_vm6, %v11013_v55, %v11123_v6  ;;  %12833 = vst [vmem:[#allocation4_spill] sm:$0xff] %v11164_v56  ;;  %v3343_v35 = vadd.f32 %v10678_v5, %v3303_v48  ;;  %v2374_v20 = vunpack.c.l.b16 %v2283_v31  ;;  %5134 = vmatpush.bf16.msrb.mxu0 %v8973_v62  ;;  %v6790_v55 = vrot.slane %v12740_v19, 1  ;;  %5366 = vmatpush.bf16.msrb.mxu1 %v8985_v30  ;;  %v3515_v30 = vpop.permute.xlu0 %3514 }
 0x2d9   : > { %v3004_v27 = vadd.f32 %v2936_v12, %v2611_v61  ;;  %v6791_v51 = vrot.slane %v12741_v29, 2  ;;  %v2816_v16 = vshrl.u32 %v11150_v3, 16  ;;  %v2819_v12 = vshll.u32 %v11150_v3, 16 }
 0x2da   : > { %v3379_v25 = vmax.f32 %v3343_v35, 0.0 }
 0x2db   : > { %v3264_v61 = vadd.f32 %v11089_v18, %v3004_v27  ;;  %2585 = vmatmul.bf16.gmra.mxu2 %v2428_v53  ;;  %3238 = vmatmul.bf16.gmra.mxu0 %v3081_v33  ;;  %v11176_v48 = vor.u32 %v6791_v51, %v6790_v55  ;;  %v2393_v18 = vpack.c.b16 %v2374_v20, %v2374_v20  ;;  %v2818_v27 = vrot.slane %v2816_v16, 2  ;;  %v3510_v55 = vpop.permute.xlu2 %3509 }
 0x2dc   : > { %2978 = vmatmul.bf16.gmra.mxu3 %v2814_v21  ;;  %v3631_v19 = vmul.f32 %v3510_v55, %v3379_v25  ;;  %v12837_v25 = vld [vmem:[#allocation5_spill] sm:$0xff] }
 0x2dd   : > { %v3304_v31 = vmul.f32 %v10668_v9, %v3264_v61  ;;  %v11185_v53 = vsel %vm1615_vm2, %v11095_v52, %v11176_v48  ;;  %v2821_v61 = vrot.slane %v2819_v12, 3 }
 0x2de   : > { %v2546_v39 = vpop.f32.mrf.mxu2  ;;  %v11180_v38 = vld [vmem:[#allocation2 + $0x3c] sm:$0xff]  ;;  %12834 = vst [vmem:[#allocation3_spill] sm:$0xff] %v11185_v53 }
 0x2df   : > { %v3344_v54 = vadd.f32 %v10678_v5, %v3304_v31  ;;  %v2612_v62 = vadd.f32 %v2546_v39, %v10448_v7  ;;  %v2939_v1 = vpop.f32.mrf.mxu3  ;;  %v3909_v9 = vrot.slane %v11180_v38, 3  ;;  %v4164_v21 = vshrl.u32 %v11180_v38, 16  ;;  %v11191_v35 = vld [vmem:[#allocation2 + $0x40] sm:$0xff] }
 0x2e0   : > { %v3201_v33 = vpop.f32.mrf.mxu0  ;;  %12835 = vst [vmem:[#allocation25_spill] sm:$0xff] %v11191_v35  ;;  %v4167_v52 = vshll.u32 %v11180_v38, 16  ;;  %v12836_v7 = vrot.slane %v11072_v44, 3  ;;  %v2429_v31 = vrot.slane %v2393_v18, 2  ;;  %v2822_v56 = vor.u32 %v2821_v61, %v2818_v27  ;;  %v11208_v18 = vld [vmem:[%s12706_s3] ss:$0 sm:$0xff] }
 0x2e1   : > { %v3380_v20 = vmax.f32 %v3344_v54, 0.0  ;;  %v3005_v51 = vadd.f32 %v2939_v1, %v2612_v62  ;;  %v4166_v16 = vrot.slane %v4164_v21, 2  ;;  %v4490_v53 = vrot.slane %v4164_v21, 3 }
 0x2e2   : > { %v3910_v5 = vsel %vm3046_vm4, %v12836_v7, %v3909_v9  ;;  %v4169_v36 = vrot.slane %v4167_v52, 3  ;;  %v3082_v54 = vrot.slane %v11150_v3, 3  ;;  %v4491_v12 = vrot.slane %v4167_v52, 4 }
 0x2e3   : > { %v3632_v39 = vmul.f32 %v3515_v30, %v3380_v20  ;;  %v3265_v29 = vadd.f32 %v3199_v50, %v3005_v51  ;;  %4037 = vmatmul.bf16.gmra.mxu1 %v3910_v5  ;;  %v12744_v62 = vshll.u32 %v11191_v35, 16  ;;  %v2228_v1 = vadd.f32 %v12837_v25, %v10473_v57  ;;  %v9463_v5 = vld [vmem:[#allocation2 + $0xc] sm:$0x8] }
 0x2e4   : > { %v11203_v44 = vor.u32 %v4169_v36, %v4166_v16  ;;  %v11211_v20 = vor.u32 %v4491_v12, %v4490_v53  ;;  %v12838_v52 = vrot.slane %v11037_v47, 2  ;;  %v12839_v27 = vrot.slane %v11037_v47, 3  ;;  %v9569_v16 = vld [vmem:[#allocation2 + $0x14] sm:$0xff]   ;;  %v11237_v47 = vld [vmem:[%s12707_s4] ss:$0 sm:$0xff] }
 0x2e5   : > { %v9098_v55 = vpack.c.bf16 %v3632_v39, %v3631_v19  ;;  %v3305_v50 = vmul.f32 %v11208_v18, %v3265_v29  ;;  %v12743_v61 = vshrl.u32 %v11191_v35, 16  ;;  %v6795_v30 = vrot.slane %v12744_v62, 2 }
 0x2e6   : > { %v2548_v21 = vpop.f32.mrf.mxu2  ;;  %v2430_v57 = vsel %vm2008_vm3, %v12838_v52, %v2429_v31  ;;  %v11219_v36 = vsel %vm2653_vm5, %v11119_v46, %v11203_v44  ;;  %v3083_v29 = vsel %vm3046_vm4, %v12839_v27, %v3082_v54  ;;  %v11227_v53 = vsel %vm4457_vm6, %v11123_v6, %v11211_v20  ;;  %v9567_v31 = vld [vmem:[#allocation2 + $0xc] sm:$0xf0]  }
 0x2e7   : > { %9394 = vst [vmem:[#allocation2 + $0x48] sm:$0xff] %v9098_v55   ;;  %v2613_v3 = vadd.f32 %v2548_v21, %v2228_v1  ;;  %v2941_v51 = vpop.f32.mrf.mxu3  ;;  %v2823_v46 = vsel %vm2653_vm5, %v11117_v40, %v2822_v56  ;;  %v3345_v6 = vadd.f32 %v11237_v47, %v3305_v50  ;;  %v6794_v39 = vrot.slane %v12743_v61, 1 }
 0x2e8   : > { %v3204_v19 = vpop.f32.mrf.mxu0  ;;  %v9464_v12 = vor.u32 %v9567_v31, %v9463_v5  ;;  %v4900_v56 = vshrl.u32 %v9569_v16, 16  ;;  %v3520_v5 = vpop.permute.xlu1 %3519 }
 0x2e9   : > { %v3006_v7 = vadd.f32 %v2941_v51, %v2613_v3  ;;  %v11242_v25 = vor.u32 %v6795_v30, %v6794_v39  ;;  %v3381_v1 = vmax.f32 %v3345_v6, 0.0  ;;  %v4903_v3 = vshll.u32 %v9569_v16, 16  ;;  %v3525_v39 = vpop.permute.xlu2 %3524 }
 0x2ea   : > { %v4895_v30 = vshll.u32 %v9464_v12, 16  ;;  %v4902_v6 = vrot.slane %v4900_v56, 3 }
 0x2eb   : > { %v3266_v54 = vadd.f32 %v3201_v33, %v3006_v7  ;;  %2590 = vmatmul.bf16.gmra.mxu2 %v2430_v57  ;;  %3243 = vmatmul.bf16.gmra.mxu0 %v3083_v29  ;;  %v11250_v50 = vsel %vm1615_vm2, %v11176_v48, %v11242_v25  ;;  %v4892_v29 = vshrl.u32 %v9464_v12, 16 }
 0x2ec   : > { %2983 = vmatmul.bf16.gmra.mxu3 %v2823_v46  ;;  %12840 = vst [vmem:[#allocation5_spill] sm:$0xff] %v11250_v50 }
 0x2ed   : > { %v3306_v40 = vmul.f32 %v11208_v18, %v3266_v54  ;;  %v3633_v54 = vmul.f32 %v3520_v5, %v3381_v1  ;;  %v2230_v1 = vadd.f32 %v10487_v22, %v10512_v24 }
 0x2ee   : > { %v2551_v55 = vpop.f32.mrf.mxu2  ;;  %v11245_v21 = vld [vmem:[#allocation2 + $0x44] sm:$0xff] }
 0x2ef   : > { %v3346_v33 = vadd.f32 %v11237_v47, %v3306_v40  ;;  %v2614_v51 = vadd.f32 %v2551_v55, %v10491_v17  ;;  %v2944_v52 = vpop.f32.mrf.mxu3  ;;  %v3911_v27 = vrot.slane %v11245_v21, 3  ;;  %v4173_v7 = vshrl.u32 %v11245_v21, 16  ;;  %v11256_v46 = vld [vmem:[#allocation2 + $0x48] sm:$0xff] }
 0x2f0   : > { %v3206_v57 = vpop.f32.mrf.mxu0  ;;  %12841 = vst [vmem:[#allocation26_spill] sm:$0xff] %v11256_v46  ;;  %v4176_v48 = vshll.u32 %v11245_v21, 16  ;;  %v4905_v40 = vrot.slane %v4903_v3, 4 }
 0x2f1   : > { %v3382_v31 = vmax.f32 %v3346_v33, 0.0  ;;  %v3007_v16 = vadd.f32 %v2944_v52, %v2614_v51  ;;  %v3912_v17 = vsel %vm3046_vm4, %v3909_v9, %v3911_v27  ;;  %v4175_v12 = vrot.slane %v4173_v7, 2 }
 0x2f2   : > { %v4178_v62 = vrot.slane %v4176_v48, 3  ;;  %v4494_v50 = vrot.slane %v4173_v7, 3  ;;  %v4894_v33 = vrot.slane %v4892_v29, 3  ;;  %v4897_v51 = vrot.slane %v4895_v30, 4 }
 0x2f3   : > { %v3634_v55 = vmul.f32 %v3525_v39, %v3382_v31  ;;  %v3267_v61 = vadd.f32 %v3204_v19, %v3007_v16  ;;  %4042 = vmatmul.bf16.gmra.mxu1 %v3912_v17  ;;  %v4495_v56 = vrot.slane %v4176_v48, 4  ;;  %v12750_v52 = vshll.u32 %v11256_v46, 16  ;;  %v11279_v31 = vpop.f32.mrf.mxu1 }
 0x2f4   : > { %v11267_v35 = vor.u32 %v4178_v62, %v4175_v12  ;;  %v11270_v3 = vor.u32 %v4905_v40, %v4902_v6  ;;  %v4898_v24 = vor.u32 %v4897_v51, %v4894_v33  ;;  %v9571_v6 = vld [vmem:[#allocation2 + $0x1c] sm:$0xff]  }
 0x2f5   : > { %v9103_v5 = vpack.c.bf16 %v3634_v55, %v3633_v54  ;;  %v3307_v38 = vmul.f32 %v11208_v18, %v3267_v61  ;;  %v11272_v19 = vor.u32 %v4495_v56, %v4494_v50  ;;  %v12747_v61 = vshrl.u32 %v11256_v46, 16 }
 0x2f6   : > { %v2553_v9 = vpop.f32.mrf.mxu2  ;;  %v11277_v30 = vsel %vm2653_vm5, %v11203_v44, %v11267_v35  ;;  %v6799_v50 = vrot.slane %v12750_v52, 2  ;;  %v4907_v44 = vsel %vm4457_vm6, %v4898_v24, %v11270_v3  ;;  %v4909_v12 = vshrl.u32 %v9571_v6, 16  ;;  %v3530_v24 = vpop.permute.xlu0 %3529 }
 0x2f7   : > { %9395 = vst [vmem:[#allocation2 + $0x50] sm:$0xff] %v9103_v5   ;;  %v2615_v7 = vadd.f32 %v2553_v9, %v2230_v1  ;;  %v2946_v29 = vpop.f32.mrf.mxu3  ;;  %v11284_v62 = vsel %vm4457_vm6, %v11211_v20, %v11272_v19  ;;  %v3347_v48 = vadd.f32 %v11237_v47, %v3307_v38  ;;  %v6798_v39 = vrot.slane %v12747_v61, 1  ;;  %v8984_v20 = vld [vmem:[%s12708_s5 + $0x118] sm:$0xff] }
 0x2f8   : > { %v3209_v22 = vpop.f32.mrf.mxu0  ;;  %5367 = vmatpush.bf16.msrb.mxu1 %v8984_v20 }
 0x2f9   : > { %v3008_v16 = vadd.f32 %v2946_v29, %v2615_v7  ;;  %v11299_v17 = vor.u32 %v6799_v50, %v6798_v39  ;;  %v3383_v55 = vmax.f32 %v3347_v48, 0.0  ;;  %v3535_v48 = vpop.permute.xlu1 %3534 }
 0x2fb   : > { %v3268_v54 = vadd.f32 %v3206_v57, %v3008_v16  ;;  %4345 = vmatmul.bf16.vlgmr.msrb.gmra.mxu2 %v10755_v49  ;;  %5135 = vmatmul.bf16.vlgmr.msrb.gmra.mxu0 %v4907_v44  ;;  %v4912_v57 = vshll.u32 %v9571_v6, 16  ;;  %v11307_v49 = vsel %vm1615_vm2, %v11242_v25, %v11299_v17  ;;  %v4911_v6 = vrot.slane %v4909_v12, 3 }
 0x2fc   : > { %4617 = vmatmul.bf16.vlgmr.msrb.gmra.mxu3 %v10778_v0  ;;  %12842 = vst [vmem:[#allocation27_spill] sm:$0xff] %v11307_v49  ;;  %v3635_v44 = vmul.f32 %v3530_v24, %v3383_v55 }
 0x2fd   : > { %v3308_v40 = vmul.f32 %v11208_v18, %v3268_v54  ;;  %v4914_v39 = vrot.slane %v4912_v57, 4 }
 0x2fe   : > { %v2556_v33 = vpop.f32.mrf.mxu2  ;;  %v11302_v51 = vld [vmem:[#allocation2 + $0x4c] sm:$0xff] }
 0x2ff   : > { %v3348_v56 = vadd.f32 %v11237_v47, %v3308_v40  ;;  %v2616_v0 = vadd.f32 %v2556_v33, %v10527_v60  ;;  %v2949_v1 = vpop.f32.mrf.mxu3  ;;  %v11311_v38 = vpop.f32.mrf.mxu1  ;;  %v3913_v9 = vrot.slane %v11302_v51, 3  ;;  %v4182_v7 = vshrl.u32 %v11302_v51, 16  ;;  %v11315_v29 = vld [vmem:[#allocation2 + $0x50] sm:$0xff] }
 0x300   : > { %v3211_v5 = vpop.f32.mrf.mxu0  ;;  %12843 = vst [vmem:[#allocation28_spill] sm:$0xff] %v11315_v29  ;;  %v4185_v25 = vshll.u32 %v11302_v51, 16  ;;  %v12749_v12 = vshll.u32 %v11315_v29, 16 }
 0x301   : > { %v3384_v50 = vmax.f32 %v3348_v56, 0.0  ;;  %v3009_v16 = vadd.f32 %v2949_v1, %v2616_v0  ;;  %v3914_v60 = vsel %vm3046_vm4, %v3911_v27, %v3913_v9  ;;  %v4184_v54 = vrot.slane %v4182_v7, 2 }
 0x302   : > { %v4187_v33 = vrot.slane %v4185_v25, 3  ;;  %v4498_v61 = vrot.slane %v4182_v7, 3  ;;  %v4499_v56 = vrot.slane %v4185_v25, 4  ;;  %v2232_v0 = vadd.f32 %v10523_v28, %v10542_v59 }
 0x303   : > { %v3636_v20 = vmul.f32 %v3535_v48, %v3384_v50  ;;  %v3269_v40 = vadd.f32 %v3209_v22, %v3009_v16  ;;  %4047 = vmatmul.bf16.gmra.mxu1 %v3914_v60  ;;  %v11329_v27 = vor.u32 %v4914_v39, %v4911_v6  ;;  %v12748_v6 = vshrl.u32 %v11315_v29, 16  ;;  %v9573_v48 = vld [vmem:[#allocation2 + $0x24] sm:$0xff]  }
 0x304   : > { %v11326_v1 = vor.u32 %v4187_v33, %v4184_v54  ;;  %v11331_v57 = vor.u32 %v4499_v56, %v4498_v61  ;;  %v6803_v61 = vrot.slane %v12749_v12, 2 }
 0x305   : > { %v9108_v55 = vpack.c.bf16 %v3636_v20, %v3635_v44  ;;  %v3309_v21 = vmul.f32 %v11208_v18, %v3269_v40  ;;  %v6802_v60 = vrot.slane %v12748_v6, 1  ;;  %v4918_v20 = vshrl.u32 %v9573_v48, 16 }
 0x306   : > { %v2558_v24 = vpop.f32.mrf.mxu2  ;;  %v11336_v7 = vsel %vm2653_vm5, %v11267_v35, %v11326_v1  ;;  %v11343_v59 = vsel %vm4457_vm6, %v11272_v19, %v11331_v57  ;;  %v4916_v35 = vsel %vm4457_vm6, %v11270_v3, %v11329_v27 }
 0x307   : > { %9396 = vst [vmem:[#allocation2 + $0x58] sm:$0xff] %v9108_v55   ;;  %v2617_v22 = vadd.f32 %v2558_v24, %v2232_v0  ;;  %v2951_v50 = vpop.f32.mrf.mxu3  ;;  %v11338_v28 = vpop.f32.mrf.mxu1  ;;  %v3349_v44 = vadd.f32 %v11237_v47, %v3309_v21  ;;  %v11356_v19 = vor.u32 %v6803_v61, %v6802_v60  ;;  %v4921_v0 = vshll.u32 %v9573_v48, 16 }
 0x308   : > { %v3214_v16 = vpop.f32.mrf.mxu0  ;;  %v3540_v61 = vpop.permute.xlu2 %3539 }
 0x309   : > { %v3010_v25 = vadd.f32 %v2951_v50, %v2617_v22  ;;  %v3385_v40 = vmax.f32 %v3349_v44, 0.0  ;;  %v11364_v3 = vsel %vm1615_vm2, %v11299_v17, %v11356_v19  ;;  %v4920_v44 = vrot.slane %v4918_v20, 3 }
 0x30a   : > { %12844 = vst [vmem:[#allocation29_spill] sm:$0xff] %v11364_v3 }
 0x30b   : > { %v3270_v39 = vadd.f32 %v3211_v5, %v3010_v25  ;;  %4350 = vmatmul.bf16.gmra.mxu2 %v10834_v34  ;;  %5140 = vmatmul.bf16.gmra.mxu0 %v4916_v35  ;;  %v3545_v35 = vpop.permute.xlu0 %3544  ;;  %v3637_v60 = vmul.f32 %v3540_v61, %v3385_v40 }
 0x30c   : > { %4622 = vmatmul.bf16.gmra.mxu3 %v10839_v4 }
 0x30d   : > { %v3310_v54 = vmul.f32 %v11208_v18, %v3270_v39  ;;  %v4923_v39 = vrot.slane %v4921_v0, 4 }
 0x30e   : > { %v2561_v33 = vpop.f32.mrf.mxu2  ;;  %v11359_v56 = vld [vmem:[#allocation2 + $0x54] sm:$0xff] }
 0x30f   : > { %v3350_v34 = vadd.f32 %v11237_v47, %v3310_v54  ;;  %v2618_v5 = vadd.f32 %v2561_v33, %v10554_v23  ;;  %v2954_v4 = vpop.f32.mrf.mxu3  ;;  %v11368_v21 = vpop.f32.mrf.mxu1  ;;  %v3915_v24 = vrot.slane %v11359_v56, 3  ;;  %v4191_v22 = vshrl.u32 %v11359_v56, 16  ;;  %v11372_v50 = vld [vmem:[#allocation2 + $0x58] sm:$0xff] }
 0x310   : > { %v3216_v55 = vpop.f32.mrf.mxu0  ;;  %12845 = vst [vmem:[#allocation30_spill] sm:$0xff] %v11372_v50  ;;  %v4194_v17 = vshll.u32 %v11359_v56, 16  ;;  %v12752_v20 = vshll.u32 %v11372_v50, 16 }
 0x311   : > { %v3386_v25 = vmax.f32 %v3350_v34, 0.0  ;;  %v3011_v48 = vadd.f32 %v2954_v4, %v2618_v5  ;;  %v3916_v23 = vsel %vm3046_vm4, %v3913_v9, %v3915_v24  ;;  %v4193_v54 = vrot.slane %v4191_v22, 2 }
 0x312   : > { %v4196_v12 = vrot.slane %v4194_v17, 3  ;;  %v4502_v52 = vrot.slane %v4191_v22, 3  ;;  %v4503_v34 = vrot.slane %v4194_v17, 4  ;;  %v2234_v5 = vadd.f32 %v10550_v41, %v10569_v42 }
 0x313   : > { %v3638_v33 = vmul.f32 %v3545_v35, %v3386_v25  ;;  %v3271_v6 = vadd.f32 %v3214_v16, %v3011_v48  ;;  %4052 = vmatmul.bf16.gmra.mxu1 %v3916_v23  ;;  %v11386_v9 = vor.u32 %v4923_v39, %v4920_v44  ;;  %v9575_v44 = vld [vmem:[#allocation2 + $0x2c] sm:$0xff]  }
 0x314   : > { %v11383_v4 = vor.u32 %v4196_v12, %v4193_v54  ;;  %v11388_v0 = vor.u32 %v4503_v34, %v4502_v52  ;;  %v12751_v12 = vshrl.u32 %v11372_v50, 16  ;;  %v6807_v52 = vrot.slane %v12752_v20, 2 }
 0x315   : > { %v9113_v40 = vpack.c.bf16 %v3638_v33, %v3637_v60  ;;  %v3311_v51 = vmul.f32 %v11208_v18, %v3271_v6  ;;  %v4927_v39 = vshrl.u32 %v9575_v44, 16 }
 0x316   : > { %v2563_v61 = vpop.f32.mrf.mxu2  ;;  %v11393_v22 = vsel %vm2653_vm5, %v11326_v1, %v11383_v4  ;;  %v11400_v42 = vsel %vm4457_vm6, %v11331_v57, %v11388_v0  ;;  %v4925_v1 = vsel %vm4457_vm6, %v11329_v27, %v11386_v9  ;;  %v6806_v35 = vrot.slane %v12751_v12, 1 }
 0x317   : > { %9397 = vst [vmem:[#allocation2 + $0x60] sm:$0xff] %v9113_v40   ;;  %v2619_v16 = vadd.f32 %v2563_v61, %v2234_v5  ;;  %v2956_v25 = vpop.f32.mrf.mxu3  ;;  %v11395_v41 = vpop.f32.mrf.mxu1  ;;  %v3351_v17 = vadd.f32 %v11237_v47, %v3311_v51  ;;  %v4930_v5 = vshll.u32 %v9575_v44, 16 }
 0x318   : > { %v3219_v48 = vpop.f32.mrf.mxu0  ;;  %v11413_v57 = vor.u32 %v6807_v52, %v6806_v35  ;;  %v3550_v52 = vpop.permute.xlu1 %3549 }
 0x319   : > { %v3012_v6 = vadd.f32 %v2956_v25, %v2619_v16  ;;  %v3387_v54 = vmax.f32 %v3351_v17, 0.0  ;;  %v4929_v17 = vrot.slane %v4927_v39, 3 }
 0x31a   : > { %v11421_v27 = vsel %vm1615_vm2, %v11356_v19, %v11413_v57 }
 0x31b   : > { %v3272_v60 = vadd.f32 %v3216_v55, %v3012_v6  ;;  %4355 = vmatmul.bf16.gmra.mxu2 %v10889_v2  ;;  %5145 = vmatmul.bf16.gmra.mxu0 %v4925_v1  ;;  %12846 = vst [vmem:[#allocation31_spill] sm:$0xff] %v11421_v27  ;;  %v3555_v1 = vpop.permute.xlu2 %3554  ;;  %v3639_v35 = vmul.f32 %v3550_v52, %v3387_v54 }
 0x31c   : > { %4627 = vmatmul.bf16.gmra.mxu3 %v10894_v15 }
 0x31d   : > { %v3312_v23 = vmul.f32 %v11208_v18, %v3272_v60  ;;  %v4932_v60 = vrot.slane %v4930_v5, 4 }
 0x31e   : > { %v2566_v33 = vpop.f32.mrf.mxu2  ;;  %v11416_v34 = vld [vmem:[#allocation2 + $0x5c] sm:$0xff] }
 0x31f   : > { %v3352_v2 = vadd.f32 %v11237_v47, %v3312_v23  ;;  %v2620_v55 = vadd.f32 %v2566_v33, %v10581_v58  ;;  %v2959_v15 = vpop.f32.mrf.mxu3  ;;  %v11425_v51 = vpop.f32.mrf.mxu1  ;;  %v3917_v61 = vrot.slane %v11416_v34, 3  ;;  %v4200_v16 = vshrl.u32 %v11416_v34, 16  ;;  %v11429_v25 = vld [vmem:[#allocation2 + $0x60] sm:$0xff] }
 0x320   : > { %v3221_v40 = vpop.f32.mrf.mxu0  ;;  %12847 = vst [vmem:[#allocation32_spill] sm:$0xff] %v11429_v25  ;;  %v4203_v19 = vshll.u32 %v11416_v34, 16  ;;  %v12754_v39 = vshll.u32 %v11429_v25, 16 }
 0x321   : > { %v3388_v6 = vmax.f32 %v3352_v2, 0.0  ;;  %v3013_v44 = vadd.f32 %v2959_v15, %v2620_v55  ;;  %v3918_v58 = vsel %vm3046_vm4, %v3915_v24, %v3917_v61  ;;  %v4202_v23 = vrot.slane %v4200_v16, 2  ;;  %v12848_v55 = vld [vmem:[#allocation6_spill] sm:$0xff] }
 0x322   : > { %v4205_v20 = vrot.slane %v4203_v19, 3  ;;  %v4506_v27 = vrot.slane %v4200_v16, 3  ;;  %v4507_v2 = vrot.slane %v4203_v19, 4  ;;  %v2236_v15 = vadd.f32 %v12848_v55, %v10591_v13  ;;  %v8983_v16 = vld [vmem:[%s12708_s5 + $0x110] sm:$0xff] }
 0x323   : > { %v3640_v33 = vmul.f32 %v3555_v1, %v3388_v6  ;;  %v3273_v12 = vadd.f32 %v3219_v48, %v3013_v44  ;;  %4057 = vmatmul.bf16.gmra.mxu1 %v3918_v58  ;;  %v11443_v24 = vor.u32 %v4932_v60, %v4929_v17  ;;  %v9577_v19 = vld [vmem:[#allocation2 + $0x34] sm:$0xff]  }
 0x324   : > { %v11440_v52 = vor.u32 %v4205_v20, %v4202_v23  ;;  %v11445_v5 = vor.u32 %v4507_v2, %v4506_v27  ;;  %v6811_v27 = vrot.slane %v12754_v39, 2  ;;  %5368 = vmatpush.bf16.msrb.mxu1 %v8983_v16  ;;  %v4936_v23 = vshrl.u32 %v9577_v19, 16 }
 0x325   : > { %v9118_v54 = vpack.c.bf16 %v3640_v33, %v3639_v35  ;;  %v3313_v56 = vmul.f32 %v11208_v18, %v3273_v12 }
 0x326   : > { %v2568_v3 = vpop.f32.mrf.mxu2  ;;  %v11453_v13 = vsel %vm2653_vm5, %v11383_v4, %v11440_v52  ;;  %v11460_v12 = vsel %vm4457_vm6, %v11388_v0, %v11445_v5  ;;  %v4934_v4 = vsel %vm4457_vm6, %v11386_v9, %v11443_v24 }
 0x327   : > { %9398 = vst [vmem:[#allocation2 + $0x68] sm:$0xff] %v9118_v54   ;;  %v2621_v48 = vadd.f32 %v2568_v3, %v2236_v15  ;;  %v2961_v6 = vpop.f32.mrf.mxu3  ;;  %v11455_v44 = vpop.f32.mrf.mxu1  ;;  %v12753_v3 = vshrl.u32 %v11429_v25, 16  ;;  %v3353_v1 = vadd.f32 %v11237_v47, %v3313_v56  ;;  %v4939_v15 = vshll.u32 %v9577_v19, 16 }
 0x328   : > { %v3224_v20 = vpop.f32.mrf.mxu0 }
 0x329   : > { %v3014_v17 = vadd.f32 %v2961_v6, %v2621_v48  ;;  %v6810_v35 = vrot.slane %v12753_v3, 1  ;;  %v3389_v33 = vmax.f32 %v3353_v1, 0.0  ;;  %v4938_v1 = vrot.slane %v4936_v23, 3 }
 0x32b   : > { %v3274_v58 = vadd.f32 %v3221_v40, %v3014_v17  ;;  %4360 = vmatmul.bf16.gmra.mxu2 %v10967_v45  ;;  %5150 = vmatmul.bf16.gmra.mxu0 %v4934_v4  ;;  %v11473_v0 = vor.u32 %v6811_v27, %v6810_v35  ;;  %v3560_v27 = vpop.permute.xlu0 %3559  ;;  %v3565_v4 = vpop.permute.xlu1 %3564 }
 0x32c   : > { %4632 = vmatmul.bf16.gmra.mxu3 %v10972_v32  ;;  %v3641_v35 = vmul.f32 %v3560_v27, %v3389_v33 }
 0x32d   : > { %v3314_v60 = vmul.f32 %v11208_v18, %v3274_v58  ;;  %v11481_v9 = vsel %vm1615_vm2, %v11413_v57, %v11473_v0  ;;  %v4941_v58 = vrot.slane %v4939_v15, 4 }
 0x32e   : > { %v2571_v2 = vpop.f32.mrf.mxu2  ;;  %v11476_v55 = vld [vmem:[#allocation2 + $0x64] sm:$0xff]  ;;  %12849 = vst [vmem:[#allocation6_spill] sm:$0xff] %v11481_v9 }
 0x32f   : > { %v3354_v45 = vadd.f32 %v11237_v47, %v3314_v60  ;;  %v2622_v40 = vadd.f32 %v2571_v2, %v10599_v37  ;;  %v2964_v32 = vpop.f32.mrf.mxu3  ;;  %v11485_v56 = vpop.f32.mrf.mxu1  ;;  %v3919_v48 = vrot.slane %v11476_v55, 3  ;;  %v4209_v6 = vshrl.u32 %v11476_v55, 16  ;;  %v11489_v16 = vld [vmem:[#allocation2 + $0x68] sm:$0xff] }
 0x330   : > { %v3226_v54 = vpop.f32.mrf.mxu0  ;;  %12850 = vst [vmem:[#allocation33_spill] sm:$0xff] %v11489_v16  ;;  %v4212_v57 = vshll.u32 %v11476_v55, 16  ;;  %v12756_v23 = vshll.u32 %v11489_v16, 16 }
 0x331   : > { %v3390_v17 = vmax.f32 %v3354_v45, 0.0  ;;  %v3015_v19 = vadd.f32 %v2964_v32, %v2622_v40  ;;  %v3920_v37 = vsel %vm3046_vm4, %v3917_v61, %v3919_v48  ;;  %v4211_v60 = vrot.slane %v4209_v6, 2  ;;  %v12851_v40 = vld [vmem:[#allocation7_spill] sm:$0xff] }
 0x332   : > { %v4214_v39 = vrot.slane %v4212_v57, 3  ;;  %v4510_v9 = vrot.slane %v4209_v6, 3  ;;  %v4511_v45 = vrot.slane %v4212_v57, 4  ;;  %v2238_v32 = vadd.f32 %v12851_v40, %v10606_v26 }
 0x333   : > { %v3642_v2 = vmul.f32 %v3565_v4, %v3390_v17  ;;  %v3275_v3 = vadd.f32 %v3224_v20, %v3015_v19  ;;  %4062 = vmatmul.bf16.gmra.mxu1 %v3920_v37  ;;  %v11503_v61 = vor.u32 %v4941_v58, %v4938_v1  ;;  %v9579_v1 = vld [vmem:[#allocation2 + $0x3c] sm:$0xff]  }
 0x334   : > { %v11500_v27 = vor.u32 %v4214_v39, %v4211_v60  ;;  %v11505_v15 = vor.u32 %v4511_v45, %v4510_v9  ;;  %v6815_v9 = vrot.slane %v12756_v23, 2  ;;  %v4945_v58 = vshrl.u32 %v9579_v1, 16 }
 0x335   : > { %v9123_v33 = vpack.c.bf16 %v3642_v2, %v3641_v35  ;;  %v3315_v34 = vmul.f32 %v11208_v18, %v3275_v3  ;;  %v12755_v3 = vshrl.u32 %v11489_v16, 16  ;;  %v4948_v40 = vshll.u32 %v9579_v1, 16 }
 0x336   : > { %v2573_v49 = vpop.f32.mrf.mxu2  ;;  %v11510_v6 = vsel %vm2653_vm5, %v11440_v52, %v11500_v27  ;;  %v11517_v39 = vsel %vm4457_vm6, %v11445_v5, %v11505_v15  ;;  %v4943_v52 = vsel %vm4457_vm6, %v11443_v24, %v11503_v61 }
 0x337   : > { %9399 = vst [vmem:[#allocation2 + $0x70] sm:$0xff] %v9123_v33   ;;  %v2623_v20 = vadd.f32 %v2573_v49, %v2238_v32  ;;  %v2966_v17 = vpop.f32.mrf.mxu3  ;;  %v11512_v26 = vpop.f32.mrf.mxu1  ;;  %v3355_v57 = vadd.f32 %v11237_v47, %v3315_v34  ;;  %v6814_v4 = vrot.slane %v12755_v3, 1 }
 0x338   : > { %v3229_v19 = vpop.f32.mrf.mxu0 }
 0x339   : > { %v3016_v49 = vadd.f32 %v2966_v17, %v2623_v20  ;;  %v11530_v5 = vor.u32 %v6815_v9, %v6814_v4  ;;  %v3391_v60 = vmax.f32 %v3355_v57, 0.0  ;;  %v3570_v9 = vpop.permute.xlu2 %3569  ;;  %v4947_v57 = vrot.slane %v4945_v58, 3 }
 0x33b   : > { %v3276_v35 = vadd.f32 %v3226_v54, %v3016_v49  ;;  %4365 = vmatmul.bf16.gmra.mxu2 %v11042_v11  ;;  %5155 = vmatmul.bf16.gmra.mxu0 %v4943_v52  ;;  %v11538_v24 = vsel %vm1615_vm2, %v11473_v0, %v11530_v5  ;;  %v3575_v52 = vpop.permute.xlu0 %3574  ;;  %v3643_v4 = vmul.f32 %v3570_v9, %v3391_v60 }
 0x33c   : > { %4637 = vmatmul.bf16.gmra.mxu3 %v11047_v63  ;;  %12852 = vst [vmem:[#allocation7_spill] sm:$0xff] %v11538_v24 }
 0x33d   : > { %v3316_v37 = vmul.f32 %v11208_v18, %v3276_v35  ;;  %v4950_v35 = vrot.slane %v4948_v40, 4 }
 0x33e   : > { %v2576_v2 = vpop.f32.mrf.mxu2  ;;  %v11533_v45 = vld [vmem:[#allocation2 + $0x6c] sm:$0xff] }
 0x33f   : > { %v3356_v11 = vadd.f32 %v11237_v47, %v3316_v37  ;;  %v2624_v54 = vadd.f32 %v2576_v2, %v10614_v14  ;;  %v2969_v63 = vpop.f32.mrf.mxu3  ;;  %v3921_v34 = vrot.slane %v11533_v45, 3  ;;  %v4218_v20 = vshrl.u32 %v11533_v45, 16  ;;  %v11546_v17 = vld [vmem:[#allocation2 + $0x70] sm:$0xff] }
 0x340   : > { %v3231_v32 = vpop.f32.mrf.mxu0  ;;  %v11542_v33 = vpop.f32.mrf.mxu1  ;;  %12853 = vst [vmem:[#allocation34_spill] sm:$0xff] %v11546_v17  ;;  %v4221_v0 = vshll.u32 %v11533_v45, 16  ;;  %v12762_v58 = vshll.u32 %v11546_v17, 16 }
 0x341   : > { %v3392_v49 = vmax.f32 %v3356_v11, 0.0  ;;  %v3017_v1 = vadd.f32 %v2969_v63, %v2624_v54  ;;  %v3922_v14 = vsel %vm3046_vm4, %v3919_v48, %v3921_v34  ;;  %v4220_v37 = vrot.slane %v4218_v20, 2  ;;  %v12854_v54 = vld [vmem:[#allocation9_spill] sm:$0xff]  ;;  %v12855_v63 = vld [vmem:[#allocation8_spill] sm:$0xff] }
 0x342   : > { %v4223_v23 = vrot.slane %v4221_v0, 3  ;;  %v4514_v24 = vrot.slane %v4218_v20, 3  ;;  %v4515_v11 = vrot.slane %v4221_v0, 4  ;;  %v2240_v16 = vadd.f32 %v12855_v63, %v12854_v54  ;;  %v8982_v20 = vld [vmem:[%s12708_s5 + $0x108] sm:$0xff] }
 0x343   : > { %v3644_v2 = vmul.f32 %v3575_v52, %v3392_v49  ;;  %v3277_v3 = vadd.f32 %v3229_v19, %v3017_v1  ;;  %4067 = vmatmul.bf16.gmra.mxu1 %v3922_v14  ;;  %v11560_v48 = vor.u32 %v4950_v35, %v4947_v57  ;;  %v9581_v57 = vld [vmem:[#allocation2 + $0x44] sm:$0xff]  }
 0x344   : > { %v11557_v9 = vor.u32 %v4223_v23, %v4220_v37  ;;  %v11562_v40 = vor.u32 %v4515_v11, %v4514_v24  ;;  %5369 = vmatpush.bf16.msrb.mxu1 %v8982_v20  ;;  %v4954_v37 = vshrl.u32 %v9581_v57, 16  ;;  %v4957_v63 = vshll.u32 %v9581_v57, 16 }
 0x345   : > { %v9128_v60 = vpack.c.bf16 %v3644_v2, %v3643_v4  ;;  %v3317_v55 = vmul.f32 %v11208_v18, %v3277_v3 }
 0x346   : > { %v2578_v25 = vpop.f32.mrf.mxu2  ;;  %v11570_v1 = vsel %vm2653_vm5, %v11500_v27, %v11557_v9  ;;  %v11577_v3 = vsel %vm4457_vm6, %v11505_v15, %v11562_v40  ;;  %v4952_v27 = vsel %vm4457_vm6, %v11503_v61, %v11560_v48 }
 0x347   : > { %9400 = vst [vmem:[#allocation2 + $0x78] sm:$0xff] %v9128_v60   ;;  %v2625_v19 = vadd.f32 %v2578_v25, %v2240_v16  ;;  %v2971_v49 = vpop.f32.mrf.mxu3  ;;  %v12761_v25 = vshrl.u32 %v11546_v17, 16  ;;  %v6819_v16 = vrot.slane %v12762_v58, 2  ;;  %v3357_v52 = vadd.f32 %v11237_v47, %v3317_v55 }
 0x348   : > { %v3234_v23 = vpop.f32.mrf.mxu0  ;;  %v11572_v0 = vpop.f32.mrf.mxu1 }
 0x349   : > { %v3018_v24 = vadd.f32 %v2971_v49, %v2625_v19  ;;  %v6818_v4 = vrot.slane %v12761_v25, 1  ;;  %v3393_v2 = vmax.f32 %v3357_v52, 0.0 }
 0x34b   : > { %v3278_v14 = vadd.f32 %v3231_v32, %v3018_v24  ;;  %4370 = vmatmul.bf16.gmra.mxu2 %v11143_v43  ;;  %5160 = vmatmul.bf16.gmra.mxu0 %v4952_v27  ;;  %v11590_v15 = vor.u32 %v6819_v16, %v6818_v4  ;;  %v12857_v32 = vld [vmem:[#allocation11_spill] sm:$0xff]  ;;  %v3580_v24 = vpop.permute.xlu1 %3579  ;;  %v4956_v27 = vrot.slane %v4954_v37, 3  ;;  %v3585_v4 = vpop.permute.xlu2 %3584 }
 0x34c   : > { %4642 = vmatmul.bf16.gmra.mxu3 %v11155_v10 }
 0x34d   : > { %v3318_v35 = vmul.f32 %v11208_v18, %v3278_v14  ;;  %v11598_v61 = vsel %vm1615_vm2, %v11530_v5, %v11590_v15  ;;  %v3645_v14 = vmul.f32 %v3580_v24, %v3393_v2 }
 0x34e   : > { %v2581_v11 = vpop.f32.mrf.mxu2  ;;  %v11593_v54 = vld [vmem:[#allocation2 + $0x74] sm:$0xff]  ;;  %12856 = vst [vmem:[#allocation9_spill] sm:$0xff] %v11598_v61 }
 0x34f   : > { %v3358_v43 = vadd.f32 %v11237_v47, %v3318_v35  ;;  %v2626_v60 = vadd.f32 %v2581_v11, %v12857_v32  ;;  %v2974_v10 = vpop.f32.mrf.mxu3  ;;  %v3923_v49 = vrot.slane %v11593_v54, 3  ;;  %v4227_v20 = vshrl.u32 %v11593_v54, 16  ;;  %v11606_v16 = vld [vmem:[#allocation2 + $0x78] sm:$0xff] }
 0x350   : > { %v3236_v55 = vpop.f32.mrf.mxu0  ;;  %v11602_v19 = vpop.f32.mrf.mxu1  ;;  %12858 = vst [vmem:[#allocation8_spill] sm:$0xff] %v11606_v16  ;;  %v4230_v5 = vshll.u32 %v11593_v54, 16  ;;  %v4959_v11 = vrot.slane %v4957_v63, 4  ;;  %v12770_v37 = vshll.u32 %v11606_v16, 16 }
 0x351   : > { %v3394_v57 = vmax.f32 %v3358_v43, 0.0  ;;  %v3019_v52 = vadd.f32 %v2974_v10, %v2626_v60  ;;  %v3924_v35 = vsel %vm3046_vm4, %v3921_v34, %v3923_v49  ;;  %v4229_v32 = vrot.slane %v4227_v20, 2  ;;  %v12859_v60 = vld [vmem:[#allocation12_spill] sm:$0xff]  ;;  %v12860_v10 = vld [vmem:[#allocation10_spill] sm:$0xff] }
 0x352   : > { %v4232_v61 = vrot.slane %v4230_v5, 3  ;;  %v4518_v17 = vrot.slane %v4227_v20, 3  ;;  %v4519_v43 = vrot.slane %v4230_v5, 4  ;;  %v2242_v50 = vadd.f32 %v12860_v10, %v12859_v60 }
 0x353   : > { %v3646_v25 = vmul.f32 %v3585_v4, %v3394_v57  ;;  %v3279_v58 = vadd.f32 %v3234_v23, %v3019_v52  ;;  %4072 = vmatmul.bf16.gmra.mxu1 %v3924_v35  ;;  %v11620_v34 = vor.u32 %v4959_v11, %v4956_v27 }
 0x354   : > { %v11617_v24 = vor.u32 %v4232_v61, %v4229_v32  ;;  %v11622_v63 = vor.u32 %v4519_v43, %v4518_v17  ;;  %v6823_v17 = vrot.slane %v12770_v37, 2 }
 0x355   : > { %v9133_v2 = vpack.c.bf16 %v3646_v25, %v3645_v14  ;;  %v3319_v45 = vmul.f32 %v11208_v18, %v3279_v58  ;;  %v12769_v25 = vshrl.u32 %v11606_v16, 16 }
 0x356   : > { %v2583_v29 = vpop.f32.mrf.mxu2  ;;  %v11627_v20 = vsel %vm2653_vm5, %v11557_v9, %v11617_v24  ;;  %v11634_v58 = vsel %vm4457_vm6, %v11562_v40, %v11622_v63  ;;  %v4961_v9 = vsel %vm4457_vm6, %v11560_v48, %v11620_v34 }
 0x357   : > { %9401 = vst [vmem:[#allocation2 + $0x80] sm:$0xff] %v9133_v2   ;;  %v2627_v23 = vadd.f32 %v2583_v29, %v2242_v50  ;;  %v2976_v57 = vpop.f32.mrf.mxu3  ;;  %v9583_v50 = vld [vmem:[#allocation2 + $0x4c] sm:$0xff]   ;;  %v3359_v61 = vadd.f32 %v11237_v47, %v3319_v45  ;;  %v6822_v27 = vrot.slane %v12769_v25, 1 }
 0x358   : > { %v3239_v52 = vpop.f32.mrf.mxu0  ;;  %v11629_v5 = vpop.f32.mrf.mxu1  ;;  %v4963_v35 = vshrl.u32 %v9583_v50, 16  ;;  %v4966_v60 = vshll.u32 %v9583_v50, 16 }
 0x359   : > { %v3020_v29 = vadd.f32 %v2976_v57, %v2627_v23  ;;  %v11647_v40 = vor.u32 %v6823_v17, %v6822_v27  ;;  %v3395_v11 = vmax.f32 %v3359_v61, 0.0  ;;  %v3595_v27 = vpop.permute.xlu1 %3594 }
 0x35b   : > { %v3280_v4 = vadd.f32 %v3236_v55, %v3020_v29  ;;  %4375 = vmatmul.bf16.gmra.mxu2 %v11219_v36  ;;  %5165 = vmatmul.bf16.gmra.mxu0 %v4961_v9  ;;  %v11655_v48 = vsel %vm1615_vm2, %v11590_v15, %v11647_v40  ;;  %v12862_v55 = vld [vmem:[#allocation13_spill] sm:$0xff]  ;;  %v3590_v29 = vpop.permute.xlu0 %3589  ;;  %v4965_v9 = vrot.slane %v4963_v35, 3 }
 0x35c   : > { %4647 = vmatmul.bf16.gmra.mxu3 %v11227_v53  ;;  %12861 = vst [vmem:[#allocation11_spill] sm:$0xff] %v11655_v48 }
 0x35d   : > { %v3320_v14 = vmul.f32 %v11208_v18, %v3280_v4  ;;  %v3647_v4 = vmul.f32 %v3590_v29, %v3395_v11 }
 0x35e   : > { %v2586_v32 = vpop.f32.mrf.mxu2  ;;  %v11650_v43 = vld [vmem:[#allocation2 + $0x7c] sm:$0xff] }
 0x35f   : > { %v3360_v36 = vadd.f32 %v11237_v47, %v3320_v14  ;;  %v2628_v10 = vadd.f32 %v2586_v32, %v12862_v55  ;;  %v2979_v53 = vpop.f32.mrf.mxu3  ;;  %v3925_v23 = vrot.slane %v11650_v43, 3  ;;  %v4236_v57 = vshrl.u32 %v11650_v43, 16  ;;  %v11663_v17 = vld [vmem:[#allocation2 + $0x80] sm:$0xff] }
 0x360   : > { %v3241_v2 = vpop.f32.mrf.mxu0  ;;  %v11659_v45 = vpop.f32.mrf.mxu1  ;;  %v4239_v15 = vshll.u32 %v11650_v43, 16  ;;  %v4968_v32 = vrot.slane %v4966_v60, 4  ;;  %v12778_v35 = vshll.u32 %v11663_v17, 16 }
 0x361   : > { %v3396_v50 = vmax.f32 %v3360_v36, 0.0  ;;  %v3021_v61 = vadd.f32 %v2979_v53, %v2628_v10  ;;  %v3926_v14 = vsel %vm3046_vm4, %v3923_v49, %v3925_v23  ;;  %v4238_v55 = vrot.slane %v4236_v57, 2  ;;  %v12863_v10 = vld [vmem:[#allocation15_spill] sm:$0xff]  ;;  %v12864_v53 = vld [vmem:[#allocation14_spill] sm:$0xff] }
 0x362   : > { %v4241_v48 = vrot.slane %v4239_v15, 3  ;;  %v4522_v16 = vrot.slane %v4236_v57, 3  ;;  %v4523_v36 = vrot.slane %v4239_v15, 4  ;;  %v2244_v46 = vadd.f32 %v12864_v53, %v12863_v10  ;;  %v8981_v57 = vld [vmem:[%s12708_s5 + $0x100] sm:$0xff] }
 0x363   : > { %v3648_v25 = vmul.f32 %v3595_v27, %v3396_v50  ;;  %v3281_v37 = vadd.f32 %v3239_v52, %v3021_v61  ;;  %4077 = vmatmul.bf16.gmra.mxu1 %v3926_v14  ;;  %v11677_v49 = vor.u32 %v4968_v32, %v4965_v9  ;;  %v9585_v9 = vld [vmem:[#allocation2 + $0x54] sm:$0xff]  }
 0x364   : > { %v11674_v29 = vor.u32 %v4241_v48, %v4238_v55  ;;  %v11679_v60 = vor.u32 %v4523_v36, %v4522_v16  ;;  %5370 = vmatpush.bf16.msrb.mxu1 %v8981_v57  ;;  %v4972_v32 = vshrl.u32 %v9585_v9, 16  ;;  %v4975_v53 = vshll.u32 %v9585_v9, 16 }
 0x365   : > { %v9138_v11 = vpack.c.bf16 %v3648_v25, %v3647_v4  ;;  %v3321_v54 = vmul.f32 %v11208_v18, %v3281_v37 }
 0x366   : > { %v2588_v8 = vpop.f32.mrf.mxu2  ;;  %v11687_v25 = vsel %vm2653_vm5, %v11617_v24, %v11674_v29  ;;  %v11694_v16 = vsel %vm4457_vm6, %v11622_v63, %v11679_v60  ;;  %v4970_v24 = vsel %vm4457_vm6, %v11620_v34, %v11677_v49 }
 0x367   : > { %9402 = vst [vmem:[#allocation2 + $0x88] sm:$0xff] %v9138_v11   ;;  %v2629_v52 = vadd.f32 %v2588_v8, %v2244_v46  ;;  %v2981_v50 = vpop.f32.mrf.mxu3  ;;  %v12777_v8 = vshrl.u32 %v11663_v17, 16  ;;  %v6827_v46 = vrot.slane %v12778_v35, 2  ;;  %v3361_v15 = vadd.f32 %v11237_v47, %v3321_v54 }
 0x368   : > { %v3244_v48 = vpop.f32.mrf.mxu0  ;;  %v11689_v61 = vpop.f32.mrf.mxu1 }
 0x369   : > { %v3022_v37 = vadd.f32 %v2981_v50, %v2629_v52  ;;  %v6826_v27 = vrot.slane %v12777_v8, 1  ;;  %v3397_v55 = vmax.f32 %v3361_v15, 0.0  ;;  %v4974_v15 = vrot.slane %v4972_v32, 3 }
 0x36b   : > { %v3282_v4 = vadd.f32 %v3241_v2, %v3022_v37  ;;  %4380 = vmatmul.bf16.gmra.mxu2 %v11277_v30  ;;  %5170 = vmatmul.bf16.gmra.mxu0 %v4970_v24  ;;  %v11707_v63 = vor.u32 %v6827_v46, %v6826_v27  ;;  %v12866_v2 = vld [vmem:[#allocation16_spill] sm:$0xff]  ;;  %v3600_v46 = vpop.permute.xlu2 %3599  ;;  %v3605_v24 = vpop.permute.xlu0 %3604 }
 0x36c   : > { %4652 = vmatmul.bf16.gmra.mxu3 %v11284_v62 }
 0x36d   : > { %v3322_v14 = vmul.f32 %v11208_v18, %v3282_v4  ;;  %v11715_v34 = vsel %vm1615_vm2, %v11647_v40, %v11707_v63  ;;  %v4977_v4 = vrot.slane %v4975_v53, 4 }
 0x36e   : > { %v2591_v36 = vpop.f32.mrf.mxu2  ;;  %v11710_v10 = vld [vmem:[#allocation2 + $0x84] sm:$0xff]  ;;  %12865 = vst [vmem:[#allocation12_spill] sm:$0xff] %v11715_v34 }
 0x36f   : > { %v3362_v30 = vadd.f32 %v11237_v47, %v3322_v14  ;;  %v2630_v11 = vadd.f32 %v2591_v36, %v12866_v2  ;;  %v2984_v62 = vpop.f32.mrf.mxu3  ;;  %v3927_v18 = vrot.slane %v11710_v10, 3  ;;  %v4245_v50 = vshrl.u32 %v11710_v10, 16  ;;  %v11723_v57 = vld [vmem:[#allocation2 + $0x88] sm:$0xff] }
 0x370   : > { %v3246_v54 = vpop.f32.mrf.mxu0  ;;  %v11719_v52 = vpop.f32.mrf.mxu1  ;;  %12867 = vst [vmem:[#allocation10_spill] sm:$0xff] %v11723_v57  ;;  %v4248_v40 = vshll.u32 %v11710_v10, 16  ;;  %v3649_v47 = vmul.f32 %v3600_v46, %v3397_v55  ;;  %v12780_v32 = vshll.u32 %v11723_v57, 16  ;;  %v11736_v43 = vor.u32 %v4977_v4, %v4974_v15  ;;  %v9631_v4 = vld [vmem:[%s12707_s4] ss:$0 sm:$0xff] }
 0x371   : > { %v3398_v37 = vmax.f32 %v3362_v30, 0.0  ;;  %v3023_v9 = vadd.f32 %v2984_v62, %v2630_v11  ;;  %v3928_v27 = vsel %vm3046_vm4, %v3925_v23, %v3927_v18  ;;  %v4247_v14 = vrot.slane %v4245_v50, 2  ;;  %v12868_v11 = vld [vmem:[#allocation17_spill] sm:$0xff] }
 0x372   : > { %v4250_v8 = vrot.slane %v4248_v40, 3  ;;  %v4526_v35 = vrot.slane %v4245_v50, 3  ;;  %v4527_v30 = vrot.slane %v4248_v40, 4  ;;  %v2246_v62 = vadd.f32 %v11279_v31, %v12868_v11 }
 0x373   : > { %v3650_v36 = vmul.f32 %v3605_v24, %v3398_v37  ;;  %v3283_v2 = vadd.f32 %v3244_v48, %v3023_v9  ;;  %4082 = vmatmul.bf16.gmra.mxu1 %v3928_v27  ;;  %v9630_v48 = vld [vmem:[%s12706_s3] ss:$0 sm:$0xff]  ;;  %v12779_v15 = vshrl.u32 %v11723_v57, 16  ;;  %v9039_v24 = vld [vmem:[%s12708_s5 + $0x1b8] sm:$0xff] }
 0x374   : > { %v11734_v46 = vor.u32 %v4250_v8, %v4247_v14  ;;  %v11738_v23 = vor.u32 %v4527_v30, %v4526_v35  ;;  %6355 = vmatpush.bf16.msra.mxu3 %v9039_v24 }
 0x375   : > { %v9143_v55 = vpack.c.bf16 %v3650_v36, %v3649_v47  ;;  %v3323_v53 = vmul.f32 %v9630_v48, %v3283_v2  ;;  %v4979_v47 = vsel %vm4457_vm6, %v11677_v49, %v11736_v43  ;;  %v6830_v27 = vrot.slane %v12779_v15, 1 }
 0x376   : > { %v2593_v34 = vpop.f32.mrf.mxu2  ;;  %v11746_v31 = vsel %vm2653_vm5, %v11674_v29, %v11734_v46  ;;  %v11755_v35 = vsel %vm4457_vm6, %v11679_v60, %v11738_v23  ;;  %v9014_v29 = vld [vmem:[%s12708_s5 + $0x178] sm:$0xff] }
 0x377   : > { %9403 = vst [vmem:[#allocation2 + $0x90] sm:$0xff] %v9143_v55   ;;  %v2631_v50 = vadd.f32 %v2593_v34, %v2246_v62  ;;  %v2986_v37 = vpop.f32.mrf.mxu3  ;;  %v6831_v34 = vrot.slane %v12780_v32, 2  ;;  %v9587_v60 = vld [vmem:[#allocation2 + $0x5c] sm:$0xff]   ;;  %v3363_v14 = vadd.f32 %v9631_v4, %v3323_v53  ;;  %5859 = vmatpush.bf16.msra.mxu2 %v9014_v29 }
 0x378   : > { %v11748_v8 = vpop.f32.mrf.mxu0  ;;  %v11750_v9 = vpop.f32.mrf.mxu1  ;;  %v4981_v62 = vshrl.u32 %v9587_v60, 16  ;;  %v4984_v55 = vshll.u32 %v9587_v60, 16 }
 0x379   : > { %v3024_v40 = vadd.f32 %v2986_v37, %v2631_v50  ;;  %v11776_v2 = vor.u32 %v6831_v34, %v6830_v27 }
 0x37b   : > { %v3284_v36 = vadd.f32 %v3246_v54, %v3024_v40  ;;  %4385 = vmatmul.bf16.gmra.mxu2 %v11336_v7  ;;  %5175 = vmatmul.bf16.gmra.mxu0 %v4979_v47  ;;  %v11783_v54 = vsel %vm1615_vm2, %v11707_v63, %v11776_v2  ;;  %v3399_v7 = vmax.f32 %v3363_v14, 0.0  ;;  %v9047_v63 = vld [vmem:[%s12708_s5 + $0x1f8] sm:$0xff]  ;;  %v3610_v14 = vpop.permute.xlu1 %3609 }
 0x37c   : > { %4657 = vmatmul.bf16.gmra.mxu3 %v11343_v59  ;;  %12869 = vst [vmem:[#allocation13_spill] sm:$0xff] %v11783_v54  ;;  %6614 = vmatpush.bf16.msra.mxu0 %v9047_v63 }
 0x37d   : > { %v3324_v30 = vmul.f32 %v9630_v48, %v3284_v36  ;;  %v3651_v15 = vmul.f32 %v3610_v14, %v3399_v7 }
 0x37e   : > { %v4346_v49 = vpop.f32.mrf.mxu2  ;;  %v11778_v11 = vld [vmem:[#allocation2 + $0x8c] sm:$0xff]  ;;  %v3768_v50 = vld [vmem:[#allocation2 + $0x94] sm:$0x7] }
 0x37f   : > { %v3364_v53 = vadd.f32 %v9631_v4, %v3324_v30  ;;  %v4347_v59 = vadd.f32 %v4346_v49, %v11311_v38  ;;  %v4618_v37 = vpop.f32.mrf.mxu3  ;;  %v3876_v34 = vunpack.c.l.b16 %v3768_v50  ;;  %v3929_v29 = vrot.slane %v11778_v11, 3  ;;  %v3615_v38 = vpop.permute.xlu2 %3614 }
 0x380   : > { %v5138_v40 = vpop.f32.mrf.mxu0  ;;  %v11786_v48 = vpop.f32.mrf.mxu1  ;;  %v4254_v24 = vshrl.u32 %v11778_v11, 16  ;;  %v4257_v4 = vshll.u32 %v11778_v11, 16  ;;  %v4983_v30 = vrot.slane %v4981_v62, 3  ;;  %v4986_v49 = vrot.slane %v4984_v55, 4 }
 0x381   : > { %v3400_v47 = vmax.f32 %v3364_v53, 0.0  ;;  %v4708_v60 = vadd.f32 %v4618_v37, %v4347_v59  ;;  %v3895_v27 = vpack.c.b16 %v3876_v34, %v3876_v34  ;;  %v3930_v36 = vsel %vm3046_vm4, %v3927_v18, %v3929_v29  ;;  %v9055_v53 = vld [vmem:[%s12708_s5 + $0x238] sm:$0xff] }
 0x382   : > { %v4256_v50 = vrot.slane %v4254_v24, 2  ;;  %v4259_v59 = vrot.slane %v4257_v4, 3  ;;  %v4530_v37 = vrot.slane %v4254_v24, 3  ;;  %v4531_v11 = vrot.slane %v4257_v4, 4  ;;  %6921 = vmatpush.bf16.msra.mxu1 %v9055_v53 }
 0x383   : > { %v3652_v32 = vmul.f32 %v3615_v38, %v3400_v47  ;;  %4087 = vmatmul.bf16.gmra.mxu1 %v3930_v36  ;;  %v4263_v34 = vshrl.u32 %v3895_v27, 16  ;;  %v4266_v54 = vshll.u32 %v3895_v27, 16  ;;  %v4987_v62 = vor.u32 %v4986_v49, %v4983_v30  ;;  %v9589_v30 = vld [vmem:[#allocation2 + $0x64] sm:$0xff]  }
 0x384   : > { %v4260_v10 = vor.u32 %v4259_v59, %v4256_v50  ;;  %v11802_v55 = vor.u32 %v4531_v11, %v4530_v37  ;;  %v4993_v53 = vshll.u32 %v9589_v30, 16 }
 0x385   : > { %v11800_v57 = vpack.c.bf16 %v3652_v32, %v3651_v15  ;;  %v4265_v7 = vrot.slane %v4263_v34, 2  ;;  %v4268_v47 = vrot.slane %v4266_v54, 3  ;;  %v11818_v54 = vadd.f32 %v11748_v8, %v4708_v60 }
 0x386   : > { %v4348_v18 = vpop.f32.mrf.mxu2  ;;  %v11808_v24 = vsel %vm2653_vm5, %v11734_v46, %v4260_v10  ;;  %v11815_v15 = vsel %vm4457_vm6, %v11738_v23, %v11802_v55  ;;  %v11829_v23 = vld [vmem:[#allocation2 + $0x90] sm:$0xff]  ;;  %v3931_v8 = vrot.slane %v3895_v27, 3  ;;  %v4990_v60 = vshrl.u32 %v9589_v30, 16 }
 0x387   : > { %9404 = vst [vmem:[#allocation2 + $0x98] sm:$0xff] %v11800_v57   ;;  %v4349_v63 = vadd.f32 %v4348_v18, %v11338_v28  ;;  %v4620_v14 = vpop.f32.mrf.mxu3  ;;  %v4269_v38 = vor.u32 %v4268_v47, %v4265_v7  ;;  %v4988_v28 = vsel %vm4457_vm6, %v11736_v43, %v4987_v62  ;;  %v4995_v7 = vrot.slane %v4993_v53, 4 }
 0x388   : > { %v5141_v4 = vpop.f32.mrf.mxu0  ;;  %v11810_v32 = vpop.f32.mrf.mxu1  ;;  %v4992_v18 = vrot.slane %v4990_v60, 3 }
 0x389   : > { %v4709_v36 = vadd.f32 %v4620_v14, %v4349_v63  ;;  %v11823_v46 = vsel %vm2653_vm5, %v4260_v10, %v4269_v38 }
 0x38b   : > { %4390 = vmatmul.bf16.gmra.mxu2 %v11393_v22  ;;  %5180 = vmatmul.bf16.gmra.mxu0 %v4988_v28  ;;  %v11827_v49 = vadd.f32 %v5138_v40, %v4709_v36  ;;  %v11836_v22 = vld [vmem:[#allocation2 + $0xa0] sm:$0xff]  ;;  %v3932_v40 = vsel %vm3046_vm4, %v3929_v29, %v3931_v8  ;;  %v4996_v29 = vor.u32 %v4995_v7, %v4992_v18  ;;  %v9591_v7 = vld [vmem:[#allocation2 + $0x6c] sm:$0xff]  }
 0x38c   : > { %4662 = vmatmul.bf16.gmra.mxu3 %v11400_v42  ;;  %12871 = vst [vmem:[#allocation14_spill] sm:$0xff] %v11836_v22  ;;  %v12783_v42 = vshrl.u32 %v11829_v23, 16  ;;  %v12787_v14 = vshll.u32 %v11836_v22, 16  ;;  %v12786_v38 = vshrl.u32 %v11836_v22, 16 }
 0x38d   : > { %v4997_v18 = vsel %vm4457_vm6, %v4987_v62, %v4996_v29 }
 0x38e   : > { %v4351_v50 = vpop.f32.mrf.mxu2  ;;  %v11832_v37 = vld [vmem:[#allocation2 + $0x98] sm:$0xff]  ;;  %v6834_v36 = vrot.slane %v12783_v42, 1 }
 0x38f   : > { %v4352_v59 = vadd.f32 %v4351_v50, %v11368_v21  ;;  %v4623_v43 = vpop.f32.mrf.mxu3  ;;  %12870 = vst [vmem:[#allocation15_spill] sm:$0xff] %v11832_v37  ;;  %v12788_v21 = vshll.u32 %v11829_v23, 16  ;;  %v12784_v47 = vshrl.u32 %v11832_v37, 16  ;;  %v12785_v63 = vshll.u32 %v11832_v37, 16 }
 0x390   : > { %v5143_v11 = vpop.f32.mrf.mxu0  ;;  %v11834_v34 = vpop.f32.mrf.mxu1 }
 0x391   : > { %v4710_v10 = vadd.f32 %v4623_v43, %v4352_v59  ;;  %v6838_v8 = vrot.slane %v12784_v47, 1  ;;  %v6839_v59 = vrot.slane %v12785_v63, 2  ;;  %v6842_v43 = vrot.slane %v12786_v38, 1 }
 0x393   : > { %4092 = vmatmul.bf16.gmra.mxu1 %v3932_v40  ;;  %v11840_v27 = vadd.f32 %v5141_v4, %v4710_v10  ;;  %v6835_v4 = vrot.slane %v12788_v21, 2  ;;  %v6843_v10 = vrot.slane %v12787_v14, 2  ;;  %v9045_v21 = vld [vmem:[%s12708_s5 + $0x1e8] sm:$0xff] }
 0x395   : > { %v6836_v40 = vor.u32 %v6835_v4, %v6834_v36  ;;  %v11863_v42 = vor.u32 %v6843_v10, %v6842_v43  ;;  %v9013_v36 = vld [vmem:[%s12708_s5 + $0x170] sm:$0xff] }
 0x396   : > { %v4353_v28 = vpop.f32.mrf.mxu2  ;;  %5860 = vmatpush.bf16.msra.mxu2 %v9013_v36  ;;  %v9038_v43 = vld [vmem:[%s12708_s5 + $0x1b0] sm:$0xff] }
 0x397   : > { %v4354_v30 = vadd.f32 %v4353_v28, %v11395_v41  ;;  %v4625_v50 = vpop.f32.mrf.mxu3  ;;  %v6840_v28 = vor.u32 %v6839_v59, %v6838_v8  ;;  %12872 = vst [vmem:[#allocation16_spill] sm:$0xff] %v11863_v42  ;;  %v11870_v63 = vsel %vm1615_vm2, %v11776_v2, %v6836_v40  ;;  %v9405_v10 = vld [vmem:[#allocation2 + $0x10] sm:$0xff]   ;;  %6356 = vmatpush.bf16.msra.mxu3 %v9038_v43 }
 0x398   : > { %v5146_v60 = vpop.f32.mrf.mxu0  ;;  %v11854_v53 = vpop.f32.mrf.mxu1  ;;  %12873 = vst [vmem:[#allocation17_spill] sm:$0xff] %v11870_v63 }
 0x399   : > { %v4711_v41 = vadd.f32 %v4625_v50, %v4354_v30  ;;  %v11877_v62 = vsel %vm1615_vm2, %v6836_v40, %v6840_v28  ;;  %v11881_v30 = vsel %vm1615_vm2, %v6840_v28, %v11863_v42  ;;  %v5002_v50 = vshll.u32 %v9591_v7, 16  ;;  %v9599_v42 = vld [vmem:[#allocation2 + $0x8c] sm:$0xff]  }
 0x39a   : > { %12874 = vst [vmem:[#allocation35_spill] sm:$0xff] %v11877_v62 }
 0x39b   : > { %4395 = vmatmul.bf16.gmra.mxu2 %v11453_v13  ;;  %5185 = vmatmul.bf16.gmra.mxu0 %v4997_v18  ;;  %v11866_v47 = vadd.f32 %v5143_v11, %v4711_v41  ;;  %12875 = vst [vmem:[#allocation36_spill] sm:$0xff] %v11881_v30  ;;  %v4999_v11 = vshrl.u32 %v9591_v7, 16  ;;  %v5004_v40 = vrot.slane %v5002_v50, 4  ;;  %v9593_v50 = vld [vmem:[#allocation2 + $0x74] sm:$0xff]  }
 0x39c   : > { %4667 = vmatmul.bf16.gmra.mxu3 %v11460_v12  ;;  %v5008_v43 = vshrl.u32 %v9593_v50, 16 }
 0x39d   : > { %v5001_v41 = vrot.slane %v4999_v11, 3  ;;  %v9054_v11 = vld [vmem:[%s12708_s5 + $0x230] sm:$0xff] }
 0x39e   : > { %v4356_v13 = vpop.f32.mrf.mxu2  ;;  %6922 = vmatpush.bf16.msra.mxu1 %v9054_v11 }
 0x39f   : > { %v4357_v2 = vadd.f32 %v4356_v13, %v11425_v51  ;;  %v4628_v4 = vpop.f32.mrf.mxu3  ;;  %v5005_v28 = vor.u32 %v5004_v40, %v5001_v41 }
 0x3a0   : > { %v5148_v8 = vpop.f32.mrf.mxu0  ;;  %v11884_v12 = vpop.f32.mrf.mxu1 }
 0x3a1   : > { %v4712_v59 = vadd.f32 %v4628_v4, %v4357_v2  ;;  %v9046_v4 = vld [vmem:[%s12708_s5 + $0x1f0] sm:$0xff] }
 0x3a2   : > { %6615 = vmatpush.bf16.msra.mxu0 %v9046_v4 }
 0x3a3   : > { %5371 = vmatmul.bf16.vlgmr.msrb.gmra.mxu1 %v9405_v10  ;;  %v11889_v18 = vadd.f32 %v5146_v60, %v4712_v59  ;;  %v5006_v60 = vsel %vm4457_vm6, %v4996_v29, %v5005_v28  ;;  %v5011_v10 = vshll.u32 %v9593_v50, 16 }
 0x3a6   : > { %v4358_v7 = vpop.f32.mrf.mxu2  ;;  %6616 = vmatpush.bf16.msra.mxu0 %v9045_v21 }
 0x3a7   : > { %v4359_v51 = vadd.f32 %v4358_v7, %v11455_v44  ;;  %v4630_v36 = vpop.f32.mrf.mxu3 }
 0x3a8   : > { %v5151_v13 = vpop.f32.mrf.mxu0  ;;  %v11892_v38 = vpop.f32.mrf.mxu1 }
 0x3a9   : > { %v4713_v2 = vadd.f32 %v4630_v36, %v4359_v51  ;;  %v11908_v36 = vld [vmem:[#allocation2 + $0x18] sm:$0xff]  }
 0x3ab   : > { %4400 = vmatmul.bf16.gmra.mxu2 %v11510_v6  ;;  %5190 = vmatmul.bf16.gmra.mxu0 %v5006_v60  ;;  %v11902_v44 = vadd.f32 %v5148_v8, %v4713_v2  ;;  %v5010_v6 = vrot.slane %v5008_v43, 3  ;;  %v5013_v60 = vrot.slane %v5011_v10, 4 }
 0x3ac   : > { %4672 = vmatmul.bf16.gmra.mxu3 %v11517_v39 }
 0x3ad   : > { %v5014_v2 = vor.u32 %v5013_v60, %v5010_v6 }
 0x3ae   : > { %v4361_v59 = vpop.f32.mrf.mxu2 }
 0x3af   : > { %v4362_v41 = vadd.f32 %v4361_v59, %v11485_v56  ;;  %v4633_v40 = vpop.f32.mrf.mxu3  ;;  %v5015_v14 = vsel %vm4457_vm6, %v5005_v28, %v5014_v2  ;;  %v9012_v28 = vld [vmem:[%s12708_s5 + $0x168] sm:$0xff] }
 0x3b0   : > { %v5153_v7 = vpop.f32.mrf.mxu0  ;;  %v11906_v51 = vpop.f32.mrf.mxu1  ;;  %5861 = vmatpush.bf16.msra.mxu2 %v9012_v28 }
 0x3b1   : > { %v4714_v29 = vadd.f32 %v4633_v40, %v4362_v41  ;;  %v9595_v41 = vld [vmem:[#allocation2 + $0x7c] sm:$0xff]  }
 0x3b2   : > { %v5017_v10 = vshrl.u32 %v9595_v41, 16  ;;  %v5020_v40 = vshll.u32 %v9595_v41, 16 }
 0x3b3   : > { %5376 = vmatmul.bf16.gmra.mxu1 %v11908_v36  ;;  %v11911_v8 = vadd.f32 %v5151_v13, %v4714_v29 }
 0x3b6   : > { %v4363_v39 = vpop.f32.mrf.mxu2 }
 0x3b7   : > { %v4364_v4 = vadd.f32 %v4363_v39, %v11512_v26  ;;  %v4635_v11 = vpop.f32.mrf.mxu3 }
 0x3b8   : > { %v5156_v50 = vpop.f32.mrf.mxu0  ;;  %v11914_v56 = vpop.f32.mrf.mxu1 }
 0x3b9   : > { %v4715_v59 = vadd.f32 %v4635_v11, %v4364_v4 }
 0x3bb   : > { %4405 = vmatmul.bf16.gmra.mxu2 %v11570_v1  ;;  %5195 = vmatmul.bf16.gmra.mxu0 %v5015_v14  ;;  %v11918_v43 = vadd.f32 %v5153_v7, %v4715_v59  ;;  %v9037_v1 = vld [vmem:[%s12708_s5 + $0x1a8] sm:$0xff]  ;;  %v9407_v14 = vld [vmem:[#allocation2 + $0x20] sm:$0xff]   ;;  %v5022_v7 = vrot.slane %v5020_v40, 4 }
 0x3bc   : > { %4677 = vmatmul.bf16.gmra.mxu3 %v11577_v3  ;;  %v5019_v3 = vrot.slane %v5017_v10, 3  ;;  %v9597_v40 = vld [vmem:[#allocation2 + $0x84] sm:$0xff]  }
 0x3bd   : > { %6357 = vmatpush.bf16.msra.mxu3 %v9037_v1  ;;  %v5026_v28 = vshrl.u32 %v9597_v40, 16  ;;  %v5029_v1 = vshll.u32 %v9597_v40, 16 }
 0x3be   : > { %v4366_v13 = vpop.f32.mrf.mxu2  ;;  %v5023_v11 = vor.u32 %v5022_v7, %v5019_v3 }
 0x3bf   : > { %v4367_v26 = vadd.f32 %v4366_v13, %v11542_v33  ;;  %v4638_v29 = vpop.f32.mrf.mxu3 }
 0x3c0   : > { %v5158_v6 = vpop.f32.mrf.mxu0  ;;  %v11922_v60 = vpop.f32.mrf.mxu1  ;;  %v5024_v10 = vsel %vm4457_vm6, %v5014_v2, %v5023_v11 }
 0x3c1   : > { %v4716_v39 = vadd.f32 %v4638_v29, %v4367_v26 }
 0x3c3   : > { %5381 = vmatmul.bf16.gmra.mxu1 %v9407_v14  ;;  %v11930_v4 = vadd.f32 %v5156_v50, %v4716_v39 }
 0x3c6   : > { %v4368_v33 = vpop.f32.mrf.mxu2 }
 0x3c7   : > { %v4369_v59 = vadd.f32 %v4368_v33, %v11572_v0  ;;  %v4640_v41 = vpop.f32.mrf.mxu3  ;;  %v9053_v0 = vld [vmem:[%s12708_s5 + $0x228] sm:$0xff]  ;;  %v5028_v33 = vrot.slane %v5026_v28, 3 }
 0x3c8   : > { %v5161_v13 = vpop.f32.mrf.mxu0  ;;  %v11933_v26 = vpop.f32.mrf.mxu1  ;;  %6923 = vmatpush.bf16.msra.mxu1 %v9053_v0 }
 0x3c9   : > { %v4717_v29 = vadd.f32 %v4640_v41, %v4369_v59  ;;  %v5031_v59 = vrot.slane %v5029_v1, 4  ;;  %v5035_v1 = vshrl.u32 %v9599_v42, 16 }
 0x3cb   : > { %4410 = vmatmul.bf16.gmra.mxu2 %v11627_v20  ;;  %5200 = vmatmul.bf16.gmra.mxu0 %v5024_v10  ;;  %v11940_v50 = vadd.f32 %v5158_v6, %v4717_v29  ;;  %v9408_v6 = vld [vmem:[#allocation2 + $0x28] sm:$0xff]   ;;  %v5032_v41 = vor.u32 %v5031_v59, %v5028_v33  ;;  %v9409_v59 = vld [vmem:[#allocation2 + $0x30] sm:$0xff]  }
 0x3cc   : > { %4682 = vmatmul.bf16.gmra.mxu3 %v11634_v58 }
 0x3ce   : > { %v4371_v39 = vpop.f32.mrf.mxu2 }
 0x3cf   : > { %v4372_v14 = vadd.f32 %v4371_v39, %v11602_v19  ;;  %v4643_v2 = vpop.f32.mrf.mxu3  ;;  %v5033_v39 = vsel %vm4457_vm6, %v5023_v11, %v5032_v41  ;;  %v5037_v11 = vrot.slane %v5035_v1, 3 }
 0x3d0   : > { %v5163_v3 = vpop.f32.mrf.mxu0  ;;  %v11947_v7 = vpop.f32.mrf.mxu1 }
 0x3d1   : > { %v4718_v20 = vadd.f32 %v4643_v2, %v4372_v14  ;;  %v5038_v14 = vshll.u32 %v9599_v42, 16 }
 0x3d3   : > { %5386 = vmatmul.bf16.gmra.mxu1 %v9408_v6  ;;  %v11949_v58 = vadd.f32 %v5161_v13, %v4718_v20 }
 0x3d6   : > { %v4373_v21 = vpop.f32.mrf.mxu2 }
 0x3d7   : > { %v4374_v29 = vadd.f32 %v4373_v21, %v11629_v5  ;;  %v4645_v10 = vpop.f32.mrf.mxu3  ;;  %v5040_v21 = vrot.slane %v5038_v14, 4  ;;  %v9600_v14 = vld [vmem:[#allocation2 + $0x94] sm:$0xff]  }
 0x3d8   : > { %v5166_v40 = vpop.f32.mrf.mxu0  ;;  %v11952_v0 = vpop.f32.mrf.mxu1 }
 0x3d9   : > { %v4719_v19 = vadd.f32 %v4645_v10, %v4374_v29  ;;  %v11967_v42 = vor.u32 %v5040_v21, %v5037_v11 }
 0x3db   : > { %4415 = vmatmul.bf16.gmra.mxu2 %v11687_v25  ;;  %5205 = vmatmul.bf16.gmra.mxu0 %v5033_v39  ;;  %v11956_v28 = vadd.f32 %v5163_v3, %v4719_v19  ;;  %v9011_v25 = vld [vmem:[%s12708_s5 + $0x160] sm:$0xff]  ;;  %v5042_v1 = vsel %vm4457_vm6, %v5032_v41, %v11967_v42  ;;  %v9043_v41 = vld [vmem:[%s12708_s5 + $0x1d8] sm:$0xff] }
 0x3dc   : > { %4687 = vmatmul.bf16.gmra.mxu3 %v11694_v16  ;;  %5862 = vmatpush.bf16.msra.mxu2 %v9011_v25  ;;  %v9036_v39 = vld [vmem:[%s12708_s5 + $0x1a0] sm:$0xff] }
 0x3dd   : > { %6358 = vmatpush.bf16.msra.mxu3 %v9036_v39  ;;  %v9410_v39 = vld [vmem:[#allocation2 + $0x38] sm:$0xff]  }
 0x3de   : > { %v4376_v13 = vpop.f32.mrf.mxu2 }
 0x3df   : > { %v4377_v5 = vadd.f32 %v4376_v13, %v11659_v45  ;;  %v4648_v2 = vpop.f32.mrf.mxu3  ;;  %v9044_v13 = vld [vmem:[%s12708_s5 + $0x1e0] sm:$0xff] }
 0x3e0   : > { %v5168_v20 = vpop.f32.mrf.mxu0  ;;  %v11960_v6 = vpop.f32.mrf.mxu1  ;;  %6617 = vmatpush.bf16.msra.mxu0 %v9044_v13 }
 0x3e1   : > { %v4720_v33 = vadd.f32 %v4648_v2, %v4377_v5  ;;  %v9010_v5 = vld [vmem:[%s12708_s5 + $0x158] sm:$0xff] }
 0x3e2   : > { %v9035_v2 = vld [vmem:[%s12708_s5 + $0x198] sm:$0xff]  ;;  %5863 = vmatpush.bf16.msra.mxu2 %v9010_v5  ;;  %v4436_v5 = vld [vmem:[#allocation2 + $0x94] sm:$0xf] }
 0x3e3   : > { %5391 = vmatmul.bf16.gmra.mxu1 %v9409_v59  ;;  %v11965_v3 = vadd.f32 %v5166_v40, %v4720_v33  ;;  %v5044_v59 = vshrl.u32 %v9600_v14, 16  ;;  %6359 = vmatpush.bf16.msra.mxu3 %v9035_v2  ;;  %v9033_v2 = vld [vmem:[%s12708_s5 + $0x188] sm:$0xff] }
 0x3e4   : > { %6618 = vmatpush.bf16.msra.mxu0 %v9043_v41  ;;  %v9041_v41 = vld [vmem:[%s12708_s5 + $0x1c8] sm:$0xff] }
 0x3e6   : > { %v4378_v16 = vpop.f32.mrf.mxu2 }
 0x3e7   : > { %v4379_v45 = vadd.f32 %v4378_v16, %v11689_v61  ;;  %v4650_v29 = vpop.f32.mrf.mxu3  ;;  %v9009_v16 = vld [vmem:[%s12708_s5 + $0x150] sm:$0xff] }
 0x3e8   : > { %v5171_v10 = vpop.f32.mrf.mxu0  ;;  %v11970_v19 = vpop.f32.mrf.mxu1  ;;  %5864 = vmatpush.bf16.msra.mxu2 %v9009_v16  ;;  %v9221_v16 = vunpack.c.h.b16 %v11800_v57 }
 0x3e9   : > { %v4721_v40 = vadd.f32 %v4650_v29, %v4379_v45  ;;  %v9034_v45 = vld [vmem:[%s12708_s5 + $0x190] sm:$0xff] }
 0x3ea   : > { %v9042_v29 = vld [vmem:[%s12708_s5 + $0x1d0] sm:$0xff]  ;;  %6360 = vmatpush.bf16.msra.mxu3 %v9034_v45 }
 0x3eb   : > { %4420 = vmatmul.bf16.gmra.mxu2 %v11746_v31  ;;  %5210 = vmatmul.bf16.gmra.mxu0 %v5042_v1  ;;  %v11981_v61 = vadd.f32 %v5168_v20, %v4721_v40  ;;  %v5047_v31 = vshll.u32 %v9600_v14, 16  ;;  %v9052_v40 = vld [vmem:[%s12708_s5 + $0x220] sm:$0xff]  ;;  %v9008_v1 = vld [vmem:[%s12708_s5 + $0x148] sm:$0xff] }
 0x3ec   : > { %4692 = vmatmul.bf16.gmra.mxu3 %v11755_v35  ;;  %6619 = vmatpush.bf16.msra.mxu0 %v9042_v29  ;;  %v9007_v29 = vld [vmem:[%s12708_s5 + $0x140] sm:$0xff] }
 0x3ed   : > { %v5049_v13 = vrot.slane %v5047_v31, 4  ;;  %6924 = vmatpush.bf16.msra.mxu1 %v9052_v40  ;;  %5865 = vmatpush.bf16.msra.mxu2 %v9008_v1  ;;  %v4890_v40 = vpack.c.b16 %v9221_v16, %v9221_v16 }
 0x3ee   : > { %v4381_v33 = vpop.f32.mrf.mxu2  ;;  %6361 = vmatpush.bf16.msra.mxu3 %v9033_v2 }
 0x3ef   : > { %v4382_v20 = vadd.f32 %v4381_v33, %v11719_v52  ;;  %v4653_v35 = vpop.f32.mrf.mxu3  ;;  %v5046_v52 = vrot.slane %v5044_v59, 3 }
 0x3f0   : > { %v5173_v11 = vpop.f32.mrf.mxu0  ;;  %v11994_v21 = vpop.f32.mrf.mxu1  ;;  %6620 = vmatpush.bf16.msra.mxu0 %v9041_v41 }
 0x3f1   : > { %v4722_v25 = vadd.f32 %v4653_v35, %v4382_v20  ;;  %v5050_v59 = vor.u32 %v5049_v13, %v5046_v52  ;;  %v4455_v35 = vunpack.c.l.b16 %v4436_v5  ;;  %5866 = vmatpush.bf16.msra.mxu2 %v9007_v29 }
 0x3f3   : > { %5396 = vmatmul.bf16.gmra.mxu1 %v9410_v39  ;;  %v12011_v14 = vadd.f32 %v5171_v10, %v4722_v25  ;;  %v9032_v39 = vld [vmem:[%s12708_s5 + $0x180] sm:$0xff]  ;;  %v5051_v52 = vsel %vm4457_vm6, %v11967_v42, %v5050_v59  ;;  %v4456_v57 = vpack.c.b16 %v4455_v35, %v4455_v35 }
 0x3f4   : > { %6362 = vmatpush.bf16.msra.mxu3 %v9032_v39 }
 0x3f5   : > { %v4535_v41 = vshrl.u32 %v4456_v57, 16 }
 0x3f6   : > { %v4383_v33 = vpop.f32.mrf.mxu2 }
 0x3f7   : > { %v4384_v31 = vadd.f32 %v4383_v33, %v11750_v9  ;;  %v4655_v20 = vpop.f32.mrf.mxu3  ;;  %v9040_v9 = vld [vmem:[%s12708_s5 + $0x1c0] sm:$0xff]  ;;  %v4538_v33 = vshll.u32 %v4456_v57, 16 }
 0x3f8   : > { %v5176_v10 = vpop.f32.mrf.mxu0  ;;  %v12020_v25 = vpop.f32.mrf.mxu1  ;;  %6621 = vmatpush.bf16.msra.mxu0 %v9040_v9 }
 0x3f9   : > { %v4723_v45 = vadd.f32 %v4655_v20, %v4384_v31  ;;  %v5056_v20 = vshll.u32 %v4890_v40, 16 }
 0x3fb   : > { %4425 = vmatmul.bf16.gmra.mxu2 %v11808_v24  ;;  %5215 = vmatmul.bf16.gmra.mxu0 %v5051_v52  ;;  %v12035_v13 = vadd.f32 %v5173_v11, %v4723_v45  ;;  %v5053_v24 = vshrl.u32 %v4890_v40, 16  ;;  %v9411_v11 = vld [vmem:[#allocation2 + $0x40] sm:$0xff]   ;;  %v4537_v45 = vrot.slane %v4535_v41, 3  ;;  %v5058_v39 = vrot.slane %v5056_v20, 4  ;;  %v8990_v41 = vld [vmem:[#allocation2 + $0x18] sm:$0xff] }
 0x3fc   : > { %4697 = vmatmul.bf16.gmra.mxu3 %v11815_v15  ;;  %v4540_v15 = vrot.slane %v4538_v33, 4 }
 0x3fd   : > { %v5055_v29 = vrot.slane %v5053_v24, 3 }
 0x3fe   : > { %v4386_v1 = vpop.f32.mrf.mxu2 }
 0x3ff   : > { %v4387_v5 = vadd.f32 %v4386_v1, %v11786_v48  ;;  %v4658_v2 = vpop.f32.mrf.mxu3  ;;  %v4541_v1 = vor.u32 %v4540_v15, %v4537_v45  ;;  %v5059_v62 = vor.u32 %v5058_v39, %v5055_v29  ;;  %v5653_v45 = vshll.u32 %v8990_v41, 16 }
 0x400   : > { %v5178_v31 = vpop.f32.mrf.mxu0  ;;  %v12039_v42 = vpop.f32.mrf.mxu1 }
 0x401   : > { %v4724_v35 = vadd.f32 %v4658_v2, %v4387_v5  ;;  %v5060_v40 = vsel %vm4457_vm6, %v5050_v59, %v5059_v62  ;;  %v8989_v2 = vld [vmem:[#allocation2 + $0x10] sm:$0xff]  ;;  %v9412_v59 = vld [vmem:[#allocation2 + $0x48] sm:$0xff]   ;;  %v5655_v39 = vrot.slane %v5653_v45, 1 }
 0x402   : > { %v5646_v29 = vshrl.u32 %v8989_v2, 16 }
 0x403   : > { %5401 = vmatmul.bf16.gmra.mxu1 %v9411_v11  ;;  %v12041_v16 = vadd.f32 %v5176_v10, %v4724_v35  ;;  %v4542_v10 = vsel %vm4457_vm6, %v11802_v55, %v4541_v1  ;;  %v5648_v11 = vshll.u32 %v8989_v2, 16  ;;  %v9051_v55 = vld [vmem:[%s12708_s5 + $0x218] sm:$0xff] }
 0x404   : > { %6925 = vmatpush.bf16.msra.mxu1 %v9051_v55 }
 0x406   : > { %v4388_v9 = vpop.f32.mrf.mxu2 }
 0x407   : > { %v4389_v48 = vadd.f32 %v4388_v9, %v11810_v32  ;;  %v4660_v52 = vpop.f32.mrf.mxu3  ;;  %v9632_v9 = vld [vmem:[#allocation2 + $0x20] sm:$0xff] }
 0x408   : > { %v5181_v57 = vpop.f32.mrf.mxu0  ;;  %v12044_v30 = vpop.f32.mrf.mxu1 }
 0x409   : > { %v4725_v63 = vadd.f32 %v4660_v52, %v4389_v48  ;;  %v6512_v48 = vrot.slane %v9632_v9, 1  ;;  %v8991_v9 = vld [vmem:[#allocation2 + $0x20] sm:$0xff] }
 0x40b   : > { %4430 = vmatmul.bf16.gmra.mxu2 %v11823_v46  ;;  %5220 = vmatmul.bf16.gmra.mxu0 %v5060_v40  ;;  %v12050_v5 = vadd.f32 %v5178_v31, %v4725_v63  ;;  %v6144_v46 = vshll.u32 %v11908_v36, 16  ;;  %v5650_v31 = vrot.slane %v5648_v11, 1  ;;  %v6142_v40 = vshrl.u32 %v11908_v36, 16  ;;  %v12878_v11 = vld [vmem:[#allocation19_spill] sm:$0xff] }
 0x40c   : > { %4702 = vmatmul.bf16.gmra.mxu3 %v4542_v10  ;;  %v12876_v10 = vld [vmem:[#allocation18_spill] sm:$0xff] }
 0x40d   : > { %v6146_v15 = vrot.slane %v6144_v46, 1 }
 0x40e   : > { %v4391_v32 = vpop.f32.mrf.mxu2 }
 0x40f   : > { %v4392_v33 = vadd.f32 %v4391_v32, %v11834_v34  ;;  %v4663_v24 = vpop.f32.mrf.mxu3  ;;  %v12877_v32 = vshll.u32 %v12876_v10, 16  ;;  %v6147_v55 = vor.u32 %v6146_v15, %v6142_v40  ;;  %v5661_v40 = vshll.u32 %v8991_v9, 16 }
 0x410   : > { %v5183_v20 = vpop.f32.mrf.mxu0  ;;  %v12053_v35 = vpop.f32.mrf.mxu1 }
 0x411   : > { %v4726_v62 = vadd.f32 %v4663_v24, %v4392_v33  ;;  %v6151_v33 = vrot.slane %v12877_v32, 1 }
 0x413   : > { %5406 = vmatmul.bf16.gmra.mxu1 %v9412_v59  ;;  %v12059_v63 = vadd.f32 %v5181_v57, %v4726_v62  ;;  %v5651_v57 = vor.u32 %v5650_v31, %v5646_v29  ;;  %v6511_v62 = vrot.slane %v12878_v11, 1 }
 0x415   : > { %v5656_v2 = vsel %vm470_vm0, %v5651_v57, %v5655_v39  ;;  %v6513_v45 = vsel %vm970_vm1, %v6511_v62, %v6512_v48 }
 0x416   : > { %v4393_v34 = vpop.f32.mrf.mxu2 }
 0x417   : > { %v4394_v52 = vadd.f32 %v4393_v34, %v11854_v53  ;;  %v4665_v1 = vpop.f32.mrf.mxu3  ;;  %v6152_v53 = vsel %vm470_vm0, %v6147_v55, %v6151_v33  ;;  %v9633_v55 = vld [vmem:[#allocation2 + $0x28] sm:$0xff] }
 0x418   : > { %v5186_v24 = vpop.f32.mrf.mxu0  ;;  %v12065_v59 = vpop.f32.mrf.mxu1 }
 0x419   : > { %v4727_v46 = vadd.f32 %v4665_v1, %v4394_v52  ;;  %v9413_v1 = vld [vmem:[#allocation2 + $0x50] sm:$0xff]  }
 0x41b   : > { %5867 = vmatmul.bf16.vlgmr.msra.gmra.mxu2 %v5656_v2  ;;  %6622 = vmatmul.bf16.vlgmr.msra.gmra.mxu0 %v6513_v45  ;;  %v12071_v36 = vadd.f32 %v5183_v20, %v4727_v46  ;;  %v5657_v20 = vshrl.u32 %v8990_v41, 16  ;;  %v5663_v46 = vrot.slane %v5661_v40, 1  ;;  %v6514_v2 = vrot.slane %v9633_v55, 1 }
 0x41c   : > { %6363 = vmatmul.bf16.vlgmr.msra.gmra.mxu3 %v6152_v53  ;;  %v12879_v53 = vld [vmem:[#allocation20_spill] sm:$0xff] }
 0x41e   : > { %v4396_v34 = vpop.f32.mrf.mxu2 }
 0x41f   : > { %v4397_v32 = vadd.f32 %v4396_v34, %v11884_v12  ;;  %v4668_v31 = vpop.f32.mrf.mxu3  ;;  %v12880_v34 = vshll.u32 %v12879_v53, 16 }
 0x420   : > { %v5188_v29 = vpop.f32.mrf.mxu0  ;;  %v5372_v11 = vpop.f32.mrf.mxu1 }
 0x421   : > { %v4728_v52 = vadd.f32 %v4668_v31, %v4397_v32  ;;  %v12075_v15 = vadd.f32 %v5372_v11, %v11818_v54  ;;  %v6159_v22 = vrot.slane %v12880_v34, 1  ;;  %v5659_v54 = vor.u32 %v5657_v20, %v5655_v39  ;;  %v8992_v39 = vld [vmem:[#allocation2 + $0x28] sm:$0xff] }
 0x423   : > { %5411 = vmatmul.bf16.gmra.mxu1 %v9413_v1  ;;  %v12077_v57 = vadd.f32 %v5186_v24, %v4728_v52  ;;  %v12881_v24 = vshrl.u32 %v12876_v10, 16  ;;  %v5664_v41 = vsel %vm470_vm0, %v5659_v54, %v5663_v46  ;;  %v6515_v1 = vsel %vm970_vm1, %v6512_v48, %v6514_v2 }
 0x424   : > { %v5669_v48 = vshll.u32 %v8992_v39, 16 }
 0x425   : > { %v6155_v52 = vor.u32 %v12881_v24, %v6151_v33 }
 0x426   : > { %v4398_v62 = vpop.f32.mrf.mxu2  ;;  %v5671_v54 = vrot.slane %v5669_v48, 1 }
 0x427   : > { %v4399_v45 = vadd.f32 %v4398_v62, %v11892_v38  ;;  %v4670_v12 = vpop.f32.mrf.mxu3  ;;  %v6160_v38 = vsel %vm470_vm0, %v6155_v52, %v6159_v22 }
 0x428   : > { %v5191_v32 = vpop.f32.mrf.mxu0  ;;  %v5374_v31 = vpop.f32.mrf.mxu1 }
 0x429   : > { %v4729_v11 = vadd.f32 %v4670_v12, %v4399_v45  ;;  %v12083_v37 = vadd.f32 %v5374_v31, %v11827_v49  ;;  %v9414_v12 = vld [vmem:[#allocation2 + $0x58] sm:$0xff]  }
 0x42b   : > { %5872 = vmatmul.bf16.gmra.mxu2 %v5664_v41  ;;  %6627 = vmatmul.bf16.gmra.mxu0 %v6515_v1  ;;  %v12090_v40 = vadd.f32 %v5188_v29, %v4729_v11  ;;  %v5665_v29 = vshrl.u32 %v8991_v9, 16  ;;  %v9634_v11 = vld [vmem:[#allocation2 + $0x30] sm:$0xff]  ;;  %v12882_v41 = vld [vmem:[#allocation22_spill] sm:$0xff] }
 0x42c   : > { %6368 = vmatmul.bf16.gmra.mxu3 %v6160_v38  ;;  %v6516_v24 = vrot.slane %v9634_v11, 1  ;;  %v12883_v1 = vshll.u32 %v12882_v41, 16  ;;  %v9050_v9 = vld [vmem:[%s12708_s5 + $0x210] sm:$0xff] }
 0x42d   : > { %6926 = vmatpush.bf16.msra.mxu1 %v9050_v9 }
 0x42e   : > { %v4401_v62 = vpop.f32.mrf.mxu2  ;;  %v6167_v38 = vrot.slane %v12883_v1, 1 }
 0x42f   : > { %v4402_v20 = vadd.f32 %v4401_v62, %v11906_v51  ;;  %v4673_v49 = vpop.f32.mrf.mxu3 }
 0x430   : > { %v5193_v55 = vpop.f32.mrf.mxu0  ;;  %v5377_v45 = vpop.f32.mrf.mxu1 }
 0x431   : > { %v4730_v10 = vadd.f32 %v4673_v49, %v4402_v20  ;;  %v12094_v33 = vadd.f32 %v5377_v45, %v11840_v27  ;;  %v5667_v27 = vor.u32 %v5665_v29, %v5663_v46 }
 0x433   : > { %5416 = vmatmul.bf16.gmra.mxu1 %v9414_v12  ;;  %v12096_v34 = vadd.f32 %v5191_v32, %v4730_v10  ;;  %v12884_v32 = vshrl.u32 %v12879_v53, 16  ;;  %v6517_v12 = vsel %vm970_vm1, %v6514_v2, %v6516_v24  ;;  %v9415_v2 = vld [vmem:[#allocation2 + $0x60] sm:$0xff]  }
 0x435   : > { %v6163_v10 = vor.u32 %v12884_v32, %v6159_v22  ;;  %v9635_v32 = vld [vmem:[#allocation2 + $0x38] sm:$0xff] }
 0x436   : > { %v4403_v31 = vpop.f32.mrf.mxu2 }
 0x437   : > { %v4404_v52 = vadd.f32 %v4403_v31, %v11914_v56  ;;  %v4675_v51 = vpop.f32.mrf.mxu3  ;;  %v5672_v56 = vsel %vm470_vm0, %v5667_v27, %v5671_v54  ;;  %v6168_v48 = vsel %vm470_vm0, %v6163_v10, %v6167_v38  ;;  %v8993_v31 = vld [vmem:[#allocation2 + $0x30] sm:$0xff]  ;;  %v5673_v27 = vshrl.u32 %v8992_v39, 16 }
 0x438   : > { %v5196_v62 = vpop.f32.mrf.mxu0  ;;  %v5379_v20 = vpop.f32.mrf.mxu1  ;;  %v5677_v1 = vshll.u32 %v8993_v31, 16  ;;  %v6518_v10 = vrot.slane %v9635_v32, 1 }
 0x439   : > { %v4731_v49 = vadd.f32 %v4675_v51, %v4404_v52  ;;  %v12102_v45 = vadd.f32 %v5379_v20, %v11866_v47 }
 0x43b   : > { %5877 = vmatmul.bf16.gmra.mxu2 %v5672_v56  ;;  %6632 = vmatmul.bf16.gmra.mxu0 %v6517_v12  ;;  %v12112_v46 = vadd.f32 %v5193_v55, %v4731_v49  ;;  %v5679_v49 = vrot.slane %v5677_v1, 1  ;;  %v12885_v56 = vld [vmem:[#allocation24_spill] sm:$0xff] }
 0x43c   : > { %6373 = vmatmul.bf16.gmra.mxu3 %v6168_v48  ;;  %v12886_v12 = vshll.u32 %v12885_v56, 16 }
 0x43e   : > { %v4406_v47 = vpop.f32.mrf.mxu2  ;;  %v6175_v48 = vrot.slane %v12886_v12, 1 }
 0x43f   : > { %v4407_v22 = vadd.f32 %v4406_v47, %v11922_v60  ;;  %v4678_v53 = vpop.f32.mrf.mxu3 }
 0x440   : > { %v5198_v29 = vpop.f32.mrf.mxu0  ;;  %v5382_v11 = vpop.f32.mrf.mxu1 }
 0x441   : > { %v4732_v52 = vadd.f32 %v4678_v53, %v4407_v22  ;;  %v12116_v51 = vadd.f32 %v5382_v11, %v11889_v18  ;;  %v5675_v18 = vor.u32 %v5673_v27, %v5671_v54  ;;  %v8994_v54 = vld [vmem:[#allocation2 + $0x38] sm:$0xff] }
 0x443   : > { %5421 = vmatmul.bf16.gmra.mxu1 %v9415_v2  ;;  %v12118_v20 = vadd.f32 %v5196_v62, %v4732_v52  ;;  %v12887_v62 = vshrl.u32 %v12882_v41, 16  ;;  %v5680_v39 = vsel %vm470_vm0, %v5675_v18, %v5679_v49  ;;  %v6519_v2 = vsel %vm970_vm1, %v6516_v24, %v6518_v10 }
 0x444   : > { %v5685_v24 = vshll.u32 %v8994_v54, 16 }
 0x445   : > { %v6171_v52 = vor.u32 %v12887_v62, %v6167_v38 }
 0x446   : > { %v4408_v55 = vpop.f32.mrf.mxu2  ;;  %v5687_v18 = vrot.slane %v5685_v24, 1 }
 0x447   : > { %v4409_v9 = vadd.f32 %v4408_v55, %v11933_v26  ;;  %v4680_v60 = vpop.f32.mrf.mxu3  ;;  %v6176_v26 = vsel %vm470_vm0, %v6171_v52, %v6175_v48 }
 0x448   : > { %v5201_v47 = vpop.f32.mrf.mxu0  ;;  %v5384_v22 = vpop.f32.mrf.mxu1 }
 0x449   : > { %v4733_v53 = vadd.f32 %v4680_v60, %v4409_v9  ;;  %v12124_v11 = vadd.f32 %v5384_v22, %v11902_v44  ;;  %v9416_v60 = vld [vmem:[#allocation2 + $0x68] sm:$0xff]  }
 0x44b   : > { %5882 = vmatmul.bf16.gmra.mxu2 %v5680_v39  ;;  %6637 = vmatmul.bf16.gmra.mxu0 %v6519_v2  ;;  %v12131_v1 = vadd.f32 %v5198_v29, %v4733_v53  ;;  %v5681_v29 = vshrl.u32 %v8993_v31, 16  ;;  %v9636_v53 = vld [vmem:[#allocation2 + $0x40] sm:$0xff] }
 0x44c   : > { %6378 = vmatmul.bf16.gmra.mxu3 %v6176_v26  ;;  %v6520_v62 = vrot.slane %v9636_v53, 1  ;;  %v12888_v39 = vld [vmem:[#allocation25_spill] sm:$0xff] }
 0x44d   : > { %v12889_v2 = vshll.u32 %v12888_v39, 16 }
 0x44e   : > { %v4411_v55 = vpop.f32.mrf.mxu2 }
 0x44f   : > { %v4412_v27 = vadd.f32 %v4411_v55, %v11947_v7  ;;  %v4683_v44 = vpop.f32.mrf.mxu3  ;;  %v6183_v26 = vrot.slane %v12889_v2, 1 }
 0x450   : > { %v5203_v32 = vpop.f32.mrf.mxu0  ;;  %v5387_v9 = vpop.f32.mrf.mxu1 }
 0x451   : > { %v4734_v41 = vadd.f32 %v4683_v44, %v4412_v27  ;;  %v12135_v38 = vadd.f32 %v5387_v9, %v11911_v8  ;;  %v5683_v8 = vor.u32 %v5681_v29, %v5679_v49  ;;  %v9049_v49 = vld [vmem:[%s12708_s5 + $0x208] sm:$0xff] }
 0x452   : > { %6927 = vmatpush.bf16.msra.mxu1 %v9049_v49 }
 0x453   : > { %5426 = vmatmul.bf16.gmra.mxu1 %v9416_v60  ;;  %v12137_v12 = vadd.f32 %v5201_v47, %v4734_v41  ;;  %v12890_v47 = vshrl.u32 %v12885_v56, 16  ;;  %v5688_v31 = vsel %vm470_vm0, %v5683_v8, %v5687_v18  ;;  %v6521_v60 = vsel %vm970_vm1, %v6518_v10, %v6520_v62 }
 0x454   : > { %v5689_v8 = vshrl.u32 %v8994_v54, 16 }
 0x455   : > { %v6179_v41 = vor.u32 %v12890_v47, %v6175_v48  ;;  %v9637_v47 = vld [vmem:[#allocation2 + $0x48] sm:$0xff] }
 0x456   : > { %v4413_v22 = vpop.f32.mrf.mxu2 }
 0x457   : > { %v4414_v52 = vadd.f32 %v4413_v22, %v11952_v0  ;;  %v4685_v7 = vpop.f32.mrf.mxu3  ;;  %v6184_v0 = vsel %vm470_vm0, %v6179_v41, %v6183_v26  ;;  %v8995_v22 = vld [vmem:[#allocation2 + $0x40] sm:$0xff]  ;;  %v6522_v41 = vrot.slane %v9637_v47, 1 }
 0x458   : > { %v5206_v55 = vpop.f32.mrf.mxu0  ;;  %v5389_v27 = vpop.f32.mrf.mxu1 }
 0x459   : > { %v4735_v44 = vadd.f32 %v4685_v7, %v4414_v52  ;;  %v12143_v9 = vadd.f32 %v5389_v27, %v11918_v43  ;;  %v9417_v7 = vld [vmem:[#allocation2 + $0x70] sm:$0xff]  }
 0x45b   : > { %5887 = vmatmul.bf16.gmra.mxu2 %v5688_v31  ;;  %6642 = vmatmul.bf16.gmra.mxu0 %v6521_v60  ;;  %v12150_v24 = vadd.f32 %v5203_v32, %v4735_v44  ;;  %v5693_v32 = vshll.u32 %v8995_v22, 16  ;;  %v12891_v60 = vld [vmem:[#allocation26_spill] sm:$0xff] }
 0x45c   : > { %6383 = vmatmul.bf16.gmra.mxu3 %v6184_v0  ;;  %v12892_v0 = vshll.u32 %v12891_v60, 16 }
 0x45d   : > { %v5695_v44 = vrot.slane %v5693_v32, 1 }
 0x45e   : > { %v4416_v43 = vpop.f32.mrf.mxu2  ;;  %v6191_v49 = vrot.slane %v12892_v0, 1 }
 0x45f   : > { %v4417_v56 = vadd.f32 %v4416_v43, %v11960_v6  ;;  %v4688_v48 = vpop.f32.mrf.mxu3 }
 0x460   : > { %v5208_v29 = vpop.f32.mrf.mxu0  ;;  %v5392_v53 = vpop.f32.mrf.mxu1 }
 0x461   : > { %v4736_v10 = vadd.f32 %v4688_v48, %v4417_v56  ;;  %v12157_v52 = vadd.f32 %v5392_v53, %v11930_v4  ;;  %v5691_v4 = vor.u32 %v5689_v8, %v5687_v18  ;;  %v8996_v18 = vld [vmem:[#allocation2 + $0x48] sm:$0xff] }
 0x463   : > { %5431 = vmatmul.bf16.gmra.mxu1 %v9417_v7  ;;  %v12159_v2 = vadd.f32 %v5206_v55, %v4736_v10  ;;  %v12893_v55 = vshrl.u32 %v12888_v39, 16  ;;  %v5696_v54 = vsel %vm470_vm0, %v5691_v4, %v5695_v44  ;;  %v6523_v7 = vsel %vm970_vm1, %v6520_v62, %v6522_v41 }
 0x464   : > { %v5701_v62 = vshll.u32 %v8996_v18, 16 }
 0x465   : > { %v6187_v10 = vor.u32 %v12893_v55, %v6183_v26 }
 0x466   : > { %v4418_v27 = vpop.f32.mrf.mxu2  ;;  %v5703_v4 = vrot.slane %v5701_v62, 1 }
 0x467   : > { %v4419_v31 = vadd.f32 %v4418_v27, %v11970_v19  ;;  %v4690_v6 = vpop.f32.mrf.mxu3  ;;  %v6192_v19 = vsel %vm470_vm0, %v6187_v10, %v6191_v49 }
 0x468   : > { %v5211_v43 = vpop.f32.mrf.mxu0  ;;  %v5394_v56 = vpop.f32.mrf.mxu1 }
 0x469   : > { %v4737_v48 = vadd.f32 %v4690_v6, %v4419_v31  ;;  %v12165_v53 = vadd.f32 %v5394_v56, %v11940_v50  ;;  %v9418_v6 = vld [vmem:[#allocation2 + $0x78] sm:$0xff]  }
 0x46b   : > { %5892 = vmatmul.bf16.gmra.mxu2 %v5696_v54  ;;  %6647 = vmatmul.bf16.gmra.mxu0 %v6523_v7  ;;  %v12172_v32 = vadd.f32 %v5208_v29, %v4737_v48  ;;  %v5697_v29 = vshrl.u32 %v8995_v22, 16  ;;  %v9638_v48 = vld [vmem:[#allocation2 + $0x50] sm:$0xff] }
 0x46c   : > { %6388 = vmatmul.bf16.gmra.mxu3 %v6192_v19  ;;  %v6524_v55 = vrot.slane %v9638_v48, 1  ;;  %v12894_v54 = vld [vmem:[#allocation28_spill] sm:$0xff] }
 0x46d   : > { %v12895_v7 = vshll.u32 %v12894_v54, 16 }
 0x46e   : > { %v4421_v27 = vpop.f32.mrf.mxu2 }
 0x46f   : > { %v4422_v8 = vadd.f32 %v4421_v27, %v11994_v21  ;;  %v4693_v50 = vpop.f32.mrf.mxu3  ;;  %v6199_v19 = vrot.slane %v12895_v7, 1 }
 0x470   : > { %v5213_v47 = vpop.f32.mrf.mxu0  ;;  %v5397_v31 = vpop.f32.mrf.mxu1 }
 0x471   : > { %v4738_v39 = vadd.f32 %v4693_v50, %v4422_v8  ;;  %v12176_v26 = vadd.f32 %v5397_v31, %v11949_v58  ;;  %v5699_v58 = vor.u32 %v5697_v29, %v5695_v44  ;;  %v8997_v44 = vld [vmem:[#allocation2 + $0x50] sm:$0xff] }
 0x472   : > { %v5709_v7 = vshll.u32 %v8997_v44, 16 }
 0x473   : > { %5436 = vmatmul.bf16.gmra.mxu1 %v9418_v6  ;;  %v12178_v0 = vadd.f32 %v5211_v43, %v4738_v39  ;;  %v12896_v43 = vshrl.u32 %v12891_v60, 16  ;;  %v5704_v22 = vsel %vm470_vm0, %v5699_v58, %v5703_v4  ;;  %v6525_v6 = vsel %vm970_vm1, %v6522_v41, %v6524_v55  ;;  %v9048_v41 = vld [vmem:[%s12708_s5 + $0x200] sm:$0xff] }
 0x474   : > { %6928 = vmatpush.bf16.msra.mxu1 %v9048_v41  ;;  %v5705_v58 = vshrl.u32 %v8996_v18, 16 }
 0x475   : > { %v6195_v39 = vor.u32 %v12896_v43, %v6191_v49 }
 0x476   : > { %v4423_v56 = vpop.f32.mrf.mxu2 }
 0x477   : > { %v4424_v10 = vadd.f32 %v4423_v56, %v12020_v25  ;;  %v4695_v21 = vpop.f32.mrf.mxu3  ;;  %v6200_v25 = vsel %vm470_vm0, %v6195_v39, %v6199_v19 }
 0x478   : > { %v5216_v27 = vpop.f32.mrf.mxu0  ;;  %v5399_v8 = vpop.f32.mrf.mxu1 }
 0x479   : > { %v4739_v50 = vadd.f32 %v4695_v21, %v4424_v10  ;;  %v12184_v31 = vadd.f32 %v5399_v8, %v11956_v28  ;;  %v9419_v21 = vld [vmem:[#allocation2 + $0x80] sm:$0xff]  }
 0x47b   : > { %5897 = vmatmul.bf16.gmra.mxu2 %v5704_v22  ;;  %6652 = vmatmul.bf16.gmra.mxu0 %v6525_v6  ;;  %v12191_v62 = vadd.f32 %v5213_v47, %v4739_v50  ;;  %v9639_v50 = vld [vmem:[#allocation2 + $0x58] sm:$0xff] }
 0x47c   : > { %6393 = vmatmul.bf16.gmra.mxu3 %v6200_v25  ;;  %v6526_v43 = vrot.slane %v9639_v50, 1 }
 0x47e   : > { %v4426_v56 = vpop.f32.mrf.mxu2  ;;  %v6527_v41 = vsel %vm970_vm1, %v6524_v55, %v6526_v43 }
 0x47f   : > { %v4427_v29 = vadd.f32 %v4426_v56, %v12039_v42  ;;  %v4698_v28 = vpop.f32.mrf.mxu3  ;;  %v5711_v42 = vrot.slane %v5709_v7, 1 }
 0x480   : > { %v5218_v48 = vpop.f32.mrf.mxu0  ;;  %v5402_v10 = vpop.f32.mrf.mxu1 }
 0x481   : > { %v4740_v60 = vadd.f32 %v4698_v28, %v4427_v29  ;;  %v12195_v49 = vadd.f32 %v5402_v10, %v11965_v3  ;;  %v12897_v3 = vld [vmem:[#allocation30_spill] sm:$0xff]  ;;  %v5707_v28 = vor.u32 %v5705_v58, %v5703_v4  ;;  %v8998_v4 = vld [vmem:[#allocation2 + $0x58] sm:$0xff] }
 0x482   : > { %v12898_v6 = vshll.u32 %v12897_v3, 16  ;;  %v5717_v55 = vshll.u32 %v8998_v4, 16 }
 0x483   : > { %5441 = vmatmul.bf16.gmra.mxu1 %v9419_v21  ;;  %v12200_v47 = vadd.f32 %v5216_v27, %v4740_v60  ;;  %v12899_v27 = vshrl.u32 %v12894_v54, 16  ;;  %v5712_v18 = vsel %vm470_vm0, %v5707_v28, %v5711_v42 }
 0x484   : > { %v6207_v25 = vrot.slane %v12898_v6, 1  ;;  %v5719_v28 = vrot.slane %v5717_v55, 1 }
 0x485   : > { %v6203_v60 = vor.u32 %v12899_v27, %v6199_v19 }
 0x486   : > { %v4428_v8 = vpop.f32.mrf.mxu2 }
 0x487   : > { %v4429_v39 = vadd.f32 %v4428_v8, %v12044_v30  ;;  %v4700_v22 = vpop.f32.mrf.mxu3  ;;  %v6208_v30 = vsel %vm470_vm0, %v6203_v60, %v6207_v25 }
 0x488   : > { %v5221_v56 = vpop.f32.mrf.mxu0  ;;  %v5404_v29 = vpop.f32.mrf.mxu1 }
 0x489   : > { %v4741_v10 = vadd.f32 %v4700_v22, %v4429_v39  ;;  %v12206_v21 = vadd.f32 %v5404_v29, %v11981_v61  ;;  %v9420_v22 = vld [vmem:[#allocation2 + $0x88] sm:$0xff]  }
 0x48b   : > { %5902 = vmatmul.bf16.gmra.mxu2 %v5712_v18  ;;  %6657 = vmatmul.bf16.gmra.mxu0 %v6527_v41  ;;  %v12213_v7 = vadd.f32 %v5218_v48, %v4741_v10  ;;  %v5713_v48 = vshrl.u32 %v8997_v44, 16  ;;  %v9640_v10 = vld [vmem:[#allocation2 + $0x60] sm:$0xff]  ;;  %v12900_v18 = vld [vmem:[#allocation32_spill] sm:$0xff] }
 0x48c   : > { %6398 = vmatmul.bf16.gmra.mxu3 %v6208_v30  ;;  %v6528_v27 = vrot.slane %v9640_v10, 1  ;;  %v12901_v41 = vshll.u32 %v12900_v18, 16 }
 0x48e   : > { %v4431_v8 = vpop.f32.mrf.mxu2  ;;  %v6215_v30 = vrot.slane %v12901_v41, 1 }
 0x48f   : > { %v4432_v58 = vadd.f32 %v4431_v8, %v12053_v35  ;;  %v4703_v61 = vpop.f32.mrf.mxu3 }
 0x490   : > { %v5223_v50 = vpop.f32.mrf.mxu0  ;;  %v5407_v39 = vpop.f32.mrf.mxu1 }
 0x491   : > { %v4742_v54 = vadd.f32 %v4703_v61, %v4432_v58  ;;  %v12217_v19 = vadd.f32 %v5407_v39, %v12011_v14  ;;  %v5715_v14 = vor.u32 %v5713_v48, %v5711_v42  ;;  %v8999_v42 = vld [vmem:[#allocation2 + $0x60] sm:$0xff] }
 0x493   : > { %5446 = vmatmul.bf16.gmra.mxu1 %v9420_v22  ;;  %v12219_v6 = vadd.f32 %v5221_v56, %v4742_v54  ;;  %v12902_v56 = vshrl.u32 %v12897_v3, 16  ;;  %v5720_v44 = vsel %vm470_vm0, %v5715_v14, %v5719_v28  ;;  %v6529_v22 = vsel %vm970_vm1, %v6526_v43, %v6528_v27 }
 0x494   : > { %v5725_v43 = vshll.u32 %v8999_v42, 16 }
 0x495   : > { %v6211_v54 = vor.u32 %v12902_v56, %v6207_v25 }
 0x496   : > { %v4433_v29 = vpop.f32.mrf.mxu2  ;;  %v5727_v14 = vrot.slane %v5725_v43, 1 }
 0x497   : > { %v4434_v60 = vadd.f32 %v4433_v29, %v12065_v59  ;;  %v4705_v35 = vpop.f32.mrf.mxu3  ;;  %v6216_v59 = vsel %vm470_vm0, %v6211_v54, %v6215_v30 }
 0x498   : > { %v6623_v8 = vpop.f32.mrf.mxu0  ;;  %v5409_v58 = vpop.f32.mrf.mxu1 }
 0x499   : > { %v4743_v61 = vadd.f32 %v4705_v35, %v4434_v60  ;;  %v12225_v39 = vadd.f32 %v5409_v58, %v12035_v13  ;;  %v9421_v35 = vld [vmem:[#allocation2 + $0x90] sm:$0xff]  }
 0x49b   : > { %5907 = vmatmul.bf16.gmra.mxu2 %v5720_v44  ;;  %6662 = vmatmul.bf16.gmra.mxu0 %v6529_v22  ;;  %v12232_v55 = vadd.f32 %v5223_v50, %v4743_v61  ;;  %v5721_v50 = vshrl.u32 %v8998_v4, 16  ;;  %v9641_v61 = vld [vmem:[#allocation2 + $0x68] sm:$0xff]  ;;  %v12903_v44 = vld [vmem:[#allocation33_spill] sm:$0xff] }
 0x49c   : > { %6403 = vmatmul.bf16.gmra.mxu3 %v6216_v59  ;;  %v6530_v56 = vrot.slane %v9641_v61, 1  ;;  %v12904_v22 = vshll.u32 %v12903_v44, 16 }
 0x49e   : > { %v5868_v29 = vpop.f32.mrf.mxu2  ;;  %v6223_v59 = vrot.slane %v12904_v22, 1 }
 0x49f   : > { %v5958_v48 = vadd.f32 %v5868_v29, %v12075_v15  ;;  %v6364_v13 = vpop.f32.mrf.mxu3 }
 0x4a0   : > { %v6625_v10 = vpop.f32.mrf.mxu0  ;;  %v5412_v60 = vpop.f32.mrf.mxu1 }
 0x4a1   : > { %v6454_v3 = vadd.f32 %v6364_v13, %v5958_v48  ;;  %v12236_v25 = vadd.f32 %v5412_v60, %v12041_v16  ;;  %v5723_v16 = vor.u32 %v5721_v50, %v5719_v28  ;;  %v9000_v28 = vld [vmem:[#allocation2 + $0x68] sm:$0xff] }
 0x4a3   : > { %5451 = vmatmul.bf16.gmra.mxu1 %v9421_v35  ;;  %v12238_v41 = vadd.f32 %v6623_v8, %v6454_v3  ;;  %v12905_v8 = vshrl.u32 %v12900_v18, 16  ;;  %v5728_v4 = vsel %vm470_vm0, %v5723_v16, %v5727_v14  ;;  %v6531_v35 = vsel %vm970_vm1, %v6528_v27, %v6530_v56  ;;  %v9642_v27 = vld [vmem:[#allocation2 + $0x98] sm:$0xff] }
 0x4a5   : > { %v6219_v3 = vor.u32 %v12905_v8, %v6215_v30 }
 0x4a6   : > { %v5870_v58 = vpop.f32.mrf.mxu2 }
 0x4a7   : > { %v5959_v54 = vadd.f32 %v5870_v58, %v12083_v37  ;;  %v6366_v15 = vpop.f32.mrf.mxu3  ;;  %v6224_v37 = vsel %vm470_vm0, %v6219_v3, %v6223_v59 }
 0x4a8   : > { %v6628_v29 = vpop.f32.mrf.mxu0  ;;  %v5414_v48 = vpop.f32.mrf.mxu1 }
 0x4a9   : > { %v6455_v13 = vadd.f32 %v6366_v15, %v5959_v54  ;;  %v12244_v60 = vadd.f32 %v5414_v48, %v12050_v5  ;;  %v5733_v15 = vshll.u32 %v9000_v28, 16 }
 0x4ab   : > { %5912 = vmatmul.bf16.gmra.mxu2 %v5728_v4  ;;  %6667 = vmatmul.bf16.gmra.mxu0 %v6531_v35  ;;  %v12251_v43 = vadd.f32 %v6625_v10, %v6455_v13  ;;  %v5729_v10 = vshrl.u32 %v8999_v42, 16  ;;  %v5735_v16 = vrot.slane %v5733_v15, 1  ;;  %v9643_v13 = vld [vmem:[#allocation2 + $0x70] sm:$0xff]  ;;  %v12906_v4 = vld [vmem:[#allocation34_spill] sm:$0xff] }
 0x4ac   : > { %6408 = vmatmul.bf16.gmra.mxu3 %v6224_v37  ;;  %v6532_v8 = vrot.slane %v9643_v13, 1  ;;  %v12907_v35 = vshll.u32 %v12906_v4, 16 }
 0x4ae   : > { %v5873_v58 = vpop.f32.mrf.mxu2  ;;  %v6231_v37 = vrot.slane %v12907_v35, 1  ;;  %v6533_v15 = vsel %vm970_vm1, %v6530_v56, %v6532_v8  ;;  %v12909_v56 = vld [vmem:[#allocation21_spill] sm:$0xff] }
 0x4af   : > { %v5960_v50 = vadd.f32 %v5873_v58, %v12094_v33  ;;  %v6369_v5 = vpop.f32.mrf.mxu3 }
 0x4b0   : > { %v6630_v61 = vpop.f32.mrf.mxu0  ;;  %v5417_v54 = vpop.f32.mrf.mxu1 }
 0x4b1   : > { %v6456_v18 = vadd.f32 %v6369_v5, %v5960_v50  ;;  %v12255_v30 = vadd.f32 %v5417_v54, %v12059_v63  ;;  %v5731_v63 = vor.u32 %v5729_v10, %v5727_v14  ;;  %v9001_v14 = vld [vmem:[#allocation2 + $0x70] sm:$0xff] }
 0x4b3   : > { %5456 = vmatmul.bf16.gmra.mxu1 %v9642_v27  ;;  %v12257_v22 = vadd.f32 %v6628_v29, %v6456_v18  ;;  %v12908_v29 = vshrl.u32 %v12903_v44, 16  ;;  %v5736_v42 = vsel %vm470_vm0, %v5731_v63, %v5735_v16 }
 0x4b5   : > { %v6227_v18 = vor.u32 %v12908_v29, %v6223_v59 }
 0x4b6   : > { %v5875_v48 = vpop.f32.mrf.mxu2 }
 0x4b7   : > { %v5961_v3 = vadd.f32 %v5875_v48, %v12102_v45  ;;  %v6371_v33 = vpop.f32.mrf.mxu3  ;;  %v6232_v45 = vsel %vm470_vm0, %v6227_v18, %v6231_v37 }
 0x4b8   : > { %v6633_v58 = vpop.f32.mrf.mxu0  ;;  %v5419_v50 = vpop.f32.mrf.mxu1 }
 0x4b9   : > { %v6457_v5 = vadd.f32 %v6371_v33, %v5961_v3  ;;  %v12263_v54 = vadd.f32 %v5419_v50, %v12071_v36  ;;  %v5741_v33 = vshll.u32 %v9001_v14, 16 }
 0x4bb   : > { %5917 = vmatmul.bf16.gmra.mxu2 %v5736_v42  ;;  %6672 = vmatmul.bf16.gmra.mxu0 %v6533_v15  ;;  %v12270_v27 = vadd.f32 %v6630_v61, %v6457_v5  ;;  %v5737_v61 = vshrl.u32 %v9000_v28, 16  ;;  %v5743_v63 = vrot.slane %v5741_v33, 1  ;;  %v9644_v5 = vld [vmem:[#allocation2 + $0x78] sm:$0xff] }
 0x4bc   : > { %6413 = vmatmul.bf16.gmra.mxu3 %v6232_v45  ;;  %v6534_v29 = vrot.slane %v9644_v5, 1  ;;  %v12910_v42 = vld [vmem:[#allocation8_spill] sm:$0xff] }
 0x4bd   : > { %v12911_v15 = vshll.u32 %v12910_v42, 16 }
 0x4be   : > { %v5878_v48 = vpop.f32.mrf.mxu2  ;;  %v6535_v33 = vsel %vm970_vm1, %v6532_v8, %v6534_v29  ;;  %v12913_v8 = vld [vmem:[#allocation23_spill] sm:$0xff] }
 0x4bf   : > { %v5962_v10 = vadd.f32 %v5878_v48, %v12116_v51  ;;  %v6374_v36 = vpop.f32.mrf.mxu3  ;;  %v6239_v45 = vrot.slane %v12911_v15, 1 }
 0x4c0   : > { %v6635_v13 = vpop.f32.mrf.mxu0  ;;  %v5422_v3 = vpop.f32.mrf.mxu1 }
 0x4c1   : > { %v6458_v44 = vadd.f32 %v6374_v36, %v5962_v10  ;;  %v12274_v59 = vadd.f32 %v5422_v3, %v12077_v57  ;;  %v5739_v57 = vor.u32 %v5737_v61, %v5735_v16  ;;  %v9002_v16 = vld [vmem:[#allocation2 + $0x78] sm:$0xff] }
 0x4c3   : > { %6929 = vmatmul.bf16.vlgmr.msra.gmra.mxu1 %v12909_v56  ;;  %v12277_v35 = vadd.f32 %v6633_v58, %v6458_v44  ;;  %v12912_v58 = vshrl.u32 %v12906_v4, 16  ;;  %v5744_v28 = vsel %vm470_vm0, %v5739_v57, %v5743_v63 }
 0x4c5   : > { %v6235_v44 = vor.u32 %v12912_v58, %v6231_v37 }
 0x4c6   : > { %v5880_v50 = vpop.f32.mrf.mxu2 }
 0x4c7   : > { %v5963_v18 = vadd.f32 %v5880_v50, %v12124_v11  ;;  %v6376_v51 = vpop.f32.mrf.mxu3  ;;  %v6240_v11 = vsel %vm470_vm0, %v6235_v44, %v6239_v45 }
 0x4c8   : > { %v6638_v48 = vpop.f32.mrf.mxu0  ;;  %v5424_v10 = vpop.f32.mrf.mxu1 }
 0x4c9   : > { %v6459_v36 = vadd.f32 %v6376_v51, %v5963_v18  ;;  %v12283_v3 = vadd.f32 %v5424_v10, %v12090_v40  ;;  %v5749_v51 = vshll.u32 %v9002_v16, 16 }
 0x4cb   : > { %5922 = vmatmul.bf16.gmra.mxu2 %v5744_v28  ;;  %6677 = vmatmul.bf16.gmra.mxu0 %v6535_v33  ;;  %v12290_v56 = vadd.f32 %v6635_v13, %v6459_v36  ;;  %v5745_v13 = vshrl.u32 %v9001_v14, 16  ;;  %v5751_v57 = vrot.slane %v5749_v51, 1  ;;  %v9645_v36 = vld [vmem:[#allocation2 + $0x80] sm:$0xff]  ;;  %v12914_v28 = vshll.u32 %v11663_v17, 16 }
 0x4cc   : > { %6418 = vmatmul.bf16.gmra.mxu3 %v6240_v11  ;;  %v6536_v58 = vrot.slane %v9645_v36, 1 }
 0x4cd   : > { %v6247_v33 = vrot.slane %v12914_v28, 1  ;;  %v5753_v28 = vshrl.u32 %v9002_v16, 16 }
 0x4ce   : > { %v5883_v50 = vpop.f32.mrf.mxu2 }
 0x4cf   : > { %v5964_v61 = vadd.f32 %v5883_v50, %v12135_v38  ;;  %v6379_v40 = vpop.f32.mrf.mxu3 }
 0x4d0   : > { %v5427_v5 = vpop.f32.mrf.mxu1  ;;  %v6640_v37 = vpop.f32.mrf.mxu0 }
 0x4d1   : > { %v6460_v18 = vadd.f32 %v6379_v40, %v5964_v61  ;;  %v12294_v4 = vadd.f32 %v5427_v5, %v12096_v34  ;;  %v5747_v34 = vor.u32 %v5745_v13, %v5743_v63  ;;  %v6537_v5 = vsel %vm970_vm1, %v6534_v29, %v6536_v58  ;;  %v12916_v29 = vld [vmem:[#allocation4_spill] sm:$0xff] }
 0x4d3   : > { %6934 = vmatmul.bf16.gmra.mxu1 %v12913_v8  ;;  %v12297_v15 = vadd.f32 %v6638_v48, %v6460_v18  ;;  %v12915_v48 = vshrl.u32 %v12910_v42, 16  ;;  %v5752_v14 = vsel %vm470_vm0, %v5747_v34, %v5751_v57  ;;  %v9003_v8 = vld [vmem:[#allocation2 + $0x80] sm:$0xff]  ;;  %v9646_v34 = vld [vmem:[#allocation2 + $0x88] sm:$0xff] }
 0x4d4   : > { %v5757_v36 = vshll.u32 %v9003_v8, 16 }
 0x4d5   : > { %v6243_v40 = vor.u32 %v12915_v48, %v6239_v45 }
 0x4d6   : > { %v5885_v10 = vpop.f32.mrf.mxu2 }
 0x4d7   : > { %v5965_v44 = vadd.f32 %v5885_v10, %v12143_v9  ;;  %v6381_v38 = vpop.f32.mrf.mxu3  ;;  %v6248_v9 = vsel %vm470_vm0, %v6243_v40, %v6247_v33  ;;  %v12917_v40 = vld [vmem:[#allocation10_spill] sm:$0xff] }
 0x4d8   : > { %v5429_v11 = vpop.f32.mrf.mxu1  ;;  %v6643_v51 = vpop.f32.mrf.mxu0 }
 0x4d9   : > { %v6461_v50 = vadd.f32 %v6381_v38, %v5965_v44  ;;  %v12303_v61 = vadd.f32 %v5429_v11, %v12112_v46  ;;  %v5759_v11 = vrot.slane %v5757_v36, 1 }
 0x4db   : > { %5927 = vmatmul.bf16.gmra.mxu2 %v5752_v14  ;;  %6682 = vmatmul.bf16.gmra.mxu0 %v6537_v5  ;;  %v12310_v18 = vadd.f32 %v6640_v37, %v6461_v50  ;;  %v6538_v50 = vrot.slane %v9646_v34, 1  ;;  %v12918_v14 = vshll.u32 %v12917_v40, 16 }
 0x4dc   : > { %6423 = vmatmul.bf16.gmra.mxu3 %v6248_v9 }
 0x4dd   : > { %v6255_v5 = vrot.slane %v12918_v14, 1 }
 0x4de   : > { %v5888_v63 = vpop.f32.mrf.mxu2 }
 0x4df   : > { %v5966_v46 = vadd.f32 %v5888_v63, %v12157_v52  ;;  %v6384_v10 = vpop.f32.mrf.mxu3 }
 0x4e0   : > { %v5432_v13 = vpop.f32.mrf.mxu1  ;;  %v6645_v38 = vpop.f32.mrf.mxu0 }
 0x4e1   : > { %v6462_v42 = vadd.f32 %v6384_v10, %v5966_v46  ;;  %v12314_v45 = vadd.f32 %v5432_v13, %v12118_v20  ;;  %v5755_v20 = vor.u32 %v5753_v28, %v5751_v57  ;;  %v6539_v13 = vsel %vm970_vm1, %v6536_v58, %v6538_v50  ;;  %v9004_v57 = vld [vmem:[#allocation2 + $0x88] sm:$0xff] }
 0x4e2   : > { %v5765_v34 = vshll.u32 %v9004_v57, 16  ;;  %v12920_v58 = vld [vmem:[#allocation3_spill] sm:$0xff] }
 0x4e3   : > { %6939 = vmatmul.bf16.gmra.mxu1 %v12916_v29  ;;  %v12317_v44 = vadd.f32 %v6643_v51, %v6462_v42  ;;  %v12919_v51 = vshrl.u32 %v11663_v17, 16  ;;  %v5760_v16 = vsel %vm470_vm0, %v5755_v20, %v5759_v11 }
 0x4e4   : > { %v5767_v14 = vrot.slane %v5765_v34, 1 }
 0x4e5   : > { %v6251_v10 = vor.u32 %v12919_v51, %v6247_v33 }
 0x4e6   : > { %v5890_v37 = vpop.f32.mrf.mxu2 }
 0x4e7   : > { %v5967_v48 = vadd.f32 %v5890_v37, %v12165_v53  ;;  %v6386_v52 = vpop.f32.mrf.mxu3  ;;  %v6256_v53 = vsel %vm470_vm0, %v6251_v10, %v6255_v5 }
 0x4e8   : > { %v5434_v9 = vpop.f32.mrf.mxu1  ;;  %v6648_v37 = vpop.f32.mrf.mxu0 }
 0x4e9   : > { %v6463_v63 = vadd.f32 %v6386_v52, %v5967_v48  ;;  %v12323_v46 = vadd.f32 %v5434_v9, %v12131_v1  ;;  %v9647_v9 = vld [vmem:[#allocation2 + $0x90] sm:$0xff] }
 0x4ea   : > { %v6540_v20 = vrot.slane %v9647_v9, 1 }
 0x4eb   : > { %5932 = vmatmul.bf16.gmra.mxu2 %v5760_v16  ;;  %6687 = vmatmul.bf16.gmra.mxu0 %v6539_v13  ;;  %v12330_v42 = vadd.f32 %v6645_v38, %v6463_v63  ;;  %v5761_v38 = vshrl.u32 %v9003_v8, 16 }
 0x4ec   : > { %6428 = vmatmul.bf16.gmra.mxu3 %v6256_v53 }
 0x4ed   : > { %v5763_v13 = vor.u32 %v5761_v38, %v5759_v11  ;;  %v9005_v11 = vld [vmem:[#allocation2 + $0x90] sm:$0xff] }
 0x4ee   : > { %v5893_v36 = vpop.f32.mrf.mxu2  ;;  %v5773_v34 = vshll.u32 %v9005_v11, 16 }
 0x4ef   : > { %v5968_v29 = vadd.f32 %v5893_v36, %v12176_v26  ;;  %v6389_v1 = vpop.f32.mrf.mxu3  ;;  %v12921_v26 = vshll.u32 %v11829_v23, 16  ;;  %v12922_v36 = vshrl.u32 %v12917_v40, 16  ;;  %v5768_v8 = vsel %vm470_vm0, %v5763_v13, %v5767_v14  ;;  %v12923_v40 = vld [vmem:[#allocation5_spill] sm:$0xff] }
 0x4f0   : > { %v5437_v28 = vpop.f32.mrf.mxu1  ;;  %v12926_v13 = vshrl.u32 %v11829_v23, 16 }
 0x4f1   : > { %v6464_v17 = vadd.f32 %v6389_v1, %v5968_v29  ;;  %v12334_v33 = vadd.f32 %v5437_v28, %v12137_v12  ;;  %v6263_v51 = vrot.slane %v12921_v26, 1  ;;  %v6259_v29 = vor.u32 %v12922_v36, %v6255_v5  ;;  %v6650_v1 = vpop.f32.mrf.mxu0 }
 0x4f2   : > { %v5769_v5 = vshrl.u32 %v9004_v57, 16 }
 0x4f3   : > { %6944 = vmatmul.bf16.gmra.mxu1 %v12920_v58  ;;  %v12337_v48 = vadd.f32 %v6648_v37, %v6464_v17  ;;  %v6541_v37 = vsel %vm970_vm1, %v6538_v50, %v6540_v20  ;;  %v5775_v58 = vrot.slane %v5773_v34, 1  ;;  %v12924_v50 = vld [vmem:[#allocation15_spill] sm:$0xff] }
 0x4f4   : > { %v12925_v9 = vshll.u32 %v12924_v50, 16 }
 0x4f6   : > { %v5895_v52 = vpop.f32.mrf.mxu2 }
 0x4f7   : > { %v5969_v63 = vadd.f32 %v5895_v52, %v12184_v31  ;;  %v6391_v10 = vpop.f32.mrf.mxu3  ;;  %v6264_v31 = vsel %vm470_vm0, %v6259_v29, %v6263_v51  ;;  %v9648_v52 = vld [vmem:[#allocation2 + $0x98] sm:$0xff] }
 0x4f8   : > { %v5439_v16 = vpop.f32.mrf.mxu1  ;;  %v6542_v38 = vrot.slane %v9648_v52, 1  ;;  %v9006_v29 = vld [vmem:[#allocation2 + $0x98] sm:$0xff] }
 0x4f9   : > { %v6465_v12 = vadd.f32 %v6391_v10, %v5969_v63  ;;  %v12343_v53 = vadd.f32 %v5439_v16, %v12150_v24  ;;  %v6271_v63 = vrot.slane %v12925_v9, 1  ;;  %v5771_v10 = vor.u32 %v5769_v5, %v5767_v14  ;;  %v5534_v9 = vld [vmem:[#allocation2 + $0xa0] sm:$0x1] }
 0x4fa   : > { %v6543_v36 = vsel %vm970_vm1, %v6540_v20, %v6542_v38  ;;  %v5781_v14 = vshll.u32 %v9006_v29, 16  ;;  %v12928_v20 = vshrl.u32 %v12924_v50, 16 }
 0x4fb   : > { %5937 = vmatmul.bf16.gmra.mxu2 %v5768_v8  ;;  %6692 = vmatmul.bf16.gmra.mxu0 %v6541_v37  ;;  %v12350_v28 = vadd.f32 %v6650_v1, %v6465_v12  ;;  %v6267_v12 = vor.u32 %v12926_v13, %v6263_v51  ;;  %v5777_v37 = vshrl.u32 %v9005_v11, 16  ;;  %v9649_v51 = vld [vmem:[#allocation2 + $0xa0] sm:$0xff] }
 0x4fc   : > { %6433 = vmatmul.bf16.gmra.mxu3 %v6264_v31  ;;  %v5783_v23 = vrot.slane %v5781_v14, 1  ;;  %v6544_v31 = vrot.slane %v9649_v51, 1  ;;  %v6275_v34 = vor.u32 %v12928_v20, %v6271_v63  ;;  %v12931_v14 = vld [vmem:[#allocation29_spill] sm:$0xff] }
 0x4fd   : > { %v6272_v57 = vsel %vm470_vm0, %v6267_v12, %v6271_v63 }
 0x4fe   : > { %v6545_v11 = vsel %vm970_vm1, %v6542_v38, %v6544_v31 }
 0x500   : > { %v5442_v17 = vpop.f32.mrf.mxu1 }
 0x501   : > { %v12353_v24 = vadd.f32 %v5442_v17, %v12159_v2  ;;  %v5776_v2 = vsel %vm470_vm0, %v5771_v10, %v5775_v58  ;;  %v6030_v17 = vld [vmem:[#allocation2 + $0xa8] sm:$0x1]  ;;  %v5779_v10 = vor.u32 %v5777_v37, %v5775_v58 }
 0x502   : > { %v6121_v13 = vunpack.c.l.b16 %v6030_v17 }
 0x503   : > { %6949 = vmatmul.bf16.gmra.mxu1 %v12923_v40  ;;  %v12929_v40 = vld [vmem:[#allocation14_spill] sm:$0xff]  ;;  %v5784_v12 = vsel %vm470_vm0, %v5779_v10, %v5783_v23 }
 0x504   : > { %v12930_v5 = vshll.u32 %v12929_v40, 16  ;;  %v6140_v50 = vpack.c.b16 %v6121_v13, %v6121_v13  ;;  %v12932_v38 = vshrl.u32 %v12929_v40, 16  ;;  %v7137_v13 = vld [vmem:[%s9744_s26 + $0xc] sm:$0xf] }
 0x506   : > { %v6279_v52 = vrot.slane %v12930_v5, 1  ;;  %v6285_v58 = vshll.u32 %v6140_v50, 16  ;;  %v6546_v37 = vrot.slane %v6140_v50, 1 }
 0x508   : > { %v5444_v26 = vpop.f32.mrf.mxu1  ;;  %v6283_v51 = vor.u32 %v12932_v38, %v6279_v52  ;;  %v6287_v17 = vrot.slane %v6285_v58, 1  ;;  %v12413_v58 = vld [vmem:[%s12710_s7] ss:$0 sm:$0xff] }
 0x509   : > { %v12359_v16 = vadd.f32 %v5444_v26, %v12172_v32  ;;  %v12927_v32 = vld [vmem:[#allocation27_spill] sm:$0xff] }
 0x50b   : > { %5942 = vmatmul.bf16.gmra.mxu2 %v5776_v2  ;;  %6697 = vmatmul.bf16.gmra.mxu0 %v6543_v36  ;;  %v5625_v2 = vunpack.c.l.b16 %v5534_v9  ;;  %v6280_v36 = vsel %vm470_vm0, %v6275_v34, %v6279_v52  ;;  %v6547_v9 = vsel %vm970_vm1, %v6544_v31, %v6546_v37 }
 0x50c   : > { %6438 = vmatmul.bf16.gmra.mxu3 %v6272_v57 }
 0x50d   : > { %v5644_v63 = vpack.c.b16 %v5625_v2, %v5625_v2  ;;  %v12405_v2 = vld [vmem:[%s12709_s6] ss:$0 sm:$0xff] }
 0x510   : > { %v5447_v1 = vpop.f32.mrf.mxu1 }
 0x511   : > { %v12367_v8 = vadd.f32 %v5447_v1, %v12178_v0 }
 0x513   : > { %6954 = vmatmul.bf16.gmra.mxu1 %v12927_v32  ;;  %v5785_v32 = vshrl.u32 %v9006_v29, 16 }
 0x515   : > { %v5787_v20 = vor.u32 %v5785_v32, %v5783_v23  ;;  %v12933_v23 = vld [vmem:[#allocation31_spill] sm:$0xff] }
 0x518   : > { %v5449_v26 = vpop.f32.mrf.mxu1 }
 0x519   : > { %v12375_v0 = vadd.f32 %v5449_v26, %v12191_v62  ;;  %v5789_v62 = vshll.u32 %v5644_v63, 16  ;;  %v6288_v26 = vsel %vm470_vm0, %v6283_v51, %v6287_v17  ;;  %v12934_v63 = vld [vmem:[#allocation6_spill] sm:$0xff] }
 0x51b   : > { %5947 = vmatmul.bf16.gmra.mxu2 %v5784_v12  ;;  %6702 = vmatmul.bf16.gmra.mxu0 %v6545_v11  ;;  %v5791_v34 = vrot.slane %v5789_v62, 1 }
 0x51c   : > { %6443 = vmatmul.bf16.gmra.mxu3 %v6280_v36  ;;  %v9427_v36 = vld [vmem:[%s9744_s26 + $0x10] sm:$0xff]  }
 0x51d   : > { %v5792_v29 = vsel %vm470_vm0, %v5787_v20, %v5791_v34 }
 0x520   : > { %v5452_v57 = vpop.f32.mrf.mxu1 }
 0x521   : > { %v12381_v1 = vadd.f32 %v5452_v57, %v12200_v47  ;;  %v9228_v57 = vunpack.c.l.bf16 %v9427_v36 }
 0x523   : > { %6959 = vmatmul.bf16.gmra.mxu1 %v12931_v14  ;;  %v7251_v32 = vrot.slane %v9228_v57, 3 }
 0x528   : > { %v5454_v5 = vpop.f32.mrf.mxu1 }
 0x529   : > { %v12388_v47 = vadd.f32 %v5454_v5, %v12213_v7  ;;  %v7136_v7 = vld [vmem:[%s9744_s26 + $0x8] sm:$0xe] }
 0x52a   : > { %v7173_v50 = vunpack.c.l.bf16 %v7136_v7 }
 0x52b   : > { %5952 = vmatmul.bf16.gmra.mxu2 %v5792_v29  ;;  %6707 = vmatmul.bf16.gmra.mxu0 %v6547_v9 }
 0x52c   : > { %6448 = vmatmul.bf16.gmra.mxu3 %v6288_v26 }
 0x530   : > { %v5457_v40 = vpop.f32.mrf.mxu1 }
 0x531   : > { %v12393_v52 = vadd.f32 %v5457_v40, %v12219_v6  ;;  %v7174_v6 = vunpack.c.l.bf16 %v7137_v13  ;;  %v12935_v13 = vld [vmem:[#allocation7_spill] sm:$0xff] }
 0x533   : > { %6964 = vmatmul.bf16.gmra.mxu1 %v12933_v23  ;;  %v7249_v62 = vrot.slane %v7174_v6, 3 }
 0x535   : > { %v7252_v20 = vsel %vm3046_vm4, %v7249_v62, %v7251_v32 }
 0x538   : > { %v5459_v10 = vpop.f32.mrf.mxu1 }
 0x539   : > { %v12397_v31 = vadd.f32 %v5459_v10, %v12232_v55  ;;  %v9428_v10 = vld [vmem:[%s9744_s26 + $0x18] sm:$0xff]  }
 0x540   : > { %v6930_v12 = vpop.f32.mrf.mxu1 }
 0x541   : > { %v7020_v11 = vadd.f32 %v6930_v12, %v12238_v41  ;;  %v7248_v41 = vrot.slane %v7173_v50, 3  ;;  %v9232_v12 = vunpack.c.l.bf16 %v9428_v10 }
 0x543   : > { %6969 = vmatmul.bf16.gmra.mxu1 %v12934_v63  ;;  %v7060_v55 = vmul.f32 %v12405_v2, %v7020_v11  ;;  %v7250_v51 = vsel %vm3046_vm4, %v7248_v41, %v7249_v62  ;;  %v7255_v63 = vrot.slane %v9232_v12, 3  ;;  %v12449_v12 = vpop.f32.mrf.mxu3 }
 0x545   : > { %v7100_v37 = vadd.f32 %v12413_v58, %v7060_v55 }
 0x547   : > { %v7357_v34 = vadd.f32 %v7250_v51, %v7100_v37 }
 0x548   : > { %v6932_v14 = vpop.f32.mrf.mxu1 }
 0x549   : > { %v7021_v38 = vadd.f32 %v6932_v14, %v12251_v43  ;;  %v7393_v29 = vmax.f32 %v7357_v34, 0.0  ;;  %v9229_v43 = vunpack.c.h.bf16 %v9427_v36  ;;  %v9429_v34 = vld [vmem:[%s9744_s26 + $0x20] sm:$0xff]  }
 0x54b   : > { %v7061_v17 = vmul.f32 %v12405_v2, %v7021_v38  ;;  %v7253_v50 = vrot.slane %v9229_v43, 3 }
 0x54d   : > { %v7101_v5 = vadd.f32 %v12413_v58, %v7061_v17  ;;  %v7254_v55 = vsel %vm3046_vm4, %v7251_v32, %v7253_v50  ;;  %v7256_v41 = vsel %vm3046_vm4, %v7253_v50, %v7255_v63 }
 0x54f   : > { %v7358_v9 = vadd.f32 %v7252_v20, %v7101_v5  ;;  %v9233_v5 = vunpack.c.h.bf16 %v9428_v10 }
 0x550   : > { %v6935_v26 = vpop.f32.mrf.mxu1 }
 0x551   : > { %v7394_v40 = vmax.f32 %v7358_v9, 0.0  ;;  %v7022_v23 = vadd.f32 %v6935_v26, %v12257_v22  ;;  %v9236_v26 = vunpack.c.l.bf16 %v9429_v34 }
 0x553   : > { %v9297_v7 = vpack.c.bf16 %v7394_v40, %v7393_v29  ;;  %6974 = vmatmul.bf16.gmra.mxu1 %v12935_v13  ;;  %v7062_v11 = vmul.f32 %v12405_v2, %v7022_v23  ;;  %v12443_v29 = vpop.f32.mrf.mxu2  ;;  %v7257_v40 = vrot.slane %v9233_v5, 3  ;;  %v7259_v43 = vrot.slane %v9236_v26, 3 }
 0x555   : > { %9298 = vst [vmem:[%s12427_s9] sm:$0xff] %v9297_v7   ;;  %v7102_v22 = vadd.f32 %v12413_v58, %v7062_v11  ;;  %v7260_v11 = vsel %vm3046_vm4, %v7257_v40, %v7259_v43 }
 0x557   : > { %v7359_v62 = vadd.f32 %v7254_v55, %v7102_v22  ;;  %v12453_v22 = vpop.f32.mrf.mxu0 }
 0x558   : > { %v6937_v6 = vpop.f32.mrf.mxu1 }
 0x559   : > { %v7023_v57 = vadd.f32 %v6937_v6, %v12270_v27  ;;  %v7395_v51 = vmax.f32 %v7359_v62, 0.0  ;;  %v12936_v27 = vld [vmem:[#allocation9_spill] sm:$0xff]  ;;  %v9430_v62 = vld [vmem:[%s9744_s26 + $0x28] sm:$0xff]  }
 0x55b   : > { %v7063_v36 = vmul.f32 %v12405_v2, %v7023_v57  ;;  %v12455_v55 = vpop.f32.mrf.mxu2 }
 0x55d   : > { %v7103_v14 = vadd.f32 %v12413_v58, %v7063_v36 }
 0x55f   : > { %v7360_v37 = vadd.f32 %v7256_v41, %v7103_v14  ;;  %v9237_v14 = vunpack.c.h.bf16 %v9429_v34  ;;  %v12464_v26 = vpop.f32.mrf.mxu0 }
 0x560   : > { %v6940_v38 = vpop.f32.mrf.mxu1 }
 0x561   : > { %v7396_v17 = vmax.f32 %v7360_v37, 0.0  ;;  %v7024_v20 = vadd.f32 %v6940_v38, %v12277_v35  ;;  %v7258_v35 = vsel %vm3046_vm4, %v7255_v63, %v7257_v40  ;;  %v12937_v38 = vld [vmem:[#allocation11_spill] sm:$0xff]  ;;  %v7261_v5 = vrot.slane %v9237_v14, 3 }
 0x563   : > { %v9302_v9 = vpack.c.bf16 %v7396_v17, %v7395_v51  ;;  %6979 = vmatmul.bf16.gmra.mxu1 %v12936_v27  ;;  %v7064_v32 = vmul.f32 %v12405_v2, %v7024_v20  ;;  %v9240_v51 = vunpack.c.l.bf16 %v9430_v62  ;;  %v12462_v20 = vpop.f32.mrf.mxu3  ;;  %v12468_v34 = vpop.f32.mrf.mxu2  ;;  %v7262_v40 = vsel %vm3046_vm4, %v7259_v43, %v7261_v5 }
 0x565   : > { %9444 = vst [vmem:[%s12427_s9 + $0x8] sm:$0xff] %v9302_v9   ;;  %v7104_v7 = vadd.f32 %v12413_v58, %v7064_v32  ;;  %v7263_v27 = vrot.slane %v9240_v51, 3 }
 0x567   : > { %v7361_v50 = vadd.f32 %v7258_v35, %v7104_v7  ;;  %v7264_v7 = vsel %vm3046_vm4, %v7261_v5, %v7263_v27 }
 0x568   : > { %v6942_v23 = vpop.f32.mrf.mxu1 }
 0x569   : > { %v7025_v13 = vadd.f32 %v6942_v23, %v12290_v56  ;;  %v7397_v41 = vmax.f32 %v7361_v50, 0.0 }
 0x56b   : > { %v7065_v10 = vmul.f32 %v12405_v2, %v7025_v13  ;;  %v12481_v14 = vpop.f32.mrf.mxu2 }
 0x56d   : > { %v7105_v6 = vadd.f32 %v12413_v58, %v7065_v10 }
 0x56f   : > { %v7362_v57 = vadd.f32 %v7260_v11, %v7105_v6  ;;  %v12474_v11 = vpop.f32.mrf.mxu3 }
 0x570   : > { %v6945_v36 = vpop.f32.mrf.mxu1 }
 0x571   : > { %v7398_v56 = vmax.f32 %v7362_v57, 0.0  ;;  %v7026_v63 = vadd.f32 %v6945_v36, %v12297_v15  ;;  %v9431_v36 = vld [vmem:[%s9744_s26 + $0x30] sm:$0xff]  }
 0x573   : > { %v9307_v37 = vpack.c.bf16 %v7398_v56, %v7397_v41  ;;  %6984 = vmatmul.bf16.gmra.mxu1 %v12937_v38  ;;  %v7066_v17 = vmul.f32 %v12405_v2, %v7026_v63  ;;  %v9241_v41 = vunpack.c.h.bf16 %v9430_v62  ;;  %v12478_v56 = vpop.f32.mrf.mxu0  ;;  %v12938_v63 = vld [vmem:[#allocation12_spill] sm:$0xff] }
 0x575   : > { %9445 = vst [vmem:[%s12427_s9 + $0x10] sm:$0xff] %v9307_v37   ;;  %v7106_v32 = vadd.f32 %v12413_v58, %v7066_v17  ;;  %v9244_v37 = vunpack.c.l.bf16 %v9431_v36  ;;  %v7265_v51 = vrot.slane %v9241_v41, 3 }
 0x577   : > { %v7363_v13 = vadd.f32 %v7262_v40, %v7106_v32  ;;  %v7267_v5 = vrot.slane %v9244_v37, 3  ;;  %v12487_v62 = vpop.f32.mrf.mxu3  ;;  %v7266_v32 = vsel %vm3046_vm4, %v7263_v27, %v7265_v51  ;;  %v9245_v27 = vunpack.c.h.bf16 %v9431_v36 }
 0x578   : > { %v6947_v9 = vpop.f32.mrf.mxu1 }
 0x579   : > { %v7027_v15 = vadd.f32 %v6947_v9, %v12310_v18  ;;  %v7399_v6 = vmax.f32 %v7363_v13, 0.0  ;;  %v7268_v40 = vsel %vm3046_vm4, %v7265_v51, %v7267_v5  ;;  %v7269_v51 = vrot.slane %v9245_v27, 3 }
 0x57b   : > { %v7067_v23 = vmul.f32 %v12405_v2, %v7027_v15 }
 0x57d   : > { %v7107_v35 = vadd.f32 %v12413_v58, %v7067_v23  ;;  %v12492_v23 = vpop.f32.mrf.mxu0 }
 0x57f   : > { %v7364_v10 = vadd.f32 %v7264_v7, %v7107_v35  ;;  %v12495_v35 = vpop.f32.mrf.mxu2 }
 0x580   : > { %v6950_v50 = vpop.f32.mrf.mxu1 }
 0x581   : > { %v7400_v57 = vmax.f32 %v7364_v10, 0.0  ;;  %v7028_v18 = vadd.f32 %v6950_v50, %v12317_v44 }
 0x583   : > { %v9312_v43 = vpack.c.bf16 %v7400_v57, %v7399_v6  ;;  %6989 = vmatmul.bf16.gmra.mxu1 %v12938_v63  ;;  %v7068_v38 = vmul.f32 %v12405_v2, %v7028_v18  ;;  %v9432_v18 = vld [vmem:[%s9744_s26 + $0x38] sm:$0xff]   ;;  %v12500_v63 = vpop.f32.mrf.mxu3 }
 0x584   : > { %v9248_v37 = vunpack.c.l.bf16 %v9432_v18 }
 0x585   : > { %9446 = vst [vmem:[%s12427_s9 + $0x18] sm:$0xff] %v9312_v43   ;;  %v7108_v9 = vadd.f32 %v12413_v58, %v7068_v38  ;;  %v12939_v43 = vld [vmem:[#allocation13_spill] sm:$0xff] }
 0x587   : > { %v7365_v7 = vadd.f32 %v7266_v32, %v7108_v9  ;;  %v12506_v9 = vpop.f32.mrf.mxu0  ;;  %v7271_v32 = vrot.slane %v9248_v37, 3 }
 0x588   : > { %v6952_v17 = vpop.f32.mrf.mxu1 }
 0x589   : > { %v7029_v44 = vadd.f32 %v6952_v17, %v12330_v42  ;;  %v7401_v6 = vmax.f32 %v7365_v7, 0.0  ;;  %v5970_v17 = vadd.f32 %v12443_v29, %v12195_v49 }
 0x58b   : > { %v7069_v15 = vmul.f32 %v12405_v2, %v7029_v44  ;;  %v12508_v44 = vpop.f32.mrf.mxu2  ;;  %v6466_v7 = vadd.f32 %v12449_v12, %v5970_v17 }
 0x58d   : > { %v7109_v13 = vadd.f32 %v12413_v58, %v7069_v15 }
 0x58f   : > { %v7366_v10 = vadd.f32 %v7268_v40, %v7109_v13  ;;  %v7270_v40 = vsel %vm3046_vm4, %v7267_v5, %v7269_v51  ;;  %v12522_v5 = vpop.f32.mrf.mxu0 }
 0x590   : > { %v6955_v50 = vpop.f32.mrf.mxu1 }
 0x591   : > { %v7402_v42 = vmax.f32 %v7366_v10, 0.0  ;;  %v7030_v57 = vadd.f32 %v6955_v50, %v12337_v48  ;;  %v7272_v10 = vsel %vm3046_vm4, %v7269_v51, %v7271_v32  ;;  %v12517_v50 = vpop.f32.mrf.mxu3 }
 0x593   : > { %v9317_v41 = vpack.c.bf16 %v7402_v42, %v7401_v6  ;;  %6994 = vmatmul.bf16.gmra.mxu1 %v12939_v43  ;;  %v7070_v38 = vmul.f32 %v12405_v2, %v7030_v57  ;;  %v5971_v6 = vadd.f32 %v12455_v55, %v12206_v21  ;;  %v9433_v43 = vld [vmem:[%s9744_s26 + $0x40] sm:$0xff]   ;;  %v12525_v37 = vpop.f32.mrf.mxu2  ;;  %v5972_v55 = vadd.f32 %v12468_v34, %v12217_v19 }
 0x595   : > { %9447 = vst [vmem:[%s12427_s9 + $0x20] sm:$0xff] %v9317_v41   ;;  %v7110_v36 = vadd.f32 %v12413_v58, %v7070_v38  ;;  %v9249_v38 = vunpack.c.h.bf16 %v9432_v18  ;;  %v6467_v51 = vadd.f32 %v12462_v20, %v5971_v6 }
 0x597   : > { %v7367_v49 = vadd.f32 %v7270_v40, %v7110_v36  ;;  %v9252_v36 = vunpack.c.l.bf16 %v9433_v43 }
 0x598   : > { %v6957_v48 = vpop.f32.mrf.mxu1 }
 0x599   : > { %v7031_v15 = vadd.f32 %v6957_v48, %v12350_v28  ;;  %v6725_v28 = vadd.f32 %v12453_v22, %v6466_v7  ;;  %v7403_v12 = vmax.f32 %v7367_v49, 0.0  ;;  %v12940_v48 = vld [vmem:[#allocation17_spill] sm:$0xff]  ;;  %v7273_v22 = vrot.slane %v9249_v38, 3  ;;  %v12534_v40 = vpop.f32.mrf.mxu3  ;;  %v9434_v38 = vld [vmem:[%s9744_s26 + $0x48] sm:$0xff]  }
 0x59a   : > { %v6468_v49 = vadd.f32 %v12474_v11, %v5972_v55 }
 0x59b   : > { %v7071_v13 = vmul.f32 %v12405_v2, %v7031_v15  ;;  %v6726_v15 = vadd.f32 %v12464_v26, %v6467_v51 }
 0x59d   : > { %v7111_v29 = vadd.f32 %v12413_v58, %v7071_v13  ;;  %v7275_v13 = vrot.slane %v9252_v36, 3 }
 0x59f   : > { %v7368_v42 = vadd.f32 %v7272_v10, %v7111_v29  ;;  %v7274_v10 = vsel %vm3046_vm4, %v7271_v32, %v7273_v22  ;;  %v12539_v29 = vpop.f32.mrf.mxu0  ;;  %v7276_v19 = vsel %vm3046_vm4, %v7273_v22, %v7275_v13  ;;  %v6727_v32 = vadd.f32 %v12478_v56, %v6468_v49 }
 0x5a0   : > { %v6960_v57 = vpop.f32.mrf.mxu1  ;;  %v9256_v22 = vunpack.c.l.bf16 %v9434_v38 }
 0x5a1   : > { %v7404_v27 = vmax.f32 %v7368_v42, 0.0  ;;  %v7032_v41 = vadd.f32 %v6960_v57, %v6725_v28  ;;  %v12542_v42 = vpop.f32.mrf.mxu2  ;;  %v5973_v28 = vadd.f32 %v12481_v14, %v12225_v39  ;;  %v12550_v51 = vpop.f32.mrf.mxu3 }
 0x5a3   : > { %v9322_v17 = vpack.c.bf16 %v7404_v27, %v7403_v12  ;;  %6999 = vmatmul.bf16.gmra.mxu1 %v12940_v48  ;;  %v7072_v21 = vmul.f32 %v12405_v2, %v7032_v41  ;;  %v6469_v48 = vadd.f32 %v12487_v62, %v5973_v28  ;;  %v5975_v28 = vadd.f32 %v12508_v44, %v12244_v60 }
 0x5a5   : > { %9448 = vst [vmem:[%s12427_s9 + $0x28] sm:$0xff] %v9322_v17   ;;  %v7112_v18 = vadd.f32 %v12413_v58, %v7072_v21  ;;  %v9253_v17 = vunpack.c.h.bf16 %v9433_v43  ;;  %v12941_v21 = vld [vmem:[#allocation35_spill] sm:$0xff] }
 0x5a7   : > { %v7369_v26 = vadd.f32 %v7274_v10, %v7112_v18  ;;  %v12554_v55 = vpop.f32.mrf.mxu0  ;;  %v7277_v14 = vrot.slane %v9253_v17, 3  ;;  %v7279_v18 = vrot.slane %v9256_v22, 3  ;;  %v6749_v10 = vld [vmem:[#allocation2 + $0xa8] sm:$0x3] }
 0x5a8   : > { %v6962_v7 = vpop.f32.mrf.mxu1 }
 0x5a9   : > { %v7033_v20 = vadd.f32 %v6962_v7, %v6726_v15  ;;  %v7405_v11 = vmax.f32 %v7369_v26, 0.0  ;;  %v12558_v56 = vpop.f32.mrf.mxu2  ;;  %v5974_v15 = vadd.f32 %v12495_v35, %v12236_v25  ;;  %v6728_v7 = vadd.f32 %v12492_v23, %v6469_v48  ;;  %v12567_v26 = vpop.f32.mrf.mxu3  ;;  %v9435_v48 = vld [vmem:[%s9744_s26 + $0x50] sm:$0xff]  }
 0x5aa   : > { %v7278_v49 = vsel %vm3046_vm4, %v7275_v13, %v7277_v14  ;;  %v6768_v25 = vunpack.c.l.b16 %v6749_v10  ;;  %v9260_v60 = vunpack.c.l.bf16 %v9435_v48 }
 0x5ab   : > { %v7073_v6 = vmul.f32 %v12405_v2, %v7033_v20 }
 0x5ad   : > { %v7113_v34 = vadd.f32 %v12413_v58, %v7073_v6  ;;  %v6470_v6 = vadd.f32 %v12500_v63, %v5974_v15 }
 0x5af   : > { %v7370_v57 = vadd.f32 %v7276_v19, %v7113_v34  ;;  %v7280_v34 = vsel %vm3046_vm4, %v7277_v14, %v7279_v18  ;;  %v6729_v63 = vadd.f32 %v12506_v9, %v6470_v6 }
 0x5b0   : > { %v6965_v12 = vpop.f32.mrf.mxu1 }
 0x5b1   : > { %v7406_v27 = vmax.f32 %v7370_v57, 0.0  ;;  %v7034_v41 = vadd.f32 %v6965_v12, %v6727_v32  ;;  %v12573_v57 = vpop.f32.mrf.mxu0  ;;  %v12576_v13 = vpop.f32.mrf.mxu2 }
 0x5b2   : > { %v12583_v15 = vpop.f32.mrf.mxu3 }
 0x5b3   : > { %v9327_v36 = vpack.c.bf16 %v7406_v27, %v7405_v11  ;;  %7004 = vmatmul.bf16.gmra.mxu1 %v12941_v21  ;;  %v7074_v39 = vmul.f32 %v12405_v2, %v7034_v41  ;;  %v6769_v11 = vpack.c.b16 %v6768_v25, %v6768_v25  ;;  %v6471_v21 = vadd.f32 %v12517_v50, %v5975_v28 }
 0x5b5   : > { %9449 = vst [vmem:[%s12427_s9 + $0x30] sm:$0xff] %v9327_v36   ;;  %v7114_v62 = vadd.f32 %v12413_v58, %v7074_v39  ;;  %v9257_v36 = vunpack.c.h.bf16 %v9434_v38  ;;  %v12942_v39 = vld [vmem:[#allocation36_spill] sm:$0xff]  ;;  %v6847_v44 = vshrl.u32 %v6769_v11, 16  ;;  %v6850_v14 = vshll.u32 %v6769_v11, 16 }
 0x5b7   : > { %v7371_v35 = vadd.f32 %v7278_v49, %v7114_v62  ;;  %v6730_v62 = vadd.f32 %v12522_v5, %v6471_v21  ;;  %v6849_v50 = vrot.slane %v6847_v44, 1  ;;  %v6852_v10 = vrot.slane %v6850_v14, 2  ;;  %v9436_v21 = vld [vmem:[%s9744_s26 + $0x58] sm:$0xff]  }
 0x5b8   : > { %v6967_v43 = vpop.f32.mrf.mxu1 }
 0x5b9   : > { %v7035_v20 = vadd.f32 %v6967_v43, %v6728_v7  ;;  %v7407_v27 = vmax.f32 %v7371_v35, 0.0  ;;  %v7281_v7 = vrot.slane %v9257_v36, 3  ;;  %v5976_v43 = vadd.f32 %v12525_v37, %v12255_v30  ;;  %v12588_v49 = vpop.f32.mrf.mxu0 }
 0x5ba   : > { %v6853_v5 = vor.u32 %v6852_v10, %v6849_v50  ;;  %v6419_v11 = vpop.f32.mrf.mxu3 }
 0x5bb   : > { %v7075_v19 = vmul.f32 %v12405_v2, %v7035_v20  ;;  %v7283_v20 = vrot.slane %v9260_v60, 3  ;;  %v7282_v25 = vsel %vm3046_vm4, %v7279_v18, %v7281_v7  ;;  %v6472_v35 = vadd.f32 %v12534_v40, %v5976_v43 }
 0x5bd   : > { %v7115_v23 = vadd.f32 %v12413_v58, %v7075_v19  ;;  %v7284_v30 = vsel %vm3046_vm4, %v7281_v7, %v7283_v20 }
 0x5bf   : > { %v7372_v32 = vadd.f32 %v7280_v34, %v7115_v23  ;;  %v5923_v34 = vpop.f32.mrf.mxu2 }
 0x5c0   : > { %v6970_v12 = vpop.f32.mrf.mxu1 }
 0x5c1   : > { %v7408_v41 = vmax.f32 %v7372_v32, 0.0  ;;  %v7036_v17 = vadd.f32 %v6970_v12, %v6729_v63  ;;  %v5977_v32 = vadd.f32 %v12542_v42, %v12263_v54  ;;  %v6731_v12 = vadd.f32 %v12539_v29, %v6472_v35  ;;  %v6678_v60 = vpop.f32.mrf.mxu0 }
 0x5c2   : > { %v9264_v42 = vunpack.c.l.bf16 %v9436_v21 }
 0x5c3   : > { %v9332_v22 = vpack.c.bf16 %v7408_v41, %v7407_v27  ;;  %7009 = vmatmul.bf16.gmra.mxu1 %v12942_v39  ;;  %v7076_v9 = vmul.f32 %v12405_v2, %v7036_v17  ;;  %v12943_v27 = vld [vmem:[#allocation16_spill] sm:$0xff]  ;;  %v6473_v39 = vadd.f32 %v12550_v51, %v5977_v32  ;;  %v6421_v51 = vpop.f32.mrf.mxu3  ;;  %v9265_v32 = vunpack.c.h.bf16 %v9436_v21 }
 0x5c4   : > { %v6854_v40 = vsel %vm1615_vm2, %v12943_v27, %v6853_v5 }
 0x5c5   : > { %9450 = vst [vmem:[%s12427_s9 + $0x38] sm:$0xff] %v9332_v22   ;;  %v7116_v6 = vadd.f32 %v12413_v58, %v7076_v9  ;;  %v9261_v22 = vunpack.c.h.bf16 %v9435_v48  ;;  %v5978_v9 = vadd.f32 %v12558_v56, %v12274_v59  ;;  %v6732_v7 = vadd.f32 %v12554_v55, %v6473_v39 }
 0x5c6   : > { %v5979_v56 = vadd.f32 %v12576_v13, %v12283_v3  ;;  %v5980_v3 = vadd.f32 %v5923_v34, %v12294_v4 }
 0x5c7   : > { %v7373_v37 = vadd.f32 %v7282_v25, %v7116_v6  ;;  %v5925_v54 = vpop.f32.mrf.mxu2  ;;  %v7285_v14 = vrot.slane %v9261_v22, 3  ;;  %v6474_v10 = vadd.f32 %v12567_v26, %v5978_v9 }
 0x5c8   : > { %v6972_v38 = vpop.f32.mrf.mxu1 }
 0x5c9   : > { %v7037_v19 = vadd.f32 %v6972_v38, %v6730_v62  ;;  %v7409_v41 = vmax.f32 %v7373_v37, 0.0  ;;  %v7287_v62 = vrot.slane %v9264_v42, 3  ;;  %v7286_v50 = vsel %vm3046_vm4, %v7283_v20, %v7285_v14  ;;  %v6680_v25 = vpop.f32.mrf.mxu0 }
 0x5cb   : > { %v7077_v23 = vmul.f32 %v12405_v2, %v7037_v19  ;;  %v7288_v19 = vsel %vm3046_vm4, %v7285_v14, %v7287_v62 }
 0x5cd   : > { %v7117_v28 = vadd.f32 %v12413_v58, %v7077_v23 }
 0x5cf   : > { %v7374_v63 = vadd.f32 %v7284_v30, %v7117_v28  ;;  %v5928_v55 = vpop.f32.mrf.mxu2  ;;  %v6733_v30 = vadd.f32 %v12573_v57, %v6474_v10  ;;  %v9437_v28 = vld [vmem:[%s9744_s26 + $0x60] sm:$0xff]  }
 0x5d0   : > { %v6975_v18 = vpop.f32.mrf.mxu1  ;;  %v9268_v27 = vunpack.c.l.bf16 %v9437_v28 }
 0x5d1   : > { %v7410_v17 = vmax.f32 %v7374_v63, 0.0  ;;  %v7038_v36 = vadd.f32 %v6975_v18, %v6731_v12  ;;  %v6475_v63 = vadd.f32 %v12583_v15, %v5979_v56  ;;  %v6424_v18 = vpop.f32.mrf.mxu3  ;;  %v6683_v13 = vpop.f32.mrf.mxu0 }
 0x5d2   : > { %v7291_v22 = vrot.slane %v9268_v27, 3 }
 0x5d3   : > { %v9337_v44 = vpack.c.bf16 %v7410_v17, %v7409_v41  ;;  %7014 = vmatmul.bf16.gmra.mxu1 %v6854_v40  ;;  %v7078_v29 = vmul.f32 %v12405_v2, %v7038_v36  ;;  %v7289_v41 = vrot.slane %v9265_v32, 3  ;;  %v6734_v57 = vadd.f32 %v12588_v49, %v6475_v63 }
 0x5d4   : > { %v5981_v49 = vadd.f32 %v5925_v54, %v12303_v61 }
 0x5d5   : > { %9451 = vst [vmem:[%s12427_s9 + $0x40] sm:$0xff] %v9337_v44   ;;  %v7118_v48 = vadd.f32 %v12413_v58, %v7078_v29  ;;  %v7290_v15 = vsel %vm3046_vm4, %v7287_v62, %v7289_v41  ;;  %v6476_v44 = vadd.f32 %v6419_v11, %v5980_v3  ;;  %v7292_v29 = vsel %vm3046_vm4, %v7289_v41, %v7291_v22  ;;  %v9438_v62 = vld [vmem:[%s9744_s26 + $0x68] sm:$0xff]  }
 0x5d7   : > { %v7375_v35 = vadd.f32 %v7286_v50, %v7118_v48  ;;  %v5930_v17 = vpop.f32.mrf.mxu2 }
 0x5d8   : > { %v6977_v43 = vpop.f32.mrf.mxu1 }
 0x5d9   : > { %v7039_v38 = vadd.f32 %v6977_v43, %v6732_v7  ;;  %v7411_v20 = vmax.f32 %v7375_v35, 0.0  ;;  %v6426_v34 = vpop.f32.mrf.mxu3  ;;  %v6735_v7 = vadd.f32 %v6678_v60, %v6476_v44  ;;  %v6685_v48 = vpop.f32.mrf.mxu0 }
 0x5db   : > { %v7079_v6 = vmul.f32 %v12405_v2, %v7039_v38 }
 0x5dd   : > { %v7119_v59 = vadd.f32 %v12413_v58, %v7079_v6  ;;  %v9269_v6 = vunpack.c.h.bf16 %v9437_v28 }
 0x5df   : > { %v7376_v23 = vadd.f32 %v7288_v19, %v7119_v59  ;;  %v5933_v11 = vpop.f32.mrf.mxu2  ;;  %v6477_v19 = vadd.f32 %v6421_v51, %v5981_v49  ;;  %v9272_v59 = vunpack.c.l.bf16 %v9438_v62 }
 0x5e0   : > { %v6980_v5 = vpop.f32.mrf.mxu1 }
 0x5e1   : > { %v7412_v37 = vmax.f32 %v7376_v23, 0.0  ;;  %v7040_v26 = vadd.f32 %v6980_v5, %v6733_v30  ;;  %v7293_v23 = vrot.slane %v9269_v6, 3  ;;  %v5982_v30 = vadd.f32 %v5928_v55, %v12314_v45  ;;  %v6429_v54 = vpop.f32.mrf.mxu3  ;;  %v6688_v51 = vpop.f32.mrf.mxu0 }
 0x5e2   : > { %v6736_v61 = vadd.f32 %v6680_v25, %v6477_v19  ;;  %v7295_v5 = vrot.slane %v9272_v59, 3  ;;  %v5983_v25 = vadd.f32 %v5930_v17, %v12323_v46  ;;  %v5984_v46 = vadd.f32 %v5933_v11, %v12334_v33 }
 0x5e3   : > { %v9342_v12 = vpack.c.bf16 %v7412_v37, %v7411_v20  ;;  %v7080_v40 = vmul.f32 %v12405_v2, %v7040_v26  ;;  %v7294_v26 = vsel %vm3046_vm4, %v7291_v22, %v7293_v23  ;;  %v6478_v28 = vadd.f32 %v6424_v18, %v5982_v30  ;;  %v9439_v22 = vld [vmem:[%s9744_s26 + $0x70] sm:$0xff]  }
 0x5e4   : > { %v9276_v44 = vunpack.c.l.bf16 %v9439_v22 }
 0x5e5   : > { %9452 = vst [vmem:[%s12427_s9 + $0x48] sm:$0xff] %v9342_v12   ;;  %v7120_v39 = vadd.f32 %v12413_v58, %v7080_v40  ;;  %v7296_v12 = vsel %vm3046_vm4, %v7293_v23, %v7295_v5  ;;  %v6737_v40 = vadd.f32 %v6683_v13, %v6478_v28 }
 0x5e6   : > { %v7299_v49 = vrot.slane %v9276_v44, 3 }
 0x5e7   : > { %v7377_v14 = vadd.f32 %v7290_v15, %v7120_v39  ;;  %v5935_v63 = vpop.f32.mrf.mxu2  ;;  %v9273_v39 = vunpack.c.h.bf16 %v9438_v62 }
 0x5e8   : > { %v6982_v36 = vpop.f32.mrf.mxu1  ;;  %v5985_v33 = vadd.f32 %v5935_v63, %v12343_v53 }
 0x5e9   : > { %v7041_v21 = vadd.f32 %v6982_v36, %v6734_v57  ;;  %v7413_v38 = vmax.f32 %v7377_v14, 0.0  ;;  %v6431_v18 = vpop.f32.mrf.mxu3 }
 0x5eb   : > { %v7081_v42 = vmul.f32 %v12405_v2, %v7041_v21  ;;  %v6479_v21 = vadd.f32 %v6426_v34, %v5983_v25  ;;  %v6480_v34 = vadd.f32 %v6429_v54, %v5984_v46  ;;  %v9277_v54 = vunpack.c.h.bf16 %v9439_v22 }
 0x5ed   : > { %v7121_v4 = vadd.f32 %v12413_v58, %v7081_v42  ;;  %v6690_v42 = vpop.f32.mrf.mxu0  ;;  %v6738_v17 = vadd.f32 %v6685_v48, %v6479_v21  ;;  %v6739_v19 = vadd.f32 %v6688_v51, %v6480_v34  ;;  %v7301_v28 = vrot.slane %v9277_v54, 3 }
 0x5ef   : > { %v7378_v9 = vadd.f32 %v7292_v29, %v7121_v4  ;;  %v5938_v14 = vpop.f32.mrf.mxu2  ;;  %v7297_v4 = vrot.slane %v9273_v39, 3 }
 0x5f0   : > { %v6985_v43 = vpop.f32.mrf.mxu1  ;;  %v5986_v53 = vadd.f32 %v5938_v14, %v12353_v24 }
 0x5f1   : > { %v7414_v50 = vmax.f32 %v7378_v9, 0.0  ;;  %v7042_v10 = vadd.f32 %v6985_v43, %v6735_v7  ;;  %v7298_v43 = vsel %vm3046_vm4, %v7295_v5, %v7297_v4 }
 0x5f3   : > { %v9347_v35 = vpack.c.bf16 %v7414_v50, %v7413_v38  ;;  %v7082_v56 = vmul.f32 %v12405_v2, %v7042_v10  ;;  %v6434_v50 = vpop.f32.mrf.mxu3  ;;  %v7300_v10 = vsel %vm3046_vm4, %v7297_v4, %v7299_v49 }
 0x5f5   : > { %9453 = vst [vmem:[%s12427_s9 + $0x50] sm:$0xff] %v9347_v35   ;;  %v7122_v20 = vadd.f32 %v12413_v58, %v7082_v56  ;;  %v6693_v48 = vpop.f32.mrf.mxu0 }
 0x5f7   : > { %v7379_v27 = vadd.f32 %v7294_v26, %v7122_v20  ;;  %v5940_v35 = vpop.f32.mrf.mxu2 }
 0x5f8   : > { %v6987_v60 = vpop.f32.mrf.mxu1  ;;  %v5987_v24 = vadd.f32 %v5940_v35, %v12359_v16 }
 0x5f9   : > { %v7043_v37 = vadd.f32 %v6987_v60, %v6736_v61  ;;  %v7415_v3 = vmax.f32 %v7379_v27, 0.0  ;;  %v9440_v61 = vld [vmem:[%s9744_s26 + $0x78] sm:$0xff]   ;;  %v6481_v60 = vadd.f32 %v6431_v18, %v5985_v33 }
 0x5fa   : > { %v9280_v20 = vunpack.c.l.bf16 %v9440_v61  ;;  %v9281_v14 = vunpack.c.h.bf16 %v9440_v61 }
 0x5fb   : > { %v7083_v32 = vmul.f32 %v12405_v2, %v7043_v37  ;;  %v6436_v26 = vpop.f32.mrf.mxu3 }
 0x5fc   : > { %v7303_v51 = vrot.slane %v9280_v20, 3  ;;  %v6483_v4 = vadd.f32 %v6436_v26, %v5987_v24  ;;  %v9442_v20 = vld [vmem:[%s9744_s26 + $0x88] sm:$0xff]  }
 0x5fd   : > { %v7123_v45 = vadd.f32 %v12413_v58, %v7083_v32  ;;  %v6740_v32 = vadd.f32 %v6690_v42, %v6481_v60 }
 0x5ff   : > { %v7380_v55 = vadd.f32 %v7296_v12, %v7123_v45  ;;  %v6695_v12 = vpop.f32.mrf.mxu0  ;;  %v5943_v25 = vpop.f32.mrf.mxu2 }
 0x600   : > { %v6990_v41 = vpop.f32.mrf.mxu1  ;;  %v5988_v16 = vadd.f32 %v5943_v25, %v12367_v8 }
 0x601   : > { %v7416_v57 = vmax.f32 %v7380_v55, 0.0  ;;  %v7044_v36 = vadd.f32 %v6990_v41, %v6737_v40  ;;  %v7302_v55 = vsel %vm3046_vm4, %v7299_v49, %v7301_v28  ;;  %v6482_v40 = vadd.f32 %v6434_v50, %v5986_v53 }
 0x603   : > { %v9352_v15 = vpack.c.bf16 %v7416_v57, %v7415_v3  ;;  %v7084_v29 = vmul.f32 %v12405_v2, %v7044_v36  ;;  %v7304_v3 = vsel %vm3046_vm4, %v7301_v28, %v7303_v51  ;;  %v6741_v18 = vadd.f32 %v6693_v48, %v6482_v40  ;;  %v6439_v39 = vpop.f32.mrf.mxu3 }
 0x604   : > { %v6484_v33 = vadd.f32 %v6439_v39, %v5988_v16 }
 0x605   : > { %9454 = vst [vmem:[%s12427_s9 + $0x58] sm:$0xff] %v9352_v15   ;;  %v7124_v9 = vadd.f32 %v12413_v58, %v7084_v29  ;;  %v9441_v29 = vld [vmem:[%s9744_s26 + $0x80] sm:$0xff]  }
 0x606   : > { %v9284_v49 = vunpack.c.l.bf16 %v9441_v29 }
 0x607   : > { %v7381_v62 = vadd.f32 %v7298_v43, %v7124_v9  ;;  %v6698_v46 = vpop.f32.mrf.mxu0  ;;  %v6742_v43 = vadd.f32 %v6695_v12, %v6483_v4  ;;  %v9443_v4 = vld [vmem:[%s9744_s26 + $0x90] sm:$0xff]  }
 0x608   : > { %v6992_v13 = vpop.f32.mrf.mxu1 }
 0x609   : > { %v7045_v7 = vadd.f32 %v6992_v13, %v6738_v17  ;;  %v7417_v56 = vmax.f32 %v7381_v62, 0.0  ;;  %v5945_v13 = vpop.f32.mrf.mxu2 }
 0x60b   : > { %v7085_v38 = vmul.f32 %v12405_v2, %v7045_v7  ;;  %v7305_v7 = vrot.slane %v9281_v14, 3  ;;  %v6441_v62 = vpop.f32.mrf.mxu3 }
 0x60d   : > { %v7125_v6 = vadd.f32 %v12413_v58, %v7085_v38  ;;  %v7307_v38 = vrot.slane %v9284_v49, 3 }
 0x60f   : > { %v7382_v11 = vadd.f32 %v7300_v10, %v7125_v6  ;;  %v7306_v6 = vsel %vm3046_vm4, %v7303_v51, %v7305_v7 }
 0x610   : > { %v6995_v59 = vpop.f32.mrf.mxu1 }
 0x611   : > { %v7418_v23 = vmax.f32 %v7382_v11, 0.0  ;;  %v7046_v30 = vadd.f32 %v6995_v59, %v6739_v19  ;;  %v7308_v11 = vsel %vm3046_vm4, %v7305_v7, %v7307_v38  ;;  %v6700_v19 = vpop.f32.mrf.mxu0  ;;  %v5948_v59 = vpop.f32.mrf.mxu2  ;;  %v9292_v7 = vunpack.c.l.bf16 %v9443_v4 }
 0x613   : > { %v9357_v5 = vpack.c.bf16 %v7418_v23, %v7417_v56  ;;  %v7086_v37 = vmul.f32 %v12405_v2, %v7046_v30  ;;  %v5989_v56 = vadd.f32 %v5945_v13, %v12375_v0  ;;  %v6743_v30 = vadd.f32 %v6698_v46, %v6484_v33  ;;  %v6444_v53 = vpop.f32.mrf.mxu3 }
 0x614   : > { %v9289_v13 = vunpack.c.h.bf16 %v9442_v20 }
 0x615   : > { %9455 = vst [vmem:[%s12427_s9 + $0x60] sm:$0xff] %v9357_v5   ;;  %v7126_v27 = vadd.f32 %v12413_v58, %v7086_v37  ;;  %v9285_v37 = vunpack.c.h.bf16 %v9441_v29  ;;  %v6485_v26 = vadd.f32 %v6441_v62, %v5989_v56 }
 0x617   : > { %v7383_v57 = vadd.f32 %v7302_v55, %v7126_v27  ;;  %v7309_v51 = vrot.slane %v9285_v37, 3  ;;  %v5990_v27 = vadd.f32 %v5948_v59, %v12381_v1  ;;  %v6744_v0 = vadd.f32 %v6700_v19, %v6485_v26  ;;  %v7172_v37 = vld [vmem:[%s9744_s26 + $0x98] sm:$0x3] }
 0x618   : > { %v6997_v63 = vpop.f32.mrf.mxu1  ;;  %v9293_v26 = vunpack.c.h.bf16 %v9443_v4 }
 0x619   : > { %v7047_v45 = vadd.f32 %v6997_v63, %v6740_v32  ;;  %v7419_v15 = vmax.f32 %v7383_v57, 0.0  ;;  %v9288_v32 = vunpack.c.l.bf16 %v9442_v20  ;;  %v6703_v12 = vpop.f32.mrf.mxu0  ;;  %v6486_v57 = vadd.f32 %v6444_v53, %v5990_v27 }
 0x61b   : > { %v7087_v41 = vmul.f32 %v12405_v2, %v7047_v45  ;;  %v5950_v45 = vpop.f32.mrf.mxu2  ;;  %v7311_v55 = vrot.slane %v9288_v32, 3  ;;  %v6446_v1 = vpop.f32.mrf.mxu3  ;;  %v7209_v32 = vunpack.c.l.bf16 %v7172_v37 }
 0x61c   : > { %v5991_v39 = vadd.f32 %v5950_v45, %v12388_v47 }
 0x61d   : > { %v7127_v36 = vadd.f32 %v12413_v58, %v7087_v41  ;;  %v7312_v24 = vsel %vm3046_vm4, %v7309_v51, %v7311_v55  ;;  %v7319_v27 = vrot.slane %v7209_v32, 3 }
 0x61e   : > { %v6487_v49 = vadd.f32 %v6446_v1, %v5991_v39 }
 0x61f   : > { %v7384_v22 = vadd.f32 %v7304_v3, %v7127_v36  ;;  %v7310_v3 = vsel %vm3046_vm4, %v7307_v38, %v7309_v51  ;;  %v7317_v51 = vrot.slane %v9293_v26, 3 }
 0x620   : > { %v7000_v21 = vpop.f32.mrf.mxu1 }
 0x621   : > { %v7420_v44 = vmax.f32 %v7384_v22, 0.0  ;;  %v7048_v42 = vadd.f32 %v7000_v21, %v6741_v18  ;;  %v6705_v46 = vpop.f32.mrf.mxu0 }
 0x622   : > { %v6746_v38 = vadd.f32 %v6705_v46, %v6487_v49 }
 0x623   : > { %v9362_v17 = vpack.c.bf16 %v7420_v44, %v7419_v15  ;;  %v7088_v9 = vmul.f32 %v12405_v2, %v7048_v42  ;;  %v6745_v15 = vadd.f32 %v6703_v12, %v6486_v57 }
 0x625   : > { %9456 = vst [vmem:[%s12427_s9 + $0x68] sm:$0xff] %v9362_v17   ;;  %v7128_v50 = vadd.f32 %v12413_v58, %v7088_v9  ;;  %v5953_v17 = vpop.f32.mrf.mxu2 }
 0x626   : > { %v5992_v47 = vadd.f32 %v5953_v17, %v12393_v52 }
 0x627   : > { %v7385_v35 = vadd.f32 %v7306_v6, %v7128_v50 }
 0x628   : > { %v7002_v34 = vpop.f32.mrf.mxu1 }
 0x629   : > { %v7049_v10 = vadd.f32 %v7002_v34, %v6742_v43  ;;  %v7421_v54 = vmax.f32 %v7385_v35, 0.0  ;;  %v6449_v43 = vpop.f32.mrf.mxu3  ;;  %v7313_v34 = vrot.slane %v9289_v13, 3  ;;  %v6708_v33 = vpop.f32.mrf.mxu0 }
 0x62b   : > { %v7089_v48 = vmul.f32 %v12405_v2, %v7049_v10  ;;  %v7315_v10 = vrot.slane %v9292_v7, 3 }
 0x62d   : > { %v7129_v8 = vadd.f32 %v12413_v58, %v7089_v48  ;;  %v7314_v48 = vsel %vm3046_vm4, %v7311_v55, %v7313_v34  ;;  %v5955_v35 = vpop.f32.mrf.mxu2  ;;  %v7318_v55 = vsel %vm3046_vm4, %v7315_v10, %v7317_v51 }
 0x62f   : > { %v7386_v23 = vadd.f32 %v7308_v11, %v7129_v8  ;;  %v6488_v11 = vadd.f32 %v6449_v43, %v5992_v47  ;;  %v7316_v8 = vsel %vm3046_vm4, %v7313_v34, %v7315_v10 }
 0x630   : > { %v7005_v61 = vpop.f32.mrf.mxu1 }
 0x631   : > { %v7422_v60 = vmax.f32 %v7386_v23, 0.0  ;;  %v7050_v5 = vadd.f32 %v7005_v61, %v6743_v30  ;;  %v6747_v56 = vadd.f32 %v6708_v33, %v6488_v11  ;;  %v5993_v23 = vadd.f32 %v5955_v35, %v12397_v31  ;;  %v6451_v61 = vpop.f32.mrf.mxu3  ;;  %v6710_v53 = vpop.f32.mrf.mxu0 }
 0x633   : > { %v9367_v28 = vpack.c.bf16 %v7422_v60, %v7421_v54  ;;  %v7090_v63 = vmul.f32 %v12405_v2, %v7050_v5 }
 0x635   : > { %9457 = vst [vmem:[%s12427_s9 + $0x70] sm:$0xff] %v9367_v28   ;;  %v7130_v40 = vadd.f32 %v12413_v58, %v7090_v63  ;;  %v6489_v28 = vadd.f32 %v6451_v61, %v5993_v23 }
 0x637   : > { %v7387_v22 = vadd.f32 %v7310_v3, %v7130_v40  ;;  %v6748_v31 = vadd.f32 %v6710_v53, %v6489_v28 }
 0x638   : > { %v7007_v25 = vpop.f32.mrf.mxu1 }
 0x639   : > { %v7051_v41 = vadd.f32 %v7007_v25, %v6744_v0  ;;  %v7423_v42 = vmax.f32 %v7387_v22, 0.0  ;;  %v9651_v0 = vld [vmem:[%s12710_s7] ss:$0 sm:$0xff] }
 0x63b   : > { %v7091_v36 = vmul.f32 %v12405_v2, %v7051_v41  ;;  %v7320_v41 = vsel %vm3046_vm4, %v7317_v51, %v7319_v27 }
 0x63d   : > { %v7131_v18 = vadd.f32 %v12413_v58, %v7091_v36 }
 0x63f   : > { %v7388_v21 = vadd.f32 %v7312_v24, %v7131_v18 }
 0x640   : > { %v7010_v44 = vpop.f32.mrf.mxu1 }
 0x641   : > { %v7424_v29 = vmax.f32 %v7388_v21, 0.0  ;;  %v7052_v14 = vadd.f32 %v7010_v44, %v6745_v15 }
 0x643   : > { %v9372_v9 = vpack.c.bf16 %v7424_v29, %v7423_v42  ;;  %v7092_v16 = vmul.f32 %v12405_v2, %v7052_v14 }
 0x645   : > { %9458 = vst [vmem:[%s12427_s9 + $0x78] sm:$0xff] %v9372_v9   ;;  %v7132_v62 = vadd.f32 %v12413_v58, %v7092_v16 }
 0x647   : > { %v7389_v59 = vadd.f32 %v7314_v48, %v7132_v62 }
 0x648   : > { %v7012_v50 = vpop.f32.mrf.mxu1 }
 0x649   : > { %v7053_v6 = vadd.f32 %v7012_v50, %v6746_v38  ;;  %v7425_v60 = vmax.f32 %v7389_v59, 0.0 }
 0x64b   : > { %v7093_v19 = vmul.f32 %v12405_v2, %v7053_v6 }
 0x64d   : > { %v7133_v52 = vadd.f32 %v12413_v58, %v7093_v19  ;;  %v9650_v58 = vld [vmem:[%s12709_s6] ss:$0 sm:$0xff] }
 0x64f   : > { %v7390_v30 = vadd.f32 %v7316_v8, %v7133_v52 }
 0x650   : > { %v7015_v54 = vpop.f32.mrf.mxu1 }
 0x651   : > { %v7426_v5 = vmax.f32 %v7390_v30, 0.0  ;;  %v7054_v20 = vadd.f32 %v7015_v54, %v6747_v56 }
 0x653   : > { %v9377_v2 = vpack.c.bf16 %v7426_v5, %v7425_v60  ;;  %v7094_v63 = vmul.f32 %v9650_v58, %v7054_v20 }
 0x655   : > { %9459 = vst [vmem:[%s12427_s9 + $0x80] sm:$0xff] %v9377_v2   ;;  %v7134_v45 = vadd.f32 %v9651_v0, %v7094_v63 }
 0x657   : > { %v7391_v3 = vadd.f32 %v7318_v55, %v7134_v45 }
 0x658   : > { %v7017_v12 = vpop.f32.mrf.mxu1 }
 0x659   : > { %v7055_v25 = vadd.f32 %v7017_v12, %v6748_v31  ;;  %v7427_v24 = vmax.f32 %v7391_v3, 0.0 }
 0x65b   : > { %v7095_v40 = vmul.f32 %v9650_v58, %v7055_v25 }
 0x65d   : > { %v7135_v57 = vadd.f32 %v9651_v0, %v7095_v40 }
 0x65f   : > { %v7392_v36 = vadd.f32 %v7320_v41, %v7135_v57 }
 0x661   : > { %v7428_v22 = vmax.f32 %v7392_v36, 0.0 }
 0x663   : > { %v9382_v18 = vpack.c.bf16 %v7428_v22, %v7427_v24 }
 0x665   : > { %9460 = vst [vmem:[%s12427_s9 + $0x88] sm:$0xff] %v9382_v18  }
 0x666 PF: > { %s18_s27 = sadd.s32 1, %s9658_s27  }
 0x667   : > { %p15_p4 = scmp.ge.s32.totalorder %s18_s27, 4  }
 0x669   :  { %17 = sbr.rel (!%p15_p4) target bundleno = 1 (0x1), region = 98 }

</bundles_post_ra>
